<compile_context>
chip_gen: v7x
topology: tpu7x:2x2x1
jax: 0.10.0
libtpu: 0.0.40
codegen_flags: <defaults>
</compile_context>

<pallas_src>
import functools

import jax
import jax.numpy as jnp
from jax.experimental import pallas as pl
from jax.experimental.pallas import tpu as pltpu


# ------------------------------- fused kernel --------------------------------


def _bilstm_fused_kernel(ids_ref, embfc_ref, fc1b_ref,
                         wih0_ref, whh0_ref, b0_ref,
                         wih1_ref, whh1_ref, b1_ref,
                         dw_ref, db_ref,
                         o_ref, y0_ref,
                         *, seq_len, batch, hidden, vocab):
    """Whole BiLSTM forward in one kernel.

    ids_ref   : (S*B, 1)  int32  token ids, position-major (row = s*B + b)
    embfc_ref : (V, E)    bf16   embedding @ fc1_w (folded on host)
    fc1b_ref  : (1, E)    f32    fc1 bias
    wih*_ref  : (in, 8H)  bf16   cols = [fwd i,f,o,g | bwd i,f,o,g], i/f/o pre-scaled x0.5
    whh*_ref  : (2H, 8H)  bf16   block-diagonal, same column layout / scaling
    b*_ref    : (1, 8H)   f32    combined (b_ih + b_hh) biases, same layout / scaling
    dw_ref    : (4H, 2)   bf16   decoder weight, rows = [fwd@0, bwd@0, fwd@T-1, bwd@T-1]
    db_ref    : (1, 2)    f32
    o_ref     : (B, 2)    f32    logits
    y0_ref    : (S*B, 2H) f32    VMEM scratch: layer-0 outputs, position-major
    """
    H = hidden
    SB = seq_len * batch

    # ---- embedding gather (one-hot MXU matmul) + fc1 + tanh, fused ----
    ids = ids_ref[...]                                               # (S*B, 1) int32
    vocab_iota = jax.lax.broadcasted_iota(jnp.int32, (SB, vocab), 1)
    one_hot = (vocab_iota == ids).astype(jnp.bfloat16)               # exact 0/1 in bf16
    x0 = jnp.tanh(
        jnp.dot(one_hot, embfc_ref[...], preferred_element_type=jnp.float32)
        + fc1b_ref[...])                                             # (S*B, E) f32

    def run_layer(x, wih_ref, whh_ref, b_ref, store_outputs):
        # Hoisted input projection for ALL timesteps and BOTH directions;
        # only h @ W_hh remains on the serial recurrence.
        xg = jnp.dot(x.astype(jnp.bfloat16), wih_ref[...],
                     preferred_element_type=jnp.float32) + b_ref[...]   # (S*B, 8H)
        whh = whh_ref[...]                                              # (2H, 8H) bf16
        h = jnp.zeros((batch, 2 * H), jnp.float32)                      # [h_fwd | h_bwd]
        c_f = jnp.zeros((batch, H), jnp.float32)
        c_b = jnp.zeros((batch, H), jnp.float32)
        ends = []
        for s in range(seq_len):                    # fully unrolled (static, small)
            r = seq_len - 1 - s                     # position consumed by backward dir
            hg = jnp.dot(h.astype(jnp.bfloat16), whh,
                         preferred_element_type=jnp.float32)            # (B, 8H)
            gate_f = xg[s * batch:(s + 1) * batch, 0:4 * H] + hg[:, 0:4 * H]
            gate_b = xg[r * batch:(r + 1) * batch, 4 * H:8 * H] + hg[:, 4 * H:8 * H]
            # One tanh over the full 128-lane gate block per direction: i/f/o
            # preactivations were pre-scaled by 0.5, so sigmoid(x) = 0.5*tanh(x/2)+0.5,
            # while the g column keeps its plain tanh.
            t_f = jnp.tanh(gate_f)
            t_b = jnp.tanh(gate_b)
            p_f = t_f * 0.5 + 0.5                   # sigmoid values for cols [i, f, o]
            p_b = t_b * 0.5 + 0.5
            c_f = p_f[:, H:2 * H] * c_f + p_f[:, 0:H] * t_f[:, 3 * H:4 * H]
            c_b = p_b[:, H:2 * H] * c_b + p_b[:, 0:H] * t_b[:, 3 * H:4 * H]
            h_f = p_f[:, 2 * H:3 * H] * jnp.tanh(c_f)
            h_b = p_b[:, 2 * H:3 * H] * jnp.tanh(c_b)
            h = jnp.concatenate([h_f, h_b], axis=-1)
            if store_outputs:
                # Per-step VMEM stores (off the recurrence critical path); row = position.
                y0_ref[s * batch:(s + 1) * batch, 0:H] = h_f
                y0_ref[r * batch:(r + 1) * batch, H:2 * H] = h_b
            else:
                if s == 0:
                    ends += [h_f, h_b]              # fwd@pos0, bwd@posT-1
                if s == seq_len - 1:
                    ends += [h_f, h_b]              # fwd@posT-1, bwd@pos0
        return ends

    # Layer 0: full output sequence feeds layer 1 -> stage in VMEM scratch.
    run_layer(x0, wih0_ref, whh0_ref, b0_ref, store_outputs=True)
    # Layer 1: only positions 0 and T-1 are needed by the decoder.
    f_pos0, b_posT, f_posT, b_pos0 = run_layer(
        y0_ref[...], wih1_ref, whh1_ref, b1_ref, store_outputs=False)

    # encoding = cat(outputs[0], outputs[-1]) in PyTorch order [fwd@0, bwd@0, fwd@T-1, bwd@T-1]
    enc = jnp.concatenate([f_pos0, b_pos0, f_posT, b_posT], axis=-1)    # (B, 4H)
    logits = jnp.dot(enc.astype(jnp.bfloat16), dw_ref[...],
                     preferred_element_type=jnp.float32) + db_ref[...]
    o_ref[...] = logits.astype(o_ref.dtype)


# ------------------------------ forward wrapper -------------------------------


def bilstm_forward(packed, inputs, *, num_hiddens):
    # inputs: (batch, seq_len) int32 token indices
    batch, seq_len = inputs.shape
    H = num_hiddens
    vocab, E = packed["emb_fc"].shape

    # inputs.permute(1, 0) from the PyTorch forward -> position-major token ids.
    ids = inputs.T.reshape(seq_len * batch, 1).astype(jnp.int32)

    l0, l1 = packed["lstm"]
    args = [ids, packed["emb_fc"], packed["fc1_b"],
            l0["wih"], l0["whh"], l0["b"],
            l1["wih"], l1["whh"], l1["b"],
            packed["dec_w"], packed["dec_b"]]

    out_shape = jax.ShapeDtypeStruct((batch, 2), jnp.float32)

    # advisory cost hint for XLA scheduling around the single custom call
    SB = seq_len * batch
    flops = 2 * SB * vocab * E                                      # one-hot gather matmul
    flops += 2 * SB * E * 8 * H + 2 * SB * (2 * H) * (8 * H)        # hoisted input projections
    flops += 2 * 2 * seq_len * batch * (2 * H) * (8 * H)            # recurrent matmuls (2 layers)
    flops += 2 * batch * (4 * H) * 2                                # decoder
    transcendentals = SB * E + 2 * seq_len * batch * 2 * (4 * H + H)
    bytes_accessed = sum(int(a.size) * a.dtype.itemsize for a in args) + batch * 2 * 4

    kernel = functools.partial(_bilstm_fused_kernel, seq_len=seq_len, batch=batch,
                               hidden=H, vocab=vocab)

    return pl.pallas_call(
        kernel,
        out_shape=out_shape,
        in_specs=[pl.BlockSpec(a.shape, lambda: (0, 0)) for a in args],
        out_specs=pl.BlockSpec(out_shape.shape, lambda: (0, 0)),
        scratch_shapes=[pltpu.VMEM((seq_len * batch, 2 * H), jnp.float32)],
        cost_estimate=pl.CostEstimate(flops=int(flops),
                                      transcendentals=int(transcendentals),
                                      bytes_accessed=int(bytes_accessed)),
    )(*args)


# --------------------------- parameter construction ---------------------------


def init_params(key, vocab_size, embed_size, num_hiddens, num_layers):
    params = {}
    keys = jax.random.split(key, 4 + 6 * num_layers * 2)
    k_iter = iter(keys)

    def nrm(shape, scale=0.1):
        return (scale * jax.random.normal(next(k_iter), shape)).astype(jnp.float32)

    params["embedding"] = nrm((vocab_size, 100))
    params["fc1_w"] = nrm((100, embed_size))
    params["fc1_b"] = nrm((embed_size,))

    lstm_layers = []
    in_dim = embed_size
    for _ in range(num_layers):
        layer = {}
        for tag in ("f", "b"):  # forward / backward directions, PyTorch gate order i,f,g,o
            layer[f"wih_{tag}"] = nrm((in_dim, 4 * num_hiddens))
            layer[f"whh_{tag}"] = nrm((num_hiddens, 4 * num_hiddens))
            layer[f"b_{tag}"] = nrm((4 * num_hiddens,))  # combined b_ih + b_hh
        lstm_layers.append(layer)
        in_dim = 2 * num_hiddens
    params["lstm"] = lstm_layers

    params["dec_w"] = nrm((4 * num_hiddens, 2))   # = decoder.weight.T for real PyTorch weights
    params["dec_b"] = nrm((2,))
    return params


def pack_params(params, num_hiddens):
    """One-time host-side weight transforms into the fused-kernel layout."""
    H = num_hiddens

    def reorder(w):
        # PyTorch gate order [i, f, g, o] along last axis -> kernel order [i, f, o, g];
        # sigmoid gates (i, f, o) pre-scaled by 0.5 so sigmoid(x) = 0.5*tanh(x/2)+0.5
        # costs a single tanh per 128-lane gate block in the kernel.
        i, f = w[..., 0:H], w[..., H:2 * H]
        g, o = w[..., 2 * H:3 * H], w[..., 3 * H:4 * H]
        return jnp.concatenate([0.5 * i, 0.5 * f, 0.5 * o, g], axis=-1)

    packed = {}
    # Fold fc1's weight into the embedding table: fc1(emb[tok]) = (emb @ W1)[tok] + b1.
    packed["emb_fc"] = jnp.dot(params["embedding"], params["fc1_w"]).astype(jnp.bfloat16)
    packed["fc1_b"] = params["fc1_b"].reshape(1, -1).astype(jnp.float32)

    layers = []
    for layer in params["lstm"]:
        wih = jnp.concatenate([reorder(layer["wih_f"]), reorder(layer["wih_b"])], axis=1)
        whh = jnp.zeros((2 * H, 8 * H), jnp.float32)                  # block-diagonal
        whh = whh.at[:H, :4 * H].set(reorder(layer["whh_f"]))
        whh = whh.at[H:, 4 * H:].set(reorder(layer["whh_b"]))
        b = jnp.concatenate([reorder(layer["b_f"]), reorder(layer["b_b"])]).reshape(1, 8 * H)
        layers.append({"wih": wih.astype(jnp.bfloat16),
                       "whh": whh.astype(jnp.bfloat16),
                       "b": b.astype(jnp.float32)})
    packed["lstm"] = layers

    # Decoder rows are in natural PyTorch encoding order [fwd@0, bwd@0, fwd@T-1, bwd@T-1];
    # the kernel builds the encoding in the same order, so no row permutation is needed.
    packed["dec_w"] = params["dec_w"].astype(jnp.bfloat16)
    packed["dec_b"] = params["dec_b"].reshape(1, -1).astype(jnp.float32)
    return packed


# --------------------------- pure-JAX f32 reference ----------------------------


def reference_forward(params, inputs, *, num_hiddens):
    H = num_hiddens
    emb = jnp.take(params["embedding"], inputs.T, axis=0)            # (S, B, 100)
    x = jnp.tanh(emb @ params["fc1_w"] + params["fc1_b"])            # (S, B, E)
    S, B = x.shape[0], x.shape[1]

    def run_dir(xs, wih, whh, b):
        h = jnp.zeros((B, H), jnp.float32)
        c = jnp.zeros((B, H), jnp.float32)
        outs = []
        for t in range(S):
            g = xs[t] @ wih + h @ whh + b                            # PyTorch order [i,f,g,o]
            i = jax.nn.sigmoid(g[:, 0:H])
            f = jax.nn.sigmoid(g[:, H:2 * H])
            gg = jnp.tanh(g[:, 2 * H:3 * H])
            o = jax.nn.sigmoid(g[:, 3 * H:4 * H])
            c = f * c + i * gg
            h = o * jnp.tanh(c)
            outs.append(h)
        return outs

    for layer in params["lstm"]:
        of = run_dir(x, layer["wih_f"], layer["whh_f"], layer["b_f"])
        ob = run_dir(x[::-1], layer["wih_b"], layer["whh_b"], layer["b_b"])[::-1]
        x = jnp.stack([jnp.concatenate([of[t], ob[t]], axis=-1) for t in range(S)])
    enc = jnp.concatenate([x[0], x[-1]], axis=-1)
    return enc @ params["dec_w"] + params["dec_b"]


# ------------------------------------ main -------------------------------------


if __name__ == "__main__":
    vocab_size = 50
    embed_size = 32
    num_hiddens = 32
    num_layers = 2
    batch = 2
    seq_len = 8

    key = jax.random.PRNGKey(0)
    k_param, k_inp = jax.random.split(key)
    params = init_params(k_param, vocab_size, embed_size, num_hiddens, num_layers)
    packed = pack_params(params, num_hiddens)
    inputs = jax.random.randint(k_inp, (batch, seq_len), 0, vocab_size, dtype=jnp.int32)

    fwd = jax.jit(functools.partial(bilstm_forward, num_hiddens=num_hiddens))
    out = jax.block_until_ready(fwd(packed, inputs))
    assert out.shape == (batch, 2), out.shape

    # Correctness guard vs. an f32 pure-JAX PyTorch-semantics reference
    # (loose tolerance: kernel uses bf16 matmul operands with f32 accumulation).
    ref = jax.jit(functools.partial(reference_forward, num_hiddens=num_hiddens))(params, inputs)
    ref = jax.block_until_ready(ref)
    assert jnp.allclose(out, ref, atol=5e-2, rtol=5e-2), (out, ref)

    print("KERNEL_OK")
</pallas_src>

<mosaic_0001>
module attributes {stable_mosaic.version = 11 : i64} {
  func.func @_bilstm_fused_kernel(%arg0: memref<16x1xi32, #tpu.memory_space<vmem>>, %arg1: memref<50x32xbf16, #tpu.memory_space<vmem>>, %arg2: memref<1x32xf32, #tpu.memory_space<vmem>>, %arg3: memref<32x256xbf16, #tpu.memory_space<vmem>>, %arg4: memref<64x256xbf16, #tpu.memory_space<vmem>>, %arg5: memref<1x256xf32, #tpu.memory_space<vmem>>, %arg6: memref<64x256xbf16, #tpu.memory_space<vmem>>, %arg7: memref<64x256xbf16, #tpu.memory_space<vmem>>, %arg8: memref<1x256xf32, #tpu.memory_space<vmem>>, %arg9: memref<128x2xbf16, #tpu.memory_space<vmem>>, %arg10: memref<1x2xf32, #tpu.memory_space<vmem>>, %arg11: memref<2x2xf32, #tpu.memory_space<vmem>>, %arg12: memref<16x64xf32, #tpu.memory_space<vmem>>) attributes {dimension_semantics = [], scalar_prefetch = 0 : i64, scratch_operands = 1 : i64, tpu.core_type = #tpu.core_type<tc>} {
    %c0 = arith.constant 0 : index
    %c0_0 = arith.constant 0 : index
    %0 = vector.load %arg0[%c0, %c0_0] : memref<16x1xi32, #tpu.memory_space<vmem>>, vector<16x1xi32>
    %1 = tpu.iota {dimensions = array<i32: 1>} : vector<16x50xi32>
    %2 = vector.broadcast %0 : vector<16x1xi32> to vector<16x50xi32>
    %3 = arith.cmpi eq, %1, %2 : vector<16x50xi32>
    %4 = arith.extui %3 : vector<16x50xi1> to vector<16x50xi32>
    %5 = arith.sitofp %4 : vector<16x50xi32> to vector<16x50xf32>
    %6 = arith.truncf %5 : vector<16x50xf32> to vector<16x50xbf16>
    %c0_1 = arith.constant 0 : index
    %c0_2 = arith.constant 0 : index
    %7 = vector.load %arg1[%c0_1, %c0_2] : memref<50x32xbf16, #tpu.memory_space<vmem>>, vector<50x32xbf16>
    %cst = arith.constant dense<0.000000e+00> : vector<16x32xf32>
    %8 = tpu.matmul %6, %7, %cst {dimension_numbers = #tpu.dot_dimension_numbers<[1], [0], [0], [1], [0, 0, 1, 1], [], []>} : vector<16x50xbf16>, vector<50x32xbf16>, vector<16x32xf32> -> vector<16x32xf32>
    %c0_3 = arith.constant 0 : index
    %c0_4 = arith.constant 0 : index
    %9 = vector.load %arg2[%c0_3, %c0_4] : memref<1x32xf32, #tpu.memory_space<vmem>>, vector<1x32xf32>
    %10 = vector.broadcast %9 : vector<1x32xf32> to vector<16x32xf32>
    %11 = arith.addf %8, %10 : vector<16x32xf32>
    %12 = math.tanh %11 : vector<16x32xf32>
    %13 = arith.truncf %12 : vector<16x32xf32> to vector<16x32xbf16>
    %c0_5 = arith.constant 0 : index
    %c0_6 = arith.constant 0 : index
    %14 = vector.load %arg3[%c0_5, %c0_6] : memref<32x256xbf16, #tpu.memory_space<vmem>>, vector<32x256xbf16>
    %cst_7 = arith.constant dense<0.000000e+00> : vector<16x256xf32>
    %15 = tpu.matmul %13, %14, %cst_7 {dimension_numbers = #tpu.dot_dimension_numbers<[1], [0], [0], [1], [0, 0, 1, 1], [], []>} : vector<16x32xbf16>, vector<32x256xbf16>, vector<16x256xf32> -> vector<16x256xf32>
    %c0_8 = arith.constant 0 : index
    %c0_9 = arith.constant 0 : index
    %16 = vector.load %arg5[%c0_8, %c0_9] : memref<1x256xf32, #tpu.memory_space<vmem>>, vector<1x256xf32>
    %17 = vector.broadcast %16 : vector<1x256xf32> to vector<16x256xf32>
    %18 = arith.addf %15, %17 : vector<16x256xf32>
    %c0_10 = arith.constant 0 : index
    %c0_11 = arith.constant 0 : index
    %19 = vector.load %arg4[%c0_10, %c0_11] : memref<64x256xbf16, #tpu.memory_space<vmem>>, vector<64x256xbf16>
    %cst_12 = arith.constant 0.000000e+00 : f32
    %20 = vector.broadcast %cst_12 : f32 to vector<2x64xf32>
    %cst_13 = arith.constant 0.000000e+00 : f32
    %21 = vector.broadcast %cst_13 : f32 to vector<2x32xf32>
    %cst_14 = arith.constant 0.000000e+00 : f32
    %22 = vector.broadcast %cst_14 : f32 to vector<2x32xf32>
    %23 = arith.truncf %20 : vector<2x64xf32> to vector<2x64xbf16>
    %cst_15 = arith.constant dense<0.000000e+00> : vector<2x256xf32>
    %24 = tpu.matmul %23, %19, %cst_15 {dimension_numbers = #tpu.dot_dimension_numbers<[1], [0], [0], [1], [0, 0, 1, 1], [], []>} : vector<2x64xbf16>, vector<64x256xbf16>, vector<2x256xf32> -> vector<2x256xf32>
    %25 = vector.extract_strided_slice %18 {offsets = [0, 0], sizes = [2, 128], strides = [1, 1]} : vector<16x256xf32> to vector<2x128xf32>
    %26 = vector.extract_strided_slice %24 {offsets = [0, 0], sizes = [2, 128], strides = [1, 1]} : vector<2x256xf32> to vector<2x128xf32>
    %27 = arith.addf %25, %26 : vector<2x128xf32>
    %28 = vector.extract_strided_slice %18 {offsets = [14, 128], sizes = [2, 128], strides = [1, 1]} : vector<16x256xf32> to vector<2x128xf32>
    %29 = vector.extract_strided_slice %24 {offsets = [0, 128], sizes = [2, 128], strides = [1, 1]} : vector<2x256xf32> to vector<2x128xf32>
    %30 = arith.addf %28, %29 : vector<2x128xf32>
    %31 = math.tanh %27 : vector<2x128xf32>
    %32 = math.tanh %30 : vector<2x128xf32>
    %cst_16 = arith.constant 5.000000e-01 : f32
    %33 = vector.broadcast %cst_16 : f32 to vector<2x128xf32>
    %34 = arith.mulf %31, %33 : vector<2x128xf32>
    %cst_17 = arith.constant 5.000000e-01 : f32
    %35 = vector.broadcast %cst_17 : f32 to vector<2x128xf32>
    %36 = arith.addf %34, %35 : vector<2x128xf32>
    %cst_18 = arith.constant 5.000000e-01 : f32
    %37 = vector.broadcast %cst_18 : f32 to vector<2x128xf32>
    %38 = arith.mulf %32, %37 : vector<2x128xf32>
    %cst_19 = arith.constant 5.000000e-01 : f32
    %39 = vector.broadcast %cst_19 : f32 to vector<2x128xf32>
    %40 = arith.addf %38, %39 : vector<2x128xf32>
    %41 = vector.extract_strided_slice %36 {offsets = [0, 32], sizes = [2, 32], strides = [1, 1]} : vector<2x128xf32> to vector<2x32xf32>
    %42 = arith.mulf %41, %21 : vector<2x32xf32>
    %43 = vector.extract_strided_slice %36 {offsets = [0, 0], sizes = [2, 32], strides = [1, 1]} : vector<2x128xf32> to vector<2x32xf32>
    %44 = vector.extract_strided_slice %31 {offsets = [0, 96], sizes = [2, 32], strides = [1, 1]} : vector<2x128xf32> to vector<2x32xf32>
    %45 = arith.mulf %43, %44 : vector<2x32xf32>
    %46 = arith.addf %42, %45 : vector<2x32xf32>
    %47 = vector.extract_strided_slice %40 {offsets = [0, 32], sizes = [2, 32], strides = [1, 1]} : vector<2x128xf32> to vector<2x32xf32>
    %48 = arith.mulf %47, %22 : vector<2x32xf32>
    %49 = vector.extract_strided_slice %40 {offsets = [0, 0], sizes = [2, 32], strides = [1, 1]} : vector<2x128xf32> to vector<2x32xf32>
    %50 = vector.extract_strided_slice %32 {offsets = [0, 96], sizes = [2, 32], strides = [1, 1]} : vector<2x128xf32> to vector<2x32xf32>
    %51 = arith.mulf %49, %50 : vector<2x32xf32>
    %52 = arith.addf %48, %51 : vector<2x32xf32>
    %53 = vector.extract_strided_slice %36 {offsets = [0, 64], sizes = [2, 32], strides = [1, 1]} : vector<2x128xf32> to vector<2x32xf32>
    %54 = math.tanh %46 : vector<2x32xf32>
    %55 = arith.mulf %53, %54 : vector<2x32xf32>
    %56 = vector.extract_strided_slice %40 {offsets = [0, 64], sizes = [2, 32], strides = [1, 1]} : vector<2x128xf32> to vector<2x32xf32>
    %57 = math.tanh %52 : vector<2x32xf32>
    %58 = arith.mulf %56, %57 : vector<2x32xf32>
    %59 = tpu.concatenate %55, %58 in 1 : vector<2x32xf32>, vector<2x32xf32> -> vector<2x64xf32>
    %c0_20 = arith.constant 0 : index
    %c0_21 = arith.constant 0 : index
    %60 = vector.load %arg12[%c0_20, %c0_21] : memref<16x64xf32, #tpu.memory_space<vmem>>, vector<2x32xf32>
    tpu.vector_store %arg12[%c0_20, %c0_21], %55 {strides = array<i32>} : memref<16x64xf32, #tpu.memory_space<vmem>>, vector<2x32xf32>,
    %c14 = arith.constant 14 : index
    %c32 = arith.constant 32 : index
    %61 = vector.load %arg12[%c14, %c32] : memref<16x64xf32, #tpu.memory_space<vmem>>, vector<2x32xf32>
    tpu.vector_store %arg12[%c14, %c32], %58 {strides = array<i32>} : memref<16x64xf32, #tpu.memory_space<vmem>>, vector<2x32xf32>,
    %62 = arith.truncf %59 : vector<2x64xf32> to vector<2x64xbf16>
    %cst_22 = arith.constant dense<0.000000e+00> : vector<2x256xf32>
    %63 = tpu.matmul %62, %19, %cst_22 {dimension_numbers = #tpu.dot_dimension_numbers<[1], [0], [0], [1], [0, 0, 1, 1], [], []>} : vector<2x64xbf16>, vector<64x256xbf16>, vector<2x256xf32> -> vector<2x256xf32>
    %64 = vector.extract_strided_slice %18 {offsets = [2, 0], sizes = [2, 128], strides = [1, 1]} : vector<16x256xf32> to vector<2x128xf32>
    %65 = vector.extract_strided_slice %63 {offsets = [0, 0], sizes = [2, 128], strides = [1, 1]} : vector<2x256xf32> to vector<2x128xf32>
    %66 = arith.addf %64, %65 : vector<2x128xf32>
    %67 = vector.extract_strided_slice %18 {offsets = [12, 128], sizes = [2, 128], strides = [1, 1]} : vector<16x256xf32> to vector<2x128xf32>
    %68 = vector.extract_strided_slice %63 {offsets = [0, 128], sizes = [2, 128], strides = [1, 1]} : vector<2x256xf32> to vector<2x128xf32>
    %69 = arith.addf %67, %68 : vector<2x128xf32>
    %70 = math.tanh %66 : vector<2x128xf32>
    %71 = math.tanh %69 : vector<2x128xf32>
    %cst_23 = arith.constant 5.000000e-01 : f32
    %72 = vector.broadcast %cst_23 : f32 to vector<2x128xf32>
    %73 = arith.mulf %70, %72 : vector<2x128xf32>
    %cst_24 = arith.constant 5.000000e-01 : f32
    %74 = vector.broadcast %cst_24 : f32 to vector<2x128xf32>
    %75 = arith.addf %73, %74 : vector<2x128xf32>
    %cst_25 = arith.constant 5.000000e-01 : f32
    %76 = vector.broadcast %cst_25 : f32 to vector<2x128xf32>
    %77 = arith.mulf %71, %76 : vector<2x128xf32>
    %cst_26 = arith.constant 5.000000e-01 : f32
    %78 = vector.broadcast %cst_26 : f32 to vector<2x128xf32>
    %79 = arith.addf %77, %78 : vector<2x128xf32>
    %80 = vector.extract_strided_slice %75 {offsets = [0, 32], sizes = [2, 32], strides = [1, 1]} : vector<2x128xf32> to vector<2x32xf32>
    %81 = arith.mulf %80, %46 : vector<2x32xf32>
    %82 = vector.extract_strided_slice %75 {offsets = [0, 0], sizes = [2, 32], strides = [1, 1]} : vector<2x128xf32> to vector<2x32xf32>
    %83 = vector.extract_strided_slice %70 {offsets = [0, 96], sizes = [2, 32], strides = [1, 1]} : vector<2x128xf32> to vector<2x32xf32>
    %84 = arith.mulf %82, %83 : vector<2x32xf32>
    %85 = arith.addf %81, %84 : vector<2x32xf32>
    %86 = vector.extract_strided_slice %79 {offsets = [0, 32], sizes = [2, 32], strides = [1, 1]} : vector<2x128xf32> to vector<2x32xf32>
    %87 = arith.mulf %86, %52 : vector<2x32xf32>
    %88 = vector.extract_strided_slice %79 {offsets = [0, 0], sizes = [2, 32], strides = [1, 1]} : vector<2x128xf32> to vector<2x32xf32>
    %89 = vector.extract_strided_slice %71 {offsets = [0, 96], sizes = [2, 32], strides = [1, 1]} : vector<2x128xf32> to vector<2x32xf32>
    %90 = arith.mulf %88, %89 : vector<2x32xf32>
    %91 = arith.addf %87, %90 : vector<2x32xf32>
    %92 = vector.extract_strided_slice %75 {offsets = [0, 64], sizes = [2, 32], strides = [1, 1]} : vector<2x128xf32> to vector<2x32xf32>
    %93 = math.tanh %85 : vector<2x32xf32>
    %94 = arith.mulf %92, %93 : vector<2x32xf32>
    %95 = vector.extract_strided_slice %79 {offsets = [0, 64], sizes = [2, 32], strides = [1, 1]} : vector<2x128xf32> to vector<2x32xf32>
    %96 = math.tanh %91 : vector<2x32xf32>
    %97 = arith.mulf %95, %96 : vector<2x32xf32>
    %98 = tpu.concatenate %94, %97 in 1 : vector<2x32xf32>, vector<2x32xf32> -> vector<2x64xf32>
    %c2 = arith.constant 2 : index
    %c0_27 = arith.constant 0 : index
    %99 = vector.load %arg12[%c2, %c0_27] : memref<16x64xf32, #tpu.memory_space<vmem>>, vector<2x32xf32>
    tpu.vector_store %arg12[%c2, %c0_27], %94 {strides = array<i32>} : memref<16x64xf32, #tpu.memory_space<vmem>>, vector<2x32xf32>,
    %c12 = arith.constant 12 : index
    %c32_28 = arith.constant 32 : index
    %100 = vector.load %arg12[%c12, %c32_28] : memref<16x64xf32, #tpu.memory_space<vmem>>, vector<2x32xf32>
    tpu.vector_store %arg12[%c12, %c32_28], %97 {strides = array<i32>} : memref<16x64xf32, #tpu.memory_space<vmem>>, vector<2x32xf32>,
    %101 = arith.truncf %98 : vector<2x64xf32> to vector<2x64xbf16>
    %cst_29 = arith.constant dense<0.000000e+00> : vector<2x256xf32>
    %102 = tpu.matmul %101, %19, %cst_29 {dimension_numbers = #tpu.dot_dimension_numbers<[1], [0], [0], [1], [0, 0, 1, 1], [], []>} : vector<2x64xbf16>, vector<64x256xbf16>, vector<2x256xf32> -> vector<2x256xf32>
    %103 = vector.extract_strided_slice %18 {offsets = [4, 0], sizes = [2, 128], strides = [1, 1]} : vector<16x256xf32> to vector<2x128xf32>
    %104 = vector.extract_strided_slice %102 {offsets = [0, 0], sizes = [2, 128], strides = [1, 1]} : vector<2x256xf32> to vector<2x128xf32>
    %105 = arith.addf %103, %104 : vector<2x128xf32>
    %106 = vector.extract_strided_slice %18 {offsets = [10, 128], sizes = [2, 128], strides = [1, 1]} : vector<16x256xf32> to vector<2x128xf32>
    %107 = vector.extract_strided_slice %102 {offsets = [0, 128], sizes = [2, 128], strides = [1, 1]} : vector<2x256xf32> to vector<2x128xf32>
    %108 = arith.addf %106, %107 : vector<2x128xf32>
    %109 = math.tanh %105 : vector<2x128xf32>
    %110 = math.tanh %108 : vector<2x128xf32>
    %cst_30 = arith.constant 5.000000e-01 : f32
    %111 = vector.broadcast %cst_30 : f32 to vector<2x128xf32>
    %112 = arith.mulf %109, %111 : vector<2x128xf32>
    %cst_31 = arith.constant 5.000000e-01 : f32
    %113 = vector.broadcast %cst_31 : f32 to vector<2x128xf32>
    %114 = arith.addf %112, %113 : vector<2x128xf32>
    %cst_32 = arith.constant 5.000000e-01 : f32
    %115 = vector.broadcast %cst_32 : f32 to vector<2x128xf32>
    %116 = arith.mulf %110, %115 : vector<2x128xf32>
    %cst_33 = arith.constant 5.000000e-01 : f32
    %117 = vector.broadcast %cst_33 : f32 to vector<2x128xf32>
    %118 = arith.addf %116, %117 : vector<2x128xf32>
    %119 = vector.extract_strided_slice %114 {offsets = [0, 32], sizes = [2, 32], strides = [1, 1]} : vector<2x128xf32> to vector<2x32xf32>
    %120 = arith.mulf %119, %85 : vector<2x32xf32>
    %121 = vector.extract_strided_slice %114 {offsets = [0, 0], sizes = [2, 32], strides = [1, 1]} : vector<2x128xf32> to vector<2x32xf32>
    %122 = vector.extract_strided_slice %109 {offsets = [0, 96], sizes = [2, 32], strides = [1, 1]} : vector<2x128xf32> to vector<2x32xf32>
    %123 = arith.mulf %121, %122 : vector<2x32xf32>
    %124 = arith.addf %120, %123 : vector<2x32xf32>
    %125 = vector.extract_strided_slice %118 {offsets = [0, 32], sizes = [2, 32], strides = [1, 1]} : vector<2x128xf32> to vector<2x32xf32>
    %126 = arith.mulf %125, %91 : vector<2x32xf32>
    %127 = vector.extract_strided_slice %118 {offsets = [0, 0], sizes = [2, 32], strides = [1, 1]} : vector<2x128xf32> to vector<2x32xf32>
    %128 = vector.extract_strided_slice %110 {offsets = [0, 96], sizes = [2, 32], strides = [1, 1]} : vector<2x128xf32> to vector<2x32xf32>
    %129 = arith.mulf %127, %128 : vector<2x32xf32>
    %130 = arith.addf %126, %129 : vector<2x32xf32>
    %131 = vector.extract_strided_slice %114 {offsets = [0, 64], sizes = [2, 32], strides = [1, 1]} : vector<2x128xf32> to vector<2x32xf32>
    %132 = math.tanh %124 : vector<2x32xf32>
    %133 = arith.mulf %131, %132 : vector<2x32xf32>
    %134 = vector.extract_strided_slice %118 {offsets = [0, 64], sizes = [2, 32], strides = [1, 1]} : vector<2x128xf32> to vector<2x32xf32>
    %135 = math.tanh %130 : vector<2x32xf32>
    %136 = arith.mulf %134, %135 : vector<2x32xf32>
    %137 = tpu.concatenate %133, %136 in 1 : vector<2x32xf32>, vector<2x32xf32> -> vector<2x64xf32>
    %c4 = arith.constant 4 : index
    %c0_34 = arith.constant 0 : index
    %138 = vector.load %arg12[%c4, %c0_34] : memref<16x64xf32, #tpu.memory_space<vmem>>, vector<2x32xf32>
    tpu.vector_store %arg12[%c4, %c0_34], %133 {strides = array<i32>} : memref<16x64xf32, #tpu.memory_space<vmem>>, vector<2x32xf32>,
    %c10 = arith.constant 10 : index
    %c32_35 = arith.constant 32 : index
    %139 = vector.load %arg12[%c10, %c32_35] : memref<16x64xf32, #tpu.memory_space<vmem>>, vector<2x32xf32>
    tpu.vector_store %arg12[%c10, %c32_35], %136 {strides = array<i32>} : memref<16x64xf32, #tpu.memory_space<vmem>>, vector<2x32xf32>,
    %140 = arith.truncf %137 : vector<2x64xf32> to vector<2x64xbf16>
    %cst_36 = arith.constant dense<0.000000e+00> : vector<2x256xf32>
    %141 = tpu.matmul %140, %19, %cst_36 {dimension_numbers = #tpu.dot_dimension_numbers<[1], [0], [0], [1], [0, 0, 1, 1], [], []>} : vector<2x64xbf16>, vector<64x256xbf16>, vector<2x256xf32> -> vector<2x256xf32>
    %142 = vector.extract_strided_slice %18 {offsets = [6, 0], sizes = [2, 128], strides = [1, 1]} : vector<16x256xf32> to vector<2x128xf32>
    %143 = vector.extract_strided_slice %141 {offsets = [0, 0], sizes = [2, 128], strides = [1, 1]} : vector<2x256xf32> to vector<2x128xf32>
    %144 = arith.addf %142, %143 : vector<2x128xf32>
    %145 = vector.extract_strided_slice %18 {offsets = [8, 128], sizes = [2, 128], strides = [1, 1]} : vector<16x256xf32> to vector<2x128xf32>
    %146 = vector.extract_strided_slice %141 {offsets = [0, 128], sizes = [2, 128], strides = [1, 1]} : vector<2x256xf32> to vector<2x128xf32>
    %147 = arith.addf %145, %146 : vector<2x128xf32>
    %148 = math.tanh %144 : vector<2x128xf32>
    %149 = math.tanh %147 : vector<2x128xf32>
    %cst_37 = arith.constant 5.000000e-01 : f32
    %150 = vector.broadcast %cst_37 : f32 to vector<2x128xf32>
    %151 = arith.mulf %148, %150 : vector<2x128xf32>
    %cst_38 = arith.constant 5.000000e-01 : f32
    %152 = vector.broadcast %cst_38 : f32 to vector<2x128xf32>
    %153 = arith.addf %151, %152 : vector<2x128xf32>
    %cst_39 = arith.constant 5.000000e-01 : f32
    %154 = vector.broadcast %cst_39 : f32 to vector<2x128xf32>
    %155 = arith.mulf %149, %154 : vector<2x128xf32>
    %cst_40 = arith.constant 5.000000e-01 : f32
    %156 = vector.broadcast %cst_40 : f32 to vector<2x128xf32>
    %157 = arith.addf %155, %156 : vector<2x128xf32>
    %158 = vector.extract_strided_slice %153 {offsets = [0, 32], sizes = [2, 32], strides = [1, 1]} : vector<2x128xf32> to vector<2x32xf32>
    %159 = arith.mulf %158, %124 : vector<2x32xf32>
    %160 = vector.extract_strided_slice %153 {offsets = [0, 0], sizes = [2, 32], strides = [1, 1]} : vector<2x128xf32> to vector<2x32xf32>
    %161 = vector.extract_strided_slice %148 {offsets = [0, 96], sizes = [2, 32], strides = [1, 1]} : vector<2x128xf32> to vector<2x32xf32>
    %162 = arith.mulf %160, %161 : vector<2x32xf32>
    %163 = arith.addf %159, %162 : vector<2x32xf32>
    %164 = vector.extract_strided_slice %157 {offsets = [0, 32], sizes = [2, 32], strides = [1, 1]} : vector<2x128xf32> to vector<2x32xf32>
    %165 = arith.mulf %164, %130 : vector<2x32xf32>
    %166 = vector.extract_strided_slice %157 {offsets = [0, 0], sizes = [2, 32], strides = [1, 1]} : vector<2x128xf32> to vector<2x32xf32>
    %167 = vector.extract_strided_slice %149 {offsets = [0, 96], sizes = [2, 32], strides = [1, 1]} : vector<2x128xf32> to vector<2x32xf32>
    %168 = arith.mulf %166, %167 : vector<2x32xf32>
    %169 = arith.addf %165, %168 : vector<2x32xf32>
    %170 = vector.extract_strided_slice %153 {offsets = [0, 64], sizes = [2, 32], strides = [1, 1]} : vector<2x128xf32> to vector<2x32xf32>
    %171 = math.tanh %163 : vector<2x32xf32>
    %172 = arith.mulf %170, %171 : vector<2x32xf32>
    %173 = vector.extract_strided_slice %157 {offsets = [0, 64], sizes = [2, 32], strides = [1, 1]} : vector<2x128xf32> to vector<2x32xf32>
    %174 = math.tanh %169 : vector<2x32xf32>
    %175 = arith.mulf %173, %174 : vector<2x32xf32>
    %176 = tpu.concatenate %172, %175 in 1 : vector<2x32xf32>, vector<2x32xf32> -> vector<2x64xf32>
    %c6 = arith.constant 6 : index
    %c0_41 = arith.constant 0 : index
    %177 = vector.load %arg12[%c6, %c0_41] : memref<16x64xf32, #tpu.memory_space<vmem>>, vector<2x32xf32>
    tpu.vector_store %arg12[%c6, %c0_41], %172 {strides = array<i32>} : memref<16x64xf32, #tpu.memory_space<vmem>>, vector<2x32xf32>,
    %c8 = arith.constant 8 : index
    %c32_42 = arith.constant 32 : index
    %178 = vector.load %arg12[%c8, %c32_42] : memref<16x64xf32, #tpu.memory_space<vmem>>, vector<2x32xf32>
    tpu.vector_store %arg12[%c8, %c32_42], %175 {strides = array<i32>} : memref<16x64xf32, #tpu.memory_space<vmem>>, vector<2x32xf32>,
    %179 = arith.truncf %176 : vector<2x64xf32> to vector<2x64xbf16>
    %cst_43 = arith.constant dense<0.000000e+00> : vector<2x256xf32>
    %180 = tpu.matmul %179, %19, %cst_43 {dimension_numbers = #tpu.dot_dimension_numbers<[1], [0], [0], [1], [0, 0, 1, 1], [], []>} : vector<2x64xbf16>, vector<64x256xbf16>, vector<2x256xf32> -> vector<2x256xf32>
    %181 = vector.extract_strided_slice %18 {offsets = [8, 0], sizes = [2, 128], strides = [1, 1]} : vector<16x256xf32> to vector<2x128xf32>
    %182 = vector.extract_strided_slice %180 {offsets = [0, 0], sizes = [2, 128], strides = [1, 1]} : vector<2x256xf32> to vector<2x128xf32>
    %183 = arith.addf %181, %182 : vector<2x128xf32>
    %184 = vector.extract_strided_slice %18 {offsets = [6, 128], sizes = [2, 128], strides = [1, 1]} : vector<16x256xf32> to vector<2x128xf32>
    %185 = vector.extract_strided_slice %180 {offsets = [0, 128], sizes = [2, 128], strides = [1, 1]} : vector<2x256xf32> to vector<2x128xf32>
    %186 = arith.addf %184, %185 : vector<2x128xf32>
    %187 = math.tanh %183 : vector<2x128xf32>
    %188 = math.tanh %186 : vector<2x128xf32>
    %cst_44 = arith.constant 5.000000e-01 : f32
    %189 = vector.broadcast %cst_44 : f32 to vector<2x128xf32>
    %190 = arith.mulf %187, %189 : vector<2x128xf32>
    %cst_45 = arith.constant 5.000000e-01 : f32
    %191 = vector.broadcast %cst_45 : f32 to vector<2x128xf32>
    %192 = arith.addf %190, %191 : vector<2x128xf32>
    %cst_46 = arith.constant 5.000000e-01 : f32
    %193 = vector.broadcast %cst_46 : f32 to vector<2x128xf32>
    %194 = arith.mulf %188, %193 : vector<2x128xf32>
    %cst_47 = arith.constant 5.000000e-01 : f32
    %195 = vector.broadcast %cst_47 : f32 to vector<2x128xf32>
    %196 = arith.addf %194, %195 : vector<2x128xf32>
    %197 = vector.extract_strided_slice %192 {offsets = [0, 32], sizes = [2, 32], strides = [1, 1]} : vector<2x128xf32> to vector<2x32xf32>
    %198 = arith.mulf %197, %163 : vector<2x32xf32>
    %199 = vector.extract_strided_slice %192 {offsets = [0, 0], sizes = [2, 32], strides = [1, 1]} : vector<2x128xf32> to vector<2x32xf32>
    %200 = vector.extract_strided_slice %187 {offsets = [0, 96], sizes = [2, 32], strides = [1, 1]} : vector<2x128xf32> to vector<2x32xf32>
    %201 = arith.mulf %199, %200 : vector<2x32xf32>
    %202 = arith.addf %198, %201 : vector<2x32xf32>
    %203 = vector.extract_strided_slice %196 {offsets = [0, 32], sizes = [2, 32], strides = [1, 1]} : vector<2x128xf32> to vector<2x32xf32>
    %204 = arith.mulf %203, %169 : vector<2x32xf32>
    %205 = vector.extract_strided_slice %196 {offsets = [0, 0], sizes = [2, 32], strides = [1, 1]} : vector<2x128xf32> to vector<2x32xf32>
    %206 = vector.extract_strided_slice %188 {offsets = [0, 96], sizes = [2, 32], strides = [1, 1]} : vector<2x128xf32> to vector<2x32xf32>
    %207 = arith.mulf %205, %206 : vector<2x32xf32>
    %208 = arith.addf %204, %207 : vector<2x32xf32>
    %209 = vector.extract_strided_slice %192 {offsets = [0, 64], sizes = [2, 32], strides = [1, 1]} : vector<2x128xf32> to vector<2x32xf32>
    %210 = math.tanh %202 : vector<2x32xf32>
    %211 = arith.mulf %209, %210 : vector<2x32xf32>
    %212 = vector.extract_strided_slice %196 {offsets = [0, 64], sizes = [2, 32], strides = [1, 1]} : vector<2x128xf32> to vector<2x32xf32>
    %213 = math.tanh %208 : vector<2x32xf32>
    %214 = arith.mulf %212, %213 : vector<2x32xf32>
    %215 = tpu.concatenate %211, %214 in 1 : vector<2x32xf32>, vector<2x32xf32> -> vector<2x64xf32>
    %c8_48 = arith.constant 8 : index
    %c0_49 = arith.constant 0 : index
    %216 = vector.load %arg12[%c8_48, %c0_49] : memref<16x64xf32, #tpu.memory_space<vmem>>, vector<2x32xf32>
    tpu.vector_store %arg12[%c8_48, %c0_49], %211 {strides = array<i32>} : memref<16x64xf32, #tpu.memory_space<vmem>>, vector<2x32xf32>,
    %c6_50 = arith.constant 6 : index
    %c32_51 = arith.constant 32 : index
    %217 = vector.load %arg12[%c6_50, %c32_51] : memref<16x64xf32, #tpu.memory_space<vmem>>, vector<2x32xf32>
    tpu.vector_store %arg12[%c6_50, %c32_51], %214 {strides = array<i32>} : memref<16x64xf32, #tpu.memory_space<vmem>>, vector<2x32xf32>,
    %218 = arith.truncf %215 : vector<2x64xf32> to vector<2x64xbf16>
    %cst_52 = arith.constant dense<0.000000e+00> : vector<2x256xf32>
    %219 = tpu.matmul %218, %19, %cst_52 {dimension_numbers = #tpu.dot_dimension_numbers<[1], [0], [0], [1], [0, 0, 1, 1], [], []>} : vector<2x64xbf16>, vector<64x256xbf16>, vector<2x256xf32> -> vector<2x256xf32>
    %220 = vector.extract_strided_slice %18 {offsets = [10, 0], sizes = [2, 128], strides = [1, 1]} : vector<16x256xf32> to vector<2x128xf32>
    %221 = vector.extract_strided_slice %219 {offsets = [0, 0], sizes = [2, 128], strides = [1, 1]} : vector<2x256xf32> to vector<2x128xf32>
    %222 = arith.addf %220, %221 : vector<2x128xf32>
    %223 = vector.extract_strided_slice %18 {offsets = [4, 128], sizes = [2, 128], strides = [1, 1]} : vector<16x256xf32> to vector<2x128xf32>
    %224 = vector.extract_strided_slice %219 {offsets = [0, 128], sizes = [2, 128], strides = [1, 1]} : vector<2x256xf32> to vector<2x128xf32>
    %225 = arith.addf %223, %224 : vector<2x128xf32>
    %226 = math.tanh %222 : vector<2x128xf32>
    %227 = math.tanh %225 : vector<2x128xf32>
    %cst_53 = arith.constant 5.000000e-01 : f32
    %228 = vector.broadcast %cst_53 : f32 to vector<2x128xf32>
    %229 = arith.mulf %226, %228 : vector<2x128xf32>
    %cst_54 = arith.constant 5.000000e-01 : f32
    %230 = vector.broadcast %cst_54 : f32 to vector<2x128xf32>
    %231 = arith.addf %229, %230 : vector<2x128xf32>
    %cst_55 = arith.constant 5.000000e-01 : f32
    %232 = vector.broadcast %cst_55 : f32 to vector<2x128xf32>
    %233 = arith.mulf %227, %232 : vector<2x128xf32>
    %cst_56 = arith.constant 5.000000e-01 : f32
    %234 = vector.broadcast %cst_56 : f32 to vector<2x128xf32>
    %235 = arith.addf %233, %234 : vector<2x128xf32>
    %236 = vector.extract_strided_slice %231 {offsets = [0, 32], sizes = [2, 32], strides = [1, 1]} : vector<2x128xf32> to vector<2x32xf32>
    %237 = arith.mulf %236, %202 : vector<2x32xf32>
    %238 = vector.extract_strided_slice %231 {offsets = [0, 0], sizes = [2, 32], strides = [1, 1]} : vector<2x128xf32> to vector<2x32xf32>
    %239 = vector.extract_strided_slice %226 {offsets = [0, 96], sizes = [2, 32], strides = [1, 1]} : vector<2x128xf32> to vector<2x32xf32>
    %240 = arith.mulf %238, %239 : vector<2x32xf32>
    %241 = arith.addf %237, %240 : vector<2x32xf32>
    %242 = vector.extract_strided_slice %235 {offsets = [0, 32], sizes = [2, 32], strides = [1, 1]} : vector<2x128xf32> to vector<2x32xf32>
    %243 = arith.mulf %242, %208 : vector<2x32xf32>
    %244 = vector.extract_strided_slice %235 {offsets = [0, 0], sizes = [2, 32], strides = [1, 1]} : vector<2x128xf32> to vector<2x32xf32>
    %245 = vector.extract_strided_slice %227 {offsets = [0, 96], sizes = [2, 32], strides = [1, 1]} : vector<2x128xf32> to vector<2x32xf32>
    %246 = arith.mulf %244, %245 : vector<2x32xf32>
    %247 = arith.addf %243, %246 : vector<2x32xf32>
    %248 = vector.extract_strided_slice %231 {offsets = [0, 64], sizes = [2, 32], strides = [1, 1]} : vector<2x128xf32> to vector<2x32xf32>
    %249 = math.tanh %241 : vector<2x32xf32>
    %250 = arith.mulf %248, %249 : vector<2x32xf32>
    %251 = vector.extract_strided_slice %235 {offsets = [0, 64], sizes = [2, 32], strides = [1, 1]} : vector<2x128xf32> to vector<2x32xf32>
    %252 = math.tanh %247 : vector<2x32xf32>
    %253 = arith.mulf %251, %252 : vector<2x32xf32>
    %254 = tpu.concatenate %250, %253 in 1 : vector<2x32xf32>, vector<2x32xf32> -> vector<2x64xf32>
    %c10_57 = arith.constant 10 : index
    %c0_58 = arith.constant 0 : index
    %255 = vector.load %arg12[%c10_57, %c0_58] : memref<16x64xf32, #tpu.memory_space<vmem>>, vector<2x32xf32>
    tpu.vector_store %arg12[%c10_57, %c0_58], %250 {strides = array<i32>} : memref<16x64xf32, #tpu.memory_space<vmem>>, vector<2x32xf32>,
    %c4_59 = arith.constant 4 : index
    %c32_60 = arith.constant 32 : index
    %256 = vector.load %arg12[%c4_59, %c32_60] : memref<16x64xf32, #tpu.memory_space<vmem>>, vector<2x32xf32>
    tpu.vector_store %arg12[%c4_59, %c32_60], %253 {strides = array<i32>} : memref<16x64xf32, #tpu.memory_space<vmem>>, vector<2x32xf32>,
    %257 = arith.truncf %254 : vector<2x64xf32> to vector<2x64xbf16>
    %cst_61 = arith.constant dense<0.000000e+00> : vector<2x256xf32>
    %258 = tpu.matmul %257, %19, %cst_61 {dimension_numbers = #tpu.dot_dimension_numbers<[1], [0], [0], [1], [0, 0, 1, 1], [], []>} : vector<2x64xbf16>, vector<64x256xbf16>, vector<2x256xf32> -> vector<2x256xf32>
    %259 = vector.extract_strided_slice %18 {offsets = [12, 0], sizes = [2, 128], strides = [1, 1]} : vector<16x256xf32> to vector<2x128xf32>
    %260 = vector.extract_strided_slice %258 {offsets = [0, 0], sizes = [2, 128], strides = [1, 1]} : vector<2x256xf32> to vector<2x128xf32>
    %261 = arith.addf %259, %260 : vector<2x128xf32>
    %262 = vector.extract_strided_slice %18 {offsets = [2, 128], sizes = [2, 128], strides = [1, 1]} : vector<16x256xf32> to vector<2x128xf32>
    %263 = vector.extract_strided_slice %258 {offsets = [0, 128], sizes = [2, 128], strides = [1, 1]} : vector<2x256xf32> to vector<2x128xf32>
    %264 = arith.addf %262, %263 : vector<2x128xf32>
    %265 = math.tanh %261 : vector<2x128xf32>
    %266 = math.tanh %264 : vector<2x128xf32>
    %cst_62 = arith.constant 5.000000e-01 : f32
    %267 = vector.broadcast %cst_62 : f32 to vector<2x128xf32>
    %268 = arith.mulf %265, %267 : vector<2x128xf32>
    %cst_63 = arith.constant 5.000000e-01 : f32
    %269 = vector.broadcast %cst_63 : f32 to vector<2x128xf32>
    %270 = arith.addf %268, %269 : vector<2x128xf32>
    %cst_64 = arith.constant 5.000000e-01 : f32
    %271 = vector.broadcast %cst_64 : f32 to vector<2x128xf32>
    %272 = arith.mulf %266, %271 : vector<2x128xf32>
    %cst_65 = arith.constant 5.000000e-01 : f32
    %273 = vector.broadcast %cst_65 : f32 to vector<2x128xf32>
    %274 = arith.addf %272, %273 : vector<2x128xf32>
    %275 = vector.extract_strided_slice %270 {offsets = [0, 32], sizes = [2, 32], strides = [1, 1]} : vector<2x128xf32> to vector<2x32xf32>
    %276 = arith.mulf %275, %241 : vector<2x32xf32>
    %277 = vector.extract_strided_slice %270 {offsets = [0, 0], sizes = [2, 32], strides = [1, 1]} : vector<2x128xf32> to vector<2x32xf32>
    %278 = vector.extract_strided_slice %265 {offsets = [0, 96], sizes = [2, 32], strides = [1, 1]} : vector<2x128xf32> to vector<2x32xf32>
    %279 = arith.mulf %277, %278 : vector<2x32xf32>
    %280 = arith.addf %276, %279 : vector<2x32xf32>
    %281 = vector.extract_strided_slice %274 {offsets = [0, 32], sizes = [2, 32], strides = [1, 1]} : vector<2x128xf32> to vector<2x32xf32>
    %282 = arith.mulf %281, %247 : vector<2x32xf32>
    %283 = vector.extract_strided_slice %274 {offsets = [0, 0], sizes = [2, 32], strides = [1, 1]} : vector<2x128xf32> to vector<2x32xf32>
    %284 = vector.extract_strided_slice %266 {offsets = [0, 96], sizes = [2, 32], strides = [1, 1]} : vector<2x128xf32> to vector<2x32xf32>
    %285 = arith.mulf %283, %284 : vector<2x32xf32>
    %286 = arith.addf %282, %285 : vector<2x32xf32>
    %287 = vector.extract_strided_slice %270 {offsets = [0, 64], sizes = [2, 32], strides = [1, 1]} : vector<2x128xf32> to vector<2x32xf32>
    %288 = math.tanh %280 : vector<2x32xf32>
    %289 = arith.mulf %287, %288 : vector<2x32xf32>
    %290 = vector.extract_strided_slice %274 {offsets = [0, 64], sizes = [2, 32], strides = [1, 1]} : vector<2x128xf32> to vector<2x32xf32>
    %291 = math.tanh %286 : vector<2x32xf32>
    %292 = arith.mulf %290, %291 : vector<2x32xf32>
    %293 = tpu.concatenate %289, %292 in 1 : vector<2x32xf32>, vector<2x32xf32> -> vector<2x64xf32>
    %c12_66 = arith.constant 12 : index
    %c0_67 = arith.constant 0 : index
    %294 = vector.load %arg12[%c12_66, %c0_67] : memref<16x64xf32, #tpu.memory_space<vmem>>, vector<2x32xf32>
    tpu.vector_store %arg12[%c12_66, %c0_67], %289 {strides = array<i32>} : memref<16x64xf32, #tpu.memory_space<vmem>>, vector<2x32xf32>,
    %c2_68 = arith.constant 2 : index
    %c32_69 = arith.constant 32 : index
    %295 = vector.load %arg12[%c2_68, %c32_69] : memref<16x64xf32, #tpu.memory_space<vmem>>, vector<2x32xf32>
    tpu.vector_store %arg12[%c2_68, %c32_69], %292 {strides = array<i32>} : memref<16x64xf32, #tpu.memory_space<vmem>>, vector<2x32xf32>,
    %296 = arith.truncf %293 : vector<2x64xf32> to vector<2x64xbf16>
    %cst_70 = arith.constant dense<0.000000e+00> : vector<2x256xf32>
    %297 = tpu.matmul %296, %19, %cst_70 {dimension_numbers = #tpu.dot_dimension_numbers<[1], [0], [0], [1], [0, 0, 1, 1], [], []>} : vector<2x64xbf16>, vector<64x256xbf16>, vector<2x256xf32> -> vector<2x256xf32>
    %298 = vector.extract_strided_slice %18 {offsets = [14, 0], sizes = [2, 128], strides = [1, 1]} : vector<16x256xf32> to vector<2x128xf32>
    %299 = vector.extract_strided_slice %297 {offsets = [0, 0], sizes = [2, 128], strides = [1, 1]} : vector<2x256xf32> to vector<2x128xf32>
    %300 = arith.addf %298, %299 : vector<2x128xf32>
    %301 = vector.extract_strided_slice %18 {offsets = [0, 128], sizes = [2, 128], strides = [1, 1]} : vector<16x256xf32> to vector<2x128xf32>
    %302 = vector.extract_strided_slice %297 {offsets = [0, 128], sizes = [2, 128], strides = [1, 1]} : vector<2x256xf32> to vector<2x128xf32>
    %303 = arith.addf %301, %302 : vector<2x128xf32>
    %304 = math.tanh %300 : vector<2x128xf32>
    %305 = math.tanh %303 : vector<2x128xf32>
    %cst_71 = arith.constant 5.000000e-01 : f32
    %306 = vector.broadcast %cst_71 : f32 to vector<2x128xf32>
    %307 = arith.mulf %304, %306 : vector<2x128xf32>
    %cst_72 = arith.constant 5.000000e-01 : f32
    %308 = vector.broadcast %cst_72 : f32 to vector<2x128xf32>
    %309 = arith.addf %307, %308 : vector<2x128xf32>
    %cst_73 = arith.constant 5.000000e-01 : f32
    %310 = vector.broadcast %cst_73 : f32 to vector<2x128xf32>
    %311 = arith.mulf %305, %310 : vector<2x128xf32>
    %cst_74 = arith.constant 5.000000e-01 : f32
    %312 = vector.broadcast %cst_74 : f32 to vector<2x128xf32>
    %313 = arith.addf %311, %312 : vector<2x128xf32>
    %314 = vector.extract_strided_slice %309 {offsets = [0, 32], sizes = [2, 32], strides = [1, 1]} : vector<2x128xf32> to vector<2x32xf32>
    %315 = arith.mulf %314, %280 : vector<2x32xf32>
    %316 = vector.extract_strided_slice %309 {offsets = [0, 0], sizes = [2, 32], strides = [1, 1]} : vector<2x128xf32> to vector<2x32xf32>
    %317 = vector.extract_strided_slice %304 {offsets = [0, 96], sizes = [2, 32], strides = [1, 1]} : vector<2x128xf32> to vector<2x32xf32>
    %318 = arith.mulf %316, %317 : vector<2x32xf32>
    %319 = arith.addf %315, %318 : vector<2x32xf32>
    %320 = vector.extract_strided_slice %313 {offsets = [0, 32], sizes = [2, 32], strides = [1, 1]} : vector<2x128xf32> to vector<2x32xf32>
    %321 = arith.mulf %320, %286 : vector<2x32xf32>
    %322 = vector.extract_strided_slice %313 {offsets = [0, 0], sizes = [2, 32], strides = [1, 1]} : vector<2x128xf32> to vector<2x32xf32>
    %323 = vector.extract_strided_slice %305 {offsets = [0, 96], sizes = [2, 32], strides = [1, 1]} : vector<2x128xf32> to vector<2x32xf32>
    %324 = arith.mulf %322, %323 : vector<2x32xf32>
    %325 = arith.addf %321, %324 : vector<2x32xf32>
    %326 = vector.extract_strided_slice %309 {offsets = [0, 64], sizes = [2, 32], strides = [1, 1]} : vector<2x128xf32> to vector<2x32xf32>
    %327 = math.tanh %319 : vector<2x32xf32>
    %328 = arith.mulf %326, %327 : vector<2x32xf32>
    %329 = vector.extract_strided_slice %313 {offsets = [0, 64], sizes = [2, 32], strides = [1, 1]} : vector<2x128xf32> to vector<2x32xf32>
    %330 = math.tanh %325 : vector<2x32xf32>
    %331 = arith.mulf %329, %330 : vector<2x32xf32>
    %c14_75 = arith.constant 14 : index
    %c0_76 = arith.constant 0 : index
    %332 = vector.load %arg12[%c14_75, %c0_76] : memref<16x64xf32, #tpu.memory_space<vmem>>, vector<2x32xf32>
    tpu.vector_store %arg12[%c14_75, %c0_76], %328 {strides = array<i32>} : memref<16x64xf32, #tpu.memory_space<vmem>>, vector<2x32xf32>,
    %c0_77 = arith.constant 0 : index
    %c32_78 = arith.constant 32 : index
    %333 = vector.load %arg12[%c0_77, %c32_78] : memref<16x64xf32, #tpu.memory_space<vmem>>, vector<2x32xf32>
    tpu.vector_store %arg12[%c0_77, %c32_78], %331 {strides = array<i32>} : memref<16x64xf32, #tpu.memory_space<vmem>>, vector<2x32xf32>,
    %c0_79 = arith.constant 0 : index
    %c0_80 = arith.constant 0 : index
    %334 = vector.load %arg12[%c0_79, %c0_80] : memref<16x64xf32, #tpu.memory_space<vmem>>, vector<16x64xf32>
    %335 = arith.truncf %334 : vector<16x64xf32> to vector<16x64xbf16>
    %c0_81 = arith.constant 0 : index
    %c0_82 = arith.constant 0 : index
    %336 = vector.load %arg6[%c0_81, %c0_82] : memref<64x256xbf16, #tpu.memory_space<vmem>>, vector<64x256xbf16>
    %cst_83 = arith.constant dense<0.000000e+00> : vector<16x256xf32>
    %337 = tpu.matmul %335, %336, %cst_83 {dimension_numbers = #tpu.dot_dimension_numbers<[1], [0], [0], [1], [0, 0, 1, 1], [], []>} : vector<16x64xbf16>, vector<64x256xbf16>, vector<16x256xf32> -> vector<16x256xf32>
    %c0_84 = arith.constant 0 : index
    %c0_85 = arith.constant 0 : index
    %338 = vector.load %arg8[%c0_84, %c0_85] : memref<1x256xf32, #tpu.memory_space<vmem>>, vector<1x256xf32>
    %339 = vector.broadcast %338 : vector<1x256xf32> to vector<16x256xf32>
    %340 = arith.addf %337, %339 : vector<16x256xf32>
    %c0_86 = arith.constant 0 : index
    %c0_87 = arith.constant 0 : index
    %341 = vector.load %arg7[%c0_86, %c0_87] : memref<64x256xbf16, #tpu.memory_space<vmem>>, vector<64x256xbf16>
    %cst_88 = arith.constant 0.000000e+00 : f32
    %342 = vector.broadcast %cst_88 : f32 to vector<2x64xf32>
    %cst_89 = arith.constant 0.000000e+00 : f32
    %343 = vector.broadcast %cst_89 : f32 to vector<2x32xf32>
    %cst_90 = arith.constant 0.000000e+00 : f32
    %344 = vector.broadcast %cst_90 : f32 to vector<2x32xf32>
    %345 = arith.truncf %342 : vector<2x64xf32> to vector<2x64xbf16>
    %cst_91 = arith.constant dense<0.000000e+00> : vector<2x256xf32>
    %346 = tpu.matmul %345, %341, %cst_91 {dimension_numbers = #tpu.dot_dimension_numbers<[1], [0], [0], [1], [0, 0, 1, 1], [], []>} : vector<2x64xbf16>, vector<64x256xbf16>, vector<2x256xf32> -> vector<2x256xf32>
    %347 = vector.extract_strided_slice %340 {offsets = [0, 0], sizes = [2, 128], strides = [1, 1]} : vector<16x256xf32> to vector<2x128xf32>
    %348 = vector.extract_strided_slice %346 {offsets = [0, 0], sizes = [2, 128], strides = [1, 1]} : vector<2x256xf32> to vector<2x128xf32>
    %349 = arith.addf %347, %348 : vector<2x128xf32>
    %350 = vector.extract_strided_slice %340 {offsets = [14, 128], sizes = [2, 128], strides = [1, 1]} : vector<16x256xf32> to vector<2x128xf32>
    %351 = vector.extract_strided_slice %346 {offsets = [0, 128], sizes = [2, 128], strides = [1, 1]} : vector<2x256xf32> to vector<2x128xf32>
    %352 = arith.addf %350, %351 : vector<2x128xf32>
    %353 = math.tanh %349 : vector<2x128xf32>
    %354 = math.tanh %352 : vector<2x128xf32>
    %cst_92 = arith.constant 5.000000e-01 : f32
    %355 = vector.broadcast %cst_92 : f32 to vector<2x128xf32>
    %356 = arith.mulf %353, %355 : vector<2x128xf32>
    %cst_93 = arith.constant 5.000000e-01 : f32
    %357 = vector.broadcast %cst_93 : f32 to vector<2x128xf32>
    %358 = arith.addf %356, %357 : vector<2x128xf32>
    %cst_94 = arith.constant 5.000000e-01 : f32
    %359 = vector.broadcast %cst_94 : f32 to vector<2x128xf32>
    %360 = arith.mulf %354, %359 : vector<2x128xf32>
    %cst_95 = arith.constant 5.000000e-01 : f32
    %361 = vector.broadcast %cst_95 : f32 to vector<2x128xf32>
    %362 = arith.addf %360, %361 : vector<2x128xf32>
    %363 = vector.extract_strided_slice %358 {offsets = [0, 32], sizes = [2, 32], strides = [1, 1]} : vector<2x128xf32> to vector<2x32xf32>
    %364 = arith.mulf %363, %343 : vector<2x32xf32>
    %365 = vector.extract_strided_slice %358 {offsets = [0, 0], sizes = [2, 32], strides = [1, 1]} : vector<2x128xf32> to vector<2x32xf32>
    %366 = vector.extract_strided_slice %353 {offsets = [0, 96], sizes = [2, 32], strides = [1, 1]} : vector<2x128xf32> to vector<2x32xf32>
    %367 = arith.mulf %365, %366 : vector<2x32xf32>
    %368 = arith.addf %364, %367 : vector<2x32xf32>
    %369 = vector.extract_strided_slice %362 {offsets = [0, 32], sizes = [2, 32], strides = [1, 1]} : vector<2x128xf32> to vector<2x32xf32>
    %370 = arith.mulf %369, %344 : vector<2x32xf32>
    %371 = vector.extract_strided_slice %362 {offsets = [0, 0], sizes = [2, 32], strides = [1, 1]} : vector<2x128xf32> to vector<2x32xf32>
    %372 = vector.extract_strided_slice %354 {offsets = [0, 96], sizes = [2, 32], strides = [1, 1]} : vector<2x128xf32> to vector<2x32xf32>
    %373 = arith.mulf %371, %372 : vector<2x32xf32>
    %374 = arith.addf %370, %373 : vector<2x32xf32>
    %375 = vector.extract_strided_slice %358 {offsets = [0, 64], sizes = [2, 32], strides = [1, 1]} : vector<2x128xf32> to vector<2x32xf32>
    %376 = math.tanh %368 : vector<2x32xf32>
    %377 = arith.mulf %375, %376 : vector<2x32xf32>
    %378 = vector.extract_strided_slice %362 {offsets = [0, 64], sizes = [2, 32], strides = [1, 1]} : vector<2x128xf32> to vector<2x32xf32>
    %379 = math.tanh %374 : vector<2x32xf32>
    %380 = arith.mulf %378, %379 : vector<2x32xf32>
    %381 = tpu.concatenate %377, %380 in 1 : vector<2x32xf32>, vector<2x32xf32> -> vector<2x64xf32>
    %382 = arith.truncf %381 : vector<2x64xf32> to vector<2x64xbf16>
    %cst_96 = arith.constant dense<0.000000e+00> : vector<2x256xf32>
    %383 = tpu.matmul %382, %341, %cst_96 {dimension_numbers = #tpu.dot_dimension_numbers<[1], [0], [0], [1], [0, 0, 1, 1], [], []>} : vector<2x64xbf16>, vector<64x256xbf16>, vector<2x256xf32> -> vector<2x256xf32>
    %384 = vector.extract_strided_slice %340 {offsets = [2, 0], sizes = [2, 128], strides = [1, 1]} : vector<16x256xf32> to vector<2x128xf32>
    %385 = vector.extract_strided_slice %383 {offsets = [0, 0], sizes = [2, 128], strides = [1, 1]} : vector<2x256xf32> to vector<2x128xf32>
    %386 = arith.addf %384, %385 : vector<2x128xf32>
    %387 = vector.extract_strided_slice %340 {offsets = [12, 128], sizes = [2, 128], strides = [1, 1]} : vector<16x256xf32> to vector<2x128xf32>
    %388 = vector.extract_strided_slice %383 {offsets = [0, 128], sizes = [2, 128], strides = [1, 1]} : vector<2x256xf32> to vector<2x128xf32>
    %389 = arith.addf %387, %388 : vector<2x128xf32>
    %390 = math.tanh %386 : vector<2x128xf32>
    %391 = math.tanh %389 : vector<2x128xf32>
    %cst_97 = arith.constant 5.000000e-01 : f32
    %392 = vector.broadcast %cst_97 : f32 to vector<2x128xf32>
    %393 = arith.mulf %390, %392 : vector<2x128xf32>
    %cst_98 = arith.constant 5.000000e-01 : f32
    %394 = vector.broadcast %cst_98 : f32 to vector<2x128xf32>
    %395 = arith.addf %393, %394 : vector<2x128xf32>
    %cst_99 = arith.constant 5.000000e-01 : f32
    %396 = vector.broadcast %cst_99 : f32 to vector<2x128xf32>
    %397 = arith.mulf %391, %396 : vector<2x128xf32>
    %cst_100 = arith.constant 5.000000e-01 : f32
    %398 = vector.broadcast %cst_100 : f32 to vector<2x128xf32>
    %399 = arith.addf %397, %398 : vector<2x128xf32>
    %400 = vector.extract_strided_slice %395 {offsets = [0, 32], sizes = [2, 32], strides = [1, 1]} : vector<2x128xf32> to vector<2x32xf32>
    %401 = arith.mulf %400, %368 : vector<2x32xf32>
    %402 = vector.extract_strided_slice %395 {offsets = [0, 0], sizes = [2, 32], strides = [1, 1]} : vector<2x128xf32> to vector<2x32xf32>
    %403 = vector.extract_strided_slice %390 {offsets = [0, 96], sizes = [2, 32], strides = [1, 1]} : vector<2x128xf32> to vector<2x32xf32>
    %404 = arith.mulf %402, %403 : vector<2x32xf32>
    %405 = arith.addf %401, %404 : vector<2x32xf32>
    %406 = vector.extract_strided_slice %399 {offsets = [0, 32], sizes = [2, 32], strides = [1, 1]} : vector<2x128xf32> to vector<2x32xf32>
    %407 = arith.mulf %406, %374 : vector<2x32xf32>
    %408 = vector.extract_strided_slice %399 {offsets = [0, 0], sizes = [2, 32], strides = [1, 1]} : vector<2x128xf32> to vector<2x32xf32>
    %409 = vector.extract_strided_slice %391 {offsets = [0, 96], sizes = [2, 32], strides = [1, 1]} : vector<2x128xf32> to vector<2x32xf32>
    %410 = arith.mulf %408, %409 : vector<2x32xf32>
    %411 = arith.addf %407, %410 : vector<2x32xf32>
    %412 = vector.extract_strided_slice %395 {offsets = [0, 64], sizes = [2, 32], strides = [1, 1]} : vector<2x128xf32> to vector<2x32xf32>
    %413 = math.tanh %405 : vector<2x32xf32>
    %414 = arith.mulf %412, %413 : vector<2x32xf32>
    %415 = vector.extract_strided_slice %399 {offsets = [0, 64], sizes = [2, 32], strides = [1, 1]} : vector<2x128xf32> to vector<2x32xf32>
    %416 = math.tanh %411 : vector<2x32xf32>
    %417 = arith.mulf %415, %416 : vector<2x32xf32>
    %418 = tpu.concatenate %414, %417 in 1 : vector<2x32xf32>, vector<2x32xf32> -> vector<2x64xf32>
    %419 = arith.truncf %418 : vector<2x64xf32> to vector<2x64xbf16>
    %cst_101 = arith.constant dense<0.000000e+00> : vector<2x256xf32>
    %420 = tpu.matmul %419, %341, %cst_101 {dimension_numbers = #tpu.dot_dimension_numbers<[1], [0], [0], [1], [0, 0, 1, 1], [], []>} : vector<2x64xbf16>, vector<64x256xbf16>, vector<2x256xf32> -> vector<2x256xf32>
    %421 = vector.extract_strided_slice %340 {offsets = [4, 0], sizes = [2, 128], strides = [1, 1]} : vector<16x256xf32> to vector<2x128xf32>
    %422 = vector.extract_strided_slice %420 {offsets = [0, 0], sizes = [2, 128], strides = [1, 1]} : vector<2x256xf32> to vector<2x128xf32>
    %423 = arith.addf %421, %422 : vector<2x128xf32>
    %424 = vector.extract_strided_slice %340 {offsets = [10, 128], sizes = [2, 128], strides = [1, 1]} : vector<16x256xf32> to vector<2x128xf32>
    %425 = vector.extract_strided_slice %420 {offsets = [0, 128], sizes = [2, 128], strides = [1, 1]} : vector<2x256xf32> to vector<2x128xf32>
    %426 = arith.addf %424, %425 : vector<2x128xf32>
    %427 = math.tanh %423 : vector<2x128xf32>
    %428 = math.tanh %426 : vector<2x128xf32>
    %cst_102 = arith.constant 5.000000e-01 : f32
    %429 = vector.broadcast %cst_102 : f32 to vector<2x128xf32>
    %430 = arith.mulf %427, %429 : vector<2x128xf32>
    %cst_103 = arith.constant 5.000000e-01 : f32
    %431 = vector.broadcast %cst_103 : f32 to vector<2x128xf32>
    %432 = arith.addf %430, %431 : vector<2x128xf32>
    %cst_104 = arith.constant 5.000000e-01 : f32
    %433 = vector.broadcast %cst_104 : f32 to vector<2x128xf32>
    %434 = arith.mulf %428, %433 : vector<2x128xf32>
    %cst_105 = arith.constant 5.000000e-01 : f32
    %435 = vector.broadcast %cst_105 : f32 to vector<2x128xf32>
    %436 = arith.addf %434, %435 : vector<2x128xf32>
    %437 = vector.extract_strided_slice %432 {offsets = [0, 32], sizes = [2, 32], strides = [1, 1]} : vector<2x128xf32> to vector<2x32xf32>
    %438 = arith.mulf %437, %405 : vector<2x32xf32>
    %439 = vector.extract_strided_slice %432 {offsets = [0, 0], sizes = [2, 32], strides = [1, 1]} : vector<2x128xf32> to vector<2x32xf32>
    %440 = vector.extract_strided_slice %427 {offsets = [0, 96], sizes = [2, 32], strides = [1, 1]} : vector<2x128xf32> to vector<2x32xf32>
    %441 = arith.mulf %439, %440 : vector<2x32xf32>
    %442 = arith.addf %438, %441 : vector<2x32xf32>
    %443 = vector.extract_strided_slice %436 {offsets = [0, 32], sizes = [2, 32], strides = [1, 1]} : vector<2x128xf32> to vector<2x32xf32>
    %444 = arith.mulf %443, %411 : vector<2x32xf32>
    %445 = vector.extract_strided_slice %436 {offsets = [0, 0], sizes = [2, 32], strides = [1, 1]} : vector<2x128xf32> to vector<2x32xf32>
    %446 = vector.extract_strided_slice %428 {offsets = [0, 96], sizes = [2, 32], strides = [1, 1]} : vector<2x128xf32> to vector<2x32xf32>
    %447 = arith.mulf %445, %446 : vector<2x32xf32>
    %448 = arith.addf %444, %447 : vector<2x32xf32>
    %449 = vector.extract_strided_slice %432 {offsets = [0, 64], sizes = [2, 32], strides = [1, 1]} : vector<2x128xf32> to vector<2x32xf32>
    %450 = math.tanh %442 : vector<2x32xf32>
    %451 = arith.mulf %449, %450 : vector<2x32xf32>
    %452 = vector.extract_strided_slice %436 {offsets = [0, 64], sizes = [2, 32], strides = [1, 1]} : vector<2x128xf32> to vector<2x32xf32>
    %453 = math.tanh %448 : vector<2x32xf32>
    %454 = arith.mulf %452, %453 : vector<2x32xf32>
    %455 = tpu.concatenate %451, %454 in 1 : vector<2x32xf32>, vector<2x32xf32> -> vector<2x64xf32>
    %456 = arith.truncf %455 : vector<2x64xf32> to vector<2x64xbf16>
    %cst_106 = arith.constant dense<0.000000e+00> : vector<2x256xf32>
    %457 = tpu.matmul %456, %341, %cst_106 {dimension_numbers = #tpu.dot_dimension_numbers<[1], [0], [0], [1], [0, 0, 1, 1], [], []>} : vector<2x64xbf16>, vector<64x256xbf16>, vector<2x256xf32> -> vector<2x256xf32>
    %458 = vector.extract_strided_slice %340 {offsets = [6, 0], sizes = [2, 128], strides = [1, 1]} : vector<16x256xf32> to vector<2x128xf32>
    %459 = vector.extract_strided_slice %457 {offsets = [0, 0], sizes = [2, 128], strides = [1, 1]} : vector<2x256xf32> to vector<2x128xf32>
    %460 = arith.addf %458, %459 : vector<2x128xf32>
    %461 = vector.extract_strided_slice %340 {offsets = [8, 128], sizes = [2, 128], strides = [1, 1]} : vector<16x256xf32> to vector<2x128xf32>
    %462 = vector.extract_strided_slice %457 {offsets = [0, 128], sizes = [2, 128], strides = [1, 1]} : vector<2x256xf32> to vector<2x128xf32>
    %463 = arith.addf %461, %462 : vector<2x128xf32>
    %464 = math.tanh %460 : vector<2x128xf32>
    %465 = math.tanh %463 : vector<2x128xf32>
    %cst_107 = arith.constant 5.000000e-01 : f32
    %466 = vector.broadcast %cst_107 : f32 to vector<2x128xf32>
    %467 = arith.mulf %464, %466 : vector<2x128xf32>
    %cst_108 = arith.constant 5.000000e-01 : f32
    %468 = vector.broadcast %cst_108 : f32 to vector<2x128xf32>
    %469 = arith.addf %467, %468 : vector<2x128xf32>
    %cst_109 = arith.constant 5.000000e-01 : f32
    %470 = vector.broadcast %cst_109 : f32 to vector<2x128xf32>
    %471 = arith.mulf %465, %470 : vector<2x128xf32>
    %cst_110 = arith.constant 5.000000e-01 : f32
    %472 = vector.broadcast %cst_110 : f32 to vector<2x128xf32>
    %473 = arith.addf %471, %472 : vector<2x128xf32>
    %474 = vector.extract_strided_slice %469 {offsets = [0, 32], sizes = [2, 32], strides = [1, 1]} : vector<2x128xf32> to vector<2x32xf32>
    %475 = arith.mulf %474, %442 : vector<2x32xf32>
    %476 = vector.extract_strided_slice %469 {offsets = [0, 0], sizes = [2, 32], strides = [1, 1]} : vector<2x128xf32> to vector<2x32xf32>
    %477 = vector.extract_strided_slice %464 {offsets = [0, 96], sizes = [2, 32], strides = [1, 1]} : vector<2x128xf32> to vector<2x32xf32>
    %478 = arith.mulf %476, %477 : vector<2x32xf32>
    %479 = arith.addf %475, %478 : vector<2x32xf32>
    %480 = vector.extract_strided_slice %473 {offsets = [0, 32], sizes = [2, 32], strides = [1, 1]} : vector<2x128xf32> to vector<2x32xf32>
    %481 = arith.mulf %480, %448 : vector<2x32xf32>
    %482 = vector.extract_strided_slice %473 {offsets = [0, 0], sizes = [2, 32], strides = [1, 1]} : vector<2x128xf32> to vector<2x32xf32>
    %483 = vector.extract_strided_slice %465 {offsets = [0, 96], sizes = [2, 32], strides = [1, 1]} : vector<2x128xf32> to vector<2x32xf32>
    %484 = arith.mulf %482, %483 : vector<2x32xf32>
    %485 = arith.addf %481, %484 : vector<2x32xf32>
    %486 = vector.extract_strided_slice %469 {offsets = [0, 64], sizes = [2, 32], strides = [1, 1]} : vector<2x128xf32> to vector<2x32xf32>
    %487 = math.tanh %479 : vector<2x32xf32>
    %488 = arith.mulf %486, %487 : vector<2x32xf32>
    %489 = vector.extract_strided_slice %473 {offsets = [0, 64], sizes = [2, 32], strides = [1, 1]} : vector<2x128xf32> to vector<2x32xf32>
    %490 = math.tanh %485 : vector<2x32xf32>
    %491 = arith.mulf %489, %490 : vector<2x32xf32>
    %492 = tpu.concatenate %488, %491 in 1 : vector<2x32xf32>, vector<2x32xf32> -> vector<2x64xf32>
    %493 = arith.truncf %492 : vector<2x64xf32> to vector<2x64xbf16>
    %cst_111 = arith.constant dense<0.000000e+00> : vector<2x256xf32>
    %494 = tpu.matmul %493, %341, %cst_111 {dimension_numbers = #tpu.dot_dimension_numbers<[1], [0], [0], [1], [0, 0, 1, 1], [], []>} : vector<2x64xbf16>, vector<64x256xbf16>, vector<2x256xf32> -> vector<2x256xf32>
    %495 = vector.extract_strided_slice %340 {offsets = [8, 0], sizes = [2, 128], strides = [1, 1]} : vector<16x256xf32> to vector<2x128xf32>
    %496 = vector.extract_strided_slice %494 {offsets = [0, 0], sizes = [2, 128], strides = [1, 1]} : vector<2x256xf32> to vector<2x128xf32>
    %497 = arith.addf %495, %496 : vector<2x128xf32>
    %498 = vector.extract_strided_slice %340 {offsets = [6, 128], sizes = [2, 128], strides = [1, 1]} : vector<16x256xf32> to vector<2x128xf32>
    %499 = vector.extract_strided_slice %494 {offsets = [0, 128], sizes = [2, 128], strides = [1, 1]} : vector<2x256xf32> to vector<2x128xf32>
    %500 = arith.addf %498, %499 : vector<2x128xf32>
    %501 = math.tanh %497 : vector<2x128xf32>
    %502 = math.tanh %500 : vector<2x128xf32>
    %cst_112 = arith.constant 5.000000e-01 : f32
    %503 = vector.broadcast %cst_112 : f32 to vector<2x128xf32>
    %504 = arith.mulf %501, %503 : vector<2x128xf32>
    %cst_113 = arith.constant 5.000000e-01 : f32
    %505 = vector.broadcast %cst_113 : f32 to vector<2x128xf32>
    %506 = arith.addf %504, %505 : vector<2x128xf32>
    %cst_114 = arith.constant 5.000000e-01 : f32
    %507 = vector.broadcast %cst_114 : f32 to vector<2x128xf32>
    %508 = arith.mulf %502, %507 : vector<2x128xf32>
    %cst_115 = arith.constant 5.000000e-01 : f32
    %509 = vector.broadcast %cst_115 : f32 to vector<2x128xf32>
    %510 = arith.addf %508, %509 : vector<2x128xf32>
    %511 = vector.extract_strided_slice %506 {offsets = [0, 32], sizes = [2, 32], strides = [1, 1]} : vector<2x128xf32> to vector<2x32xf32>
    %512 = arith.mulf %511, %479 : vector<2x32xf32>
    %513 = vector.extract_strided_slice %506 {offsets = [0, 0], sizes = [2, 32], strides = [1, 1]} : vector<2x128xf32> to vector<2x32xf32>
    %514 = vector.extract_strided_slice %501 {offsets = [0, 96], sizes = [2, 32], strides = [1, 1]} : vector<2x128xf32> to vector<2x32xf32>
    %515 = arith.mulf %513, %514 : vector<2x32xf32>
    %516 = arith.addf %512, %515 : vector<2x32xf32>
    %517 = vector.extract_strided_slice %510 {offsets = [0, 32], sizes = [2, 32], strides = [1, 1]} : vector<2x128xf32> to vector<2x32xf32>
    %518 = arith.mulf %517, %485 : vector<2x32xf32>
    %519 = vector.extract_strided_slice %510 {offsets = [0, 0], sizes = [2, 32], strides = [1, 1]} : vector<2x128xf32> to vector<2x32xf32>
    %520 = vector.extract_strided_slice %502 {offsets = [0, 96], sizes = [2, 32], strides = [1, 1]} : vector<2x128xf32> to vector<2x32xf32>
    %521 = arith.mulf %519, %520 : vector<2x32xf32>
    %522 = arith.addf %518, %521 : vector<2x32xf32>
    %523 = vector.extract_strided_slice %506 {offsets = [0, 64], sizes = [2, 32], strides = [1, 1]} : vector<2x128xf32> to vector<2x32xf32>
    %524 = math.tanh %516 : vector<2x32xf32>
    %525 = arith.mulf %523, %524 : vector<2x32xf32>
    %526 = vector.extract_strided_slice %510 {offsets = [0, 64], sizes = [2, 32], strides = [1, 1]} : vector<2x128xf32> to vector<2x32xf32>
    %527 = math.tanh %522 : vector<2x32xf32>
    %528 = arith.mulf %526, %527 : vector<2x32xf32>
    %529 = tpu.concatenate %525, %528 in 1 : vector<2x32xf32>, vector<2x32xf32> -> vector<2x64xf32>
    %530 = arith.truncf %529 : vector<2x64xf32> to vector<2x64xbf16>
    %cst_116 = arith.constant dense<0.000000e+00> : vector<2x256xf32>
    %531 = tpu.matmul %530, %341, %cst_116 {dimension_numbers = #tpu.dot_dimension_numbers<[1], [0], [0], [1], [0, 0, 1, 1], [], []>} : vector<2x64xbf16>, vector<64x256xbf16>, vector<2x256xf32> -> vector<2x256xf32>
    %532 = vector.extract_strided_slice %340 {offsets = [10, 0], sizes = [2, 128], strides = [1, 1]} : vector<16x256xf32> to vector<2x128xf32>
    %533 = vector.extract_strided_slice %531 {offsets = [0, 0], sizes = [2, 128], strides = [1, 1]} : vector<2x256xf32> to vector<2x128xf32>
    %534 = arith.addf %532, %533 : vector<2x128xf32>
    %535 = vector.extract_strided_slice %340 {offsets = [4, 128], sizes = [2, 128], strides = [1, 1]} : vector<16x256xf32> to vector<2x128xf32>
    %536 = vector.extract_strided_slice %531 {offsets = [0, 128], sizes = [2, 128], strides = [1, 1]} : vector<2x256xf32> to vector<2x128xf32>
    %537 = arith.addf %535, %536 : vector<2x128xf32>
    %538 = math.tanh %534 : vector<2x128xf32>
    %539 = math.tanh %537 : vector<2x128xf32>
    %cst_117 = arith.constant 5.000000e-01 : f32
    %540 = vector.broadcast %cst_117 : f32 to vector<2x128xf32>
    %541 = arith.mulf %538, %540 : vector<2x128xf32>
    %cst_118 = arith.constant 5.000000e-01 : f32
    %542 = vector.broadcast %cst_118 : f32 to vector<2x128xf32>
    %543 = arith.addf %541, %542 : vector<2x128xf32>
    %cst_119 = arith.constant 5.000000e-01 : f32
    %544 = vector.broadcast %cst_119 : f32 to vector<2x128xf32>
    %545 = arith.mulf %539, %544 : vector<2x128xf32>
    %cst_120 = arith.constant 5.000000e-01 : f32
    %546 = vector.broadcast %cst_120 : f32 to vector<2x128xf32>
    %547 = arith.addf %545, %546 : vector<2x128xf32>
    %548 = vector.extract_strided_slice %543 {offsets = [0, 32], sizes = [2, 32], strides = [1, 1]} : vector<2x128xf32> to vector<2x32xf32>
    %549 = arith.mulf %548, %516 : vector<2x32xf32>
    %550 = vector.extract_strided_slice %543 {offsets = [0, 0], sizes = [2, 32], strides = [1, 1]} : vector<2x128xf32> to vector<2x32xf32>
    %551 = vector.extract_strided_slice %538 {offsets = [0, 96], sizes = [2, 32], strides = [1, 1]} : vector<2x128xf32> to vector<2x32xf32>
    %552 = arith.mulf %550, %551 : vector<2x32xf32>
    %553 = arith.addf %549, %552 : vector<2x32xf32>
    %554 = vector.extract_strided_slice %547 {offsets = [0, 32], sizes = [2, 32], strides = [1, 1]} : vector<2x128xf32> to vector<2x32xf32>
    %555 = arith.mulf %554, %522 : vector<2x32xf32>
    %556 = vector.extract_strided_slice %547 {offsets = [0, 0], sizes = [2, 32], strides = [1, 1]} : vector<2x128xf32> to vector<2x32xf32>
    %557 = vector.extract_strided_slice %539 {offsets = [0, 96], sizes = [2, 32], strides = [1, 1]} : vector<2x128xf32> to vector<2x32xf32>
    %558 = arith.mulf %556, %557 : vector<2x32xf32>
    %559 = arith.addf %555, %558 : vector<2x32xf32>
    %560 = vector.extract_strided_slice %543 {offsets = [0, 64], sizes = [2, 32], strides = [1, 1]} : vector<2x128xf32> to vector<2x32xf32>
    %561 = math.tanh %553 : vector<2x32xf32>
    %562 = arith.mulf %560, %561 : vector<2x32xf32>
    %563 = vector.extract_strided_slice %547 {offsets = [0, 64], sizes = [2, 32], strides = [1, 1]} : vector<2x128xf32> to vector<2x32xf32>
    %564 = math.tanh %559 : vector<2x32xf32>
    %565 = arith.mulf %563, %564 : vector<2x32xf32>
    %566 = tpu.concatenate %562, %565 in 1 : vector<2x32xf32>, vector<2x32xf32> -> vector<2x64xf32>
    %567 = arith.truncf %566 : vector<2x64xf32> to vector<2x64xbf16>
    %cst_121 = arith.constant dense<0.000000e+00> : vector<2x256xf32>
    %568 = tpu.matmul %567, %341, %cst_121 {dimension_numbers = #tpu.dot_dimension_numbers<[1], [0], [0], [1], [0, 0, 1, 1], [], []>} : vector<2x64xbf16>, vector<64x256xbf16>, vector<2x256xf32> -> vector<2x256xf32>
    %569 = vector.extract_strided_slice %340 {offsets = [12, 0], sizes = [2, 128], strides = [1, 1]} : vector<16x256xf32> to vector<2x128xf32>
    %570 = vector.extract_strided_slice %568 {offsets = [0, 0], sizes = [2, 128], strides = [1, 1]} : vector<2x256xf32> to vector<2x128xf32>
    %571 = arith.addf %569, %570 : vector<2x128xf32>
    %572 = vector.extract_strided_slice %340 {offsets = [2, 128], sizes = [2, 128], strides = [1, 1]} : vector<16x256xf32> to vector<2x128xf32>
    %573 = vector.extract_strided_slice %568 {offsets = [0, 128], sizes = [2, 128], strides = [1, 1]} : vector<2x256xf32> to vector<2x128xf32>
    %574 = arith.addf %572, %573 : vector<2x128xf32>
    %575 = math.tanh %571 : vector<2x128xf32>
    %576 = math.tanh %574 : vector<2x128xf32>
    %cst_122 = arith.constant 5.000000e-01 : f32
    %577 = vector.broadcast %cst_122 : f32 to vector<2x128xf32>
    %578 = arith.mulf %575, %577 : vector<2x128xf32>
    %cst_123 = arith.constant 5.000000e-01 : f32
    %579 = vector.broadcast %cst_123 : f32 to vector<2x128xf32>
    %580 = arith.addf %578, %579 : vector<2x128xf32>
    %cst_124 = arith.constant 5.000000e-01 : f32
    %581 = vector.broadcast %cst_124 : f32 to vector<2x128xf32>
    %582 = arith.mulf %576, %581 : vector<2x128xf32>
    %cst_125 = arith.constant 5.000000e-01 : f32
    %583 = vector.broadcast %cst_125 : f32 to vector<2x128xf32>
    %584 = arith.addf %582, %583 : vector<2x128xf32>
    %585 = vector.extract_strided_slice %580 {offsets = [0, 32], sizes = [2, 32], strides = [1, 1]} : vector<2x128xf32> to vector<2x32xf32>
    %586 = arith.mulf %585, %553 : vector<2x32xf32>
    %587 = vector.extract_strided_slice %580 {offsets = [0, 0], sizes = [2, 32], strides = [1, 1]} : vector<2x128xf32> to vector<2x32xf32>
    %588 = vector.extract_strided_slice %575 {offsets = [0, 96], sizes = [2, 32], strides = [1, 1]} : vector<2x128xf32> to vector<2x32xf32>
    %589 = arith.mulf %587, %588 : vector<2x32xf32>
    %590 = arith.addf %586, %589 : vector<2x32xf32>
    %591 = vector.extract_strided_slice %584 {offsets = [0, 32], sizes = [2, 32], strides = [1, 1]} : vector<2x128xf32> to vector<2x32xf32>
    %592 = arith.mulf %591, %559 : vector<2x32xf32>
    %593 = vector.extract_strided_slice %584 {offsets = [0, 0], sizes = [2, 32], strides = [1, 1]} : vector<2x128xf32> to vector<2x32xf32>
    %594 = vector.extract_strided_slice %576 {offsets = [0, 96], sizes = [2, 32], strides = [1, 1]} : vector<2x128xf32> to vector<2x32xf32>
    %595 = arith.mulf %593, %594 : vector<2x32xf32>
    %596 = arith.addf %592, %595 : vector<2x32xf32>
    %597 = vector.extract_strided_slice %580 {offsets = [0, 64], sizes = [2, 32], strides = [1, 1]} : vector<2x128xf32> to vector<2x32xf32>
    %598 = math.tanh %590 : vector<2x32xf32>
    %599 = arith.mulf %597, %598 : vector<2x32xf32>
    %600 = vector.extract_strided_slice %584 {offsets = [0, 64], sizes = [2, 32], strides = [1, 1]} : vector<2x128xf32> to vector<2x32xf32>
    %601 = math.tanh %596 : vector<2x32xf32>
    %602 = arith.mulf %600, %601 : vector<2x32xf32>
    %603 = tpu.concatenate %599, %602 in 1 : vector<2x32xf32>, vector<2x32xf32> -> vector<2x64xf32>
    %604 = arith.truncf %603 : vector<2x64xf32> to vector<2x64xbf16>
    %cst_126 = arith.constant dense<0.000000e+00> : vector<2x256xf32>
    %605 = tpu.matmul %604, %341, %cst_126 {dimension_numbers = #tpu.dot_dimension_numbers<[1], [0], [0], [1], [0, 0, 1, 1], [], []>} : vector<2x64xbf16>, vector<64x256xbf16>, vector<2x256xf32> -> vector<2x256xf32>
    %606 = vector.extract_strided_slice %340 {offsets = [14, 0], sizes = [2, 128], strides = [1, 1]} : vector<16x256xf32> to vector<2x128xf32>
    %607 = vector.extract_strided_slice %605 {offsets = [0, 0], sizes = [2, 128], strides = [1, 1]} : vector<2x256xf32> to vector<2x128xf32>
    %608 = arith.addf %606, %607 : vector<2x128xf32>
    %609 = vector.extract_strided_slice %340 {offsets = [0, 128], sizes = [2, 128], strides = [1, 1]} : vector<16x256xf32> to vector<2x128xf32>
    %610 = vector.extract_strided_slice %605 {offsets = [0, 128], sizes = [2, 128], strides = [1, 1]} : vector<2x256xf32> to vector<2x128xf32>
    %611 = arith.addf %609, %610 : vector<2x128xf32>
    %612 = math.tanh %608 : vector<2x128xf32>
    %613 = math.tanh %611 : vector<2x128xf32>
    %cst_127 = arith.constant 5.000000e-01 : f32
    %614 = vector.broadcast %cst_127 : f32 to vector<2x128xf32>
    %615 = arith.mulf %612, %614 : vector<2x128xf32>
    %cst_128 = arith.constant 5.000000e-01 : f32
    %616 = vector.broadcast %cst_128 : f32 to vector<2x128xf32>
    %617 = arith.addf %615, %616 : vector<2x128xf32>
    %cst_129 = arith.constant 5.000000e-01 : f32
    %618 = vector.broadcast %cst_129 : f32 to vector<2x128xf32>
    %619 = arith.mulf %613, %618 : vector<2x128xf32>
    %cst_130 = arith.constant 5.000000e-01 : f32
    %620 = vector.broadcast %cst_130 : f32 to vector<2x128xf32>
    %621 = arith.addf %619, %620 : vector<2x128xf32>
    %622 = vector.extract_strided_slice %617 {offsets = [0, 32], sizes = [2, 32], strides = [1, 1]} : vector<2x128xf32> to vector<2x32xf32>
    %623 = arith.mulf %622, %590 : vector<2x32xf32>
    %624 = vector.extract_strided_slice %617 {offsets = [0, 0], sizes = [2, 32], strides = [1, 1]} : vector<2x128xf32> to vector<2x32xf32>
    %625 = vector.extract_strided_slice %612 {offsets = [0, 96], sizes = [2, 32], strides = [1, 1]} : vector<2x128xf32> to vector<2x32xf32>
    %626 = arith.mulf %624, %625 : vector<2x32xf32>
    %627 = arith.addf %623, %626 : vector<2x32xf32>
    %628 = vector.extract_strided_slice %621 {offsets = [0, 32], sizes = [2, 32], strides = [1, 1]} : vector<2x128xf32> to vector<2x32xf32>
    %629 = arith.mulf %628, %596 : vector<2x32xf32>
    %630 = vector.extract_strided_slice %621 {offsets = [0, 0], sizes = [2, 32], strides = [1, 1]} : vector<2x128xf32> to vector<2x32xf32>
    %631 = vector.extract_strided_slice %613 {offsets = [0, 96], sizes = [2, 32], strides = [1, 1]} : vector<2x128xf32> to vector<2x32xf32>
    %632 = arith.mulf %630, %631 : vector<2x32xf32>
    %633 = arith.addf %629, %632 : vector<2x32xf32>
    %634 = vector.extract_strided_slice %617 {offsets = [0, 64], sizes = [2, 32], strides = [1, 1]} : vector<2x128xf32> to vector<2x32xf32>
    %635 = math.tanh %627 : vector<2x32xf32>
    %636 = arith.mulf %634, %635 : vector<2x32xf32>
    %637 = vector.extract_strided_slice %621 {offsets = [0, 64], sizes = [2, 32], strides = [1, 1]} : vector<2x128xf32> to vector<2x32xf32>
    %638 = math.tanh %633 : vector<2x32xf32>
    %639 = arith.mulf %637, %638 : vector<2x32xf32>
    %640 = tpu.concatenate %377, %639, %636, %380 in 1 : vector<2x32xf32>, vector<2x32xf32>, vector<2x32xf32>, vector<2x32xf32> -> vector<2x128xf32>
    %641 = arith.truncf %640 : vector<2x128xf32> to vector<2x128xbf16>
    %c0_131 = arith.constant 0 : index
    %c0_132 = arith.constant 0 : index
    %642 = vector.load %arg9[%c0_131, %c0_132] : memref<128x2xbf16, #tpu.memory_space<vmem>>, vector<128x2xbf16>
    %cst_133 = arith.constant dense<0.000000e+00> : vector<2x2xf32>
    %643 = tpu.matmul %641, %642, %cst_133 {dimension_numbers = #tpu.dot_dimension_numbers<[1], [0], [0], [1], [0, 0, 1, 1], [], []>} : vector<2x128xbf16>, vector<128x2xbf16>, vector<2x2xf32> -> vector<2x2xf32>
    %c0_134 = arith.constant 0 : index
    %c0_135 = arith.constant 0 : index
    %644 = vector.load %arg10[%c0_134, %c0_135] : memref<1x2xf32, #tpu.memory_space<vmem>>, vector<1x2xf32>
    %645 = vector.broadcast %644 : vector<1x2xf32> to vector<2x2xf32>
    %646 = arith.addf %643, %645 : vector<2x2xf32>
    %c0_136 = arith.constant 0 : index
    %c0_137 = arith.constant 0 : index
    %647 = vector.load %arg11[%c0_136, %c0_137] : memref<2x2xf32, #tpu.memory_space<vmem>>, vector<2x2xf32>
    tpu.vector_store %arg11[%c0_136, %c0_137], %646 {strides = array<i32>} : memref<2x2xf32, #tpu.memory_space<vmem>>, vector<2x2xf32>,
    return
  }
}

</mosaic_0001>

<bundles_post_ra>
// kernel: bilstm_forward.1
= control target key start
LH: loop header
LB: loop body
LE: loop exit
PB: predicated region body
PF: predicated region fallthrough
CT: control target
= control target key end

     0   :  { %16 = vsyncpa [#allocation4], 0  ;;  %s3555_s0 = inlined_call_operand.vmem [shape: s32[16,1], index: 0, kind: input, shape index: {}]   ;;  %s3556_s1 = inlined_call_operand.vmem [shape: bf16[50,32], index: 1, kind: input, shape index: {}]   ;;  %s3557_s2 = inlined_call_operand.hbm [shape: f32[1,32], index: 2, kind: input, shape index: {}]   ;;  %s3558_s3 = inlined_call_operand.vmem [shape: bf16[32,256], index: 3, kind: input, shape index: {}]   ;;  %s3559_s4 = inlined_call_operand.vmem [shape: bf16[64,256], index: 4, kind: input, shape index: {}]   ;;  %s3560_s5 = inlined_call_operand.hbm [shape: f32[1,256], index: 5, kind: input, shape index: {}]   ;;  %s3561_s6 = inlined_call_operand.vmem [shape: bf16[64,256], index: 6, kind: input, shape index: {}]   ;;  %s3562_s7 = inlined_call_operand.hbm [shape: bf16[64,256], index: 7, kind: input, shape index: {}]   ;;  %s3563_s8 = inlined_call_operand.vmem [shape: f32[1,256], index: 8, kind: input, shape index: {}]   ;;  %s3564_s9 = inlined_call_operand.vmem [shape: bf16[128,2], index: 9, kind: input, shape index: {}]   ;;  %s3565_s10 = inlined_call_operand.hbm [shape: f32[1,2], index: 10, kind: input, shape index: {}]   ;;  %s3566_s11 = inlined_call_operand.hbm [shape: f32[2,2], index: 11, kind: output, shape index: {}]  }
   0x1   :  { %17 = vsyncpa [#allocation7], 0 }
   0x2   :  { %18 = vsyncpa [#allocation10], 0 }
   0x3   :  { %19 = vsyncpa [#allocation5], 0  ;;  %s2808_s17 = smov [#allocation6]   ;;  %s2809_s19 = smov [#allocation3]  }
   0x4   :  { %s44_s18 = sshll.u32 %s2808_s17, 4  ;;  %s30_s20 = sshll.u32 %s2809_s19, 4  ;;  %s45_s18 = int_to_ptr.vmem [resolvable:$true] %s44_s18  ;;  %s31_s20 = int_to_ptr.vmem [resolvable:$true] %s30_s20 }
   0x5   :  { %s2690_s23 = scalar_lea.hbm %s3560_s5, 32 }
   0x6   :  { %p2691_p0 = scmp.ne.s32.totalorder %s3560_s5, %s2690_s23  ;;  %p2694_p1 = scmp.lt.u32.totalorder %s2690_s23, %s3560_s5 }
   0x8   :  { %p2696_p2 = pnand %p2694_p1, %p2691_p0 }
   0xa   :  { %2699 = shalt.err (!%p2696_p2)
}
   0xb   :  { %s2700_s28 = scalar_lea.vmem %s45_s18, 32  ;;  %p2705_p4 = scmp.lt.s32.totalorder %s45_s18, %s45_s18 }
   0xc   :  { %p2701_p3 = scmp.ne.s32.totalorder %s45_s18, %s2700_s28  ;;  %p2706_p5 = scmp.lt.s32.totalorder %s2700_s28, %s2700_s28 }
   0xe   :  { %p2707_p6 = por %p2706_p5, %p2705_p4 }
  0x10   :  { %p2708_p7 = pnand %p2707_p6, %p2701_p3 }
  0x12   :  { %2711 = shalt.err (!%p2708_p7)
}
  0x13   :  { %47 = dma.hbm_to_vmem [thread:$0]  %s3560_s5, 32, %s45_s18, [#allocation7]  }
  0x14   :  { %s2712_s14 = scalar_lea.hbm %s3557_s2, 16 }
  0x15   :  { %p2713_p8 = scmp.ne.s32.totalorder %s3557_s2, %s2712_s14  ;;  %p2716_p9 = scmp.lt.u32.totalorder %s2712_s14, %s3557_s2 }
  0x17   :  { %p2718_p10 = pnand %p2716_p9, %p2713_p8 }
  0x19   :  { %2721 = shalt.err (!%p2718_p10)
}
  0x1a   :  { %s2722_s21 = scalar_lea.vmem %s31_s20, 16  ;;  %s2726_s22 = scalar_lea.vmem %s31_s20, 32 }
  0x1b   :  { %p2723_p11 = scmp.ne.s32.totalorder %s31_s20, %s2722_s21  ;;  %p2727_p12 = scmp.lt.s32.totalorder %s31_s20, %s31_s20 }
  0x1c   :  { %p2728_p13 = scmp.lt.s32.totalorder %s2726_s22, %s2722_s21 }
  0x1e   :  { %p2729_p0 = por %p2728_p13, %p2727_p12 }
  0x20   :  { %p2730_p1 = pnand %p2729_p0, %p2723_p11 }
  0x22   :  { %2733 = shalt.err (!%p2730_p1)
}
  0x23   :  { %33 = dma.hbm_to_vmem [thread:$0]  %s3557_s2, 16, %s31_s20, [#allocation4]  }
  0x24   :  { %s2810_s23 = smov [#allocation8]   ;;  %s2734_s27 = scalar_lea.hbm %s3562_s7, 1024 }
  0x25   :  { %s55_s24 = sshll.u32 %s2810_s23, 4  ;;  %p2735_p2 = scmp.ne.s32.totalorder %s3562_s7, %s2734_s27  ;;  %s56_s24 = int_to_ptr.vmem [resolvable:$true] %s55_s24 }
  0x26   :  { %p2738_p3 = scmp.lt.u32.totalorder %s2734_s27, %s3562_s7 }
  0x28   :  { %p2740_p4 = pnand %p2738_p3, %p2735_p2 }
  0x2a   :  { %2743 = shalt.err (!%p2740_p4)
}
  0x2b   :  { %s2744_s13 = scalar_lea.vmem %s56_s24, 1024  ;;  %p2749_p6 = scmp.lt.s32.totalorder %s56_s24, %s56_s24 }
  0x2c   :  { %p2745_p5 = scmp.ne.s32.totalorder %s56_s24, %s2744_s13  ;;  %p2750_p7 = scmp.lt.s32.totalorder %s2744_s13, %s2744_s13 }
  0x2e   :  { %p2751_p8 = por %p2750_p7, %p2749_p6 }
  0x30   :  { %p2752_p9 = pnand %p2751_p8, %p2745_p5 }
  0x32   :  { %2755 = shalt.err (!%p2752_p9)
}
  0x33   :  { %s2811_s2 = smov 128   ;;  %s2812_s20 = smov 8  }
  0x34   :  { %61 = dma.hbm_to_vmem [thread:$0]  %s3562_s7, 1024, %s56_s24, [#allocation7], %s2811_s2, %s2811_s2, %s2812_s20  }
  0x35   :  { %s2813_s16 = smov [#allocation9]   ;;  %s2756_s22 = scalar_lea.hbm %s3565_s10, 16 }
  0x36   :  { %s72_s17 = sshll.u32 %s2813_s16, 4  ;;  %p2757_p10 = scmp.ne.s32.totalorder %s3565_s10, %s2756_s22  ;;  %s73_s17 = int_to_ptr.vmem [resolvable:$true] %s72_s17 }
  0x37   :  { %p2760_p11 = scmp.lt.u32.totalorder %s2756_s22, %s3565_s10 }
  0x39   :  { %p2762_p12 = pnand %p2760_p11, %p2757_p10 }
  0x3b   :  { %2765 = shalt.err (!%p2762_p12)
}
  0x3c   :  { %s2766_s26 = scalar_lea.vmem %s73_s17, 16  ;;  %s2770_s7 = scalar_lea.vmem %s73_s17, 32 }
  0x3d   :  { %p2767_p13 = scmp.ne.s32.totalorder %s73_s17, %s2766_s26  ;;  %p2771_p0 = scmp.lt.s32.totalorder %s73_s17, %s73_s17 }
  0x3e   :  { %p2772_p1 = scmp.lt.s32.totalorder %s2770_s7, %s2766_s26 }
  0x40   :  { %p2773_p2 = por %p2772_p1, %p2771_p0 }
  0x42   :  { %p2774_p3 = pnand %p2773_p2, %p2767_p13 }
  0x44   :  { %2777 = shalt.err (!%p2774_p3)
}
  0x45   :  { %75 = dma.hbm_to_vmem [thread:$0]  %s3565_s10, 16, %s73_s17, [#allocation10]  }
  0x46   :  { %2800 = dma.done.wait [#allocation4], 16  }
  0x47   :  { %2801 = vsyncadd [#allocation4], 4294967280 }
  0x48   :  { %2802 = dma.done.wait [#allocation7], 1056  }
  0x49   :  { %2803 = vsyncadd [#allocation7], 4294966240 }
  0x4a   :  { %2804 = dma.done.wait [#allocation10], 16  }
  0x4b   :  { %2805 = vsyncadd [#allocation10], 4294967280  ;;  %v2814_v0 = vmov 0   ;;  %v2815_v1 = vmov 0.0   ;;  %v89_v2 = vld [vmem:[%s3555_s0] sm:$0xff]  ;;  %v90_v4 = vld [vmem:[%s3555_s0 + $0x8] sm:$0xff]  ;;  %v91_v9 = vlaneseq }
  0x4c   :  { %2503 = vset.pattern.permute.xlu0 %v2814_v0  ;;  %2458 = vmatprep.subr.bf16.mxu1 %v2815_v1  ;;  %v2504_v3 = vld [vmem:[%s3556_s1] sm:$0xff]   ;;  %v2505_v5 = vld [vmem:[%s3556_s1 + $0x8] sm:$0xff]   ;;  %v2506_v6 = vld [vmem:[%s3556_s1 + $0x10] sm:$0xff]   ;;  %vm2816_vm0 = vmmov 0   ;;  %vm145_vm1 = vcmask 1040384   ;;  %vm141_vm4 = vcmask 408576  }
  0x4d   :  { %467 = vmatprep.mubr.bf16.mxu0 %v2814_v0  ;;  %94 = vperm.xlu0 %2503, %v89_v2   ;;  %v2507_v7 = vld [vmem:[%s3556_s1 + $0x18] ss:$0 sps:$4 sm:$0x11]   ;;  %v92_v10 = vand.u32 127, %v91_v9  ;;  %v2508_v16 = vld [vmem:[%s3558_s3] ss:$8 sps:$4 sm:$0xff]  }
  0x4e   :  { %2459 = vmatpush3.bf16.msra.mxu1 %v2504_v3  ;;  %2466 = vmatprep.mubr.msk.bf16.mxu1 %vm2816_vm0, %v2815_v1  ;;  %v147_v8 = vsel %vm145_vm1, %v2507_v7, 0  ;;  %v2510_v17 = vld [vmem:[%s3558_s3 + $0x4] ss:$8 sps:$4 sm:$0xff]   ;;  %v2513_v18 = vld [vmem:[%s3558_s3 + $0x14] ss:$8 sps:$4 sm:$0xff]   ;;  %vm229_vm5 = vcmask 261120  }
  0x4f   :  { %2460 = vmatprep.subr.bf16.mxu1 %v2815_v1  ;;  %v2971_v19 = vld [vmem:[%s3559_s4 + $0x4] ss:$8 sps:$4 sm:$0xff]   ;;  %v2511_v20 = vld [vmem:[%s3558_s3 + $0x10] ss:$8 sps:$4 sm:$0xff]   ;;  %v2981_v21 = vld [vmem:[%s3559_s4] ss:$8 sps:$4 sm:$0xff]  }
  0x50   :  { %435 = vmatprep.subr.bf16.mxu0 %v2971_v19  ;;  %v2987_v22 = vld [vmem:[%s3559_s4 + $0x14] ss:$8 sps:$4 sm:$0xff]   ;;  %v2992_v23 = vld [vmem:[%s3559_s4 + $0x10] ss:$8 sps:$4 sm:$0xff]   ;;  %v2999_v24 = vld [vmem:[%s3559_s4 + $0x24] ss:$8 sps:$4 sm:$0xff]  }
  0x51   :  { %97 = vperm.xlu0 %2503, %v90_v4   ;;  %436 = vmatpush1.bf16.msra.mxu0 %v2981_v21  ;;  %v3004_v25 = vld [vmem:[%s3559_s4 + $0x20] ss:$8 sps:$4 sm:$0xff]   ;;  %v3011_v26 = vld [vmem:[%s3559_s4 + $0x34] ss:$8 sps:$4 sm:$0xff]   ;;  %v3016_v27 = vld [vmem:[%s3559_s4 + $0x30] ss:$8 sps:$4 sm:$0xff]  }
  0x52   :  { %2461 = vmatpush3.bf16.msra.mxu1 %v2505_v5  ;;  %437 = vmatprep.subr.bf16.mxu0 %v2987_v22  ;;  %v2385_v28 = vld [vmem:[#allocation3] ss:$0 sm:$0xff]  ;;  %v3042_v38 = vshrl.u32 %v91_v9, 7  ;;  %v197_v40 = vld [vmem:[#allocation6] sm:$0x3]  ;;  %s2817_s4 = smov 32  }
  0x53   :  { %2462 = vmatprep.subr.bf16.mxu1 %v2815_v1  ;;  %s2818_s16 = smov 96   ;;  %s2819_s17 = smov 64   ;;  %vm424_vm6 = vcmask 254976   ;;  %vm324_vm7 = vcmask 523264   ;;  %vm540_vm8 = vcmask 257026   ;;  %vm658_vm9 = vcmask 259076  }
  0x54   :  { %v205_v39 = vsub.s32 1, %v3042_v38  ;;  %v201_v41 = vsub.s32 0, %v3042_v38  ;;  %vm773_vm10 = vcmask 261126   ;;  %vm545_vm11 = vcmask 521476  }
  0x55   :  { %438 = vmatpush1.bf16.msra.mxu0 %v2992_v23  ;;  %vm429_vm12 = vcmask 523526   ;;  %vm778_vm13 = vcmask 517376   ;;  %vm663_vm14 = vcmask 519426   ;;  %vm2250_vm15 = vcmask 785408  }
  0x56   :  { %2463 = vmatpush3.bf16.msra.mxu1 %v2506_v6  ;;  %439 = vmatprep.subr.bf16.mxu0 %v2999_v24  ;;  %v206_v42 = vrot.slane %v197_v40, %v205_v39  ;;  %v202_v44 = vrot.slane %v197_v40, %v201_v41 }
  0x57   :  { %2464 = vmatprep.subr.bf16.mxu1 %v2815_v1 }
  0x59   :  { %440 = vmatpush1.bf16.msra.mxu0 %v3004_v25 }
  0x5a   :  { %2465 = vmatpush3.bf16.msra.mxu1 %v147_v8  ;;  %441 = vmatprep.subr.bf16.mxu0 %v3011_v26 }
  0x5b   :  { %233 = vmatprep.subr.bf16.mxu1 %v2510_v17 }
  0x5d   :  { %442 = vmatpush1.bf16.msra.mxu0 %v3016_v27 }
  0x5e   :  { %671 = vmatprep.subr.bf16.mxu0 %v2971_v19 }
  0xcc   :  { %v95_v11 = vpop.permute.xlu0 %94 }
  0xcd   :  { %vm99_vm2 = vcmp.eq.s32.totalorder %v92_v10, %v95_v11 }
  0xce   :  { %v2383_v13 = vsel %vm99_vm2, 1.0, %v2815_v1 }
  0xd0   :  { %v98_v12 = vpop.permute.xlu0 %97 }
  0xd1   :  { %vm100_vm3 = vcmp.eq.s32.totalorder %v92_v10, %v98_v12 }
  0xd2   :  { %v2384_v14 = vsel %vm100_vm3, 1.0, %v2815_v1 }
  0xd3   :  { %v105_v15 = vpack.c.bf16 %v2384_v14, %v2383_v13 }
  0xd5   :  { %2467 = vmatmul.mubr.msk.bf16.vlgmr.msra.gmra.mrb[0].mxu1 %vm141_vm4, %v105_v15 }
  0xd6   :  { %265 = vmatprep.mubr.bf16.mxu1 %v2814_v0  ;;  %234 = vmatpush1.bf16.msra.mxu1 %v2508_v16 }
  0xd7   :  { %235 = vmatprep.subr.bf16.mxu1 %v2513_v18 }
  0xda   :  { %236 = vmatpush1.bf16.msra.mxu1 %v2511_v20 }
  0xdb   :  { %328 = vmatprep.subr.bf16.mxu1 %v2971_v19 }
 0x1a8   :  { %v183_v29 = vpop.f32.mrb[0].mxu1 }
 0x1a9   :  { %v184_v30 = vadd.f32 %v2385_v28, %v183_v29  ;;  %v2468_v31 = vpop.f32.mrb[1].mxu1 }
 0x1aa   :  { %v186_v32 = vpop.f32.mrb[2].mxu1 }
 0x1ab   :  { %v187_v33 = vadd.f32 %v2385_v28, %v186_v32  ;;  %v2469_v34 = vpop.f32.mrb[3].mxu1  ;;  %2558 = vtanh.f32 %v184_v30 }
 0x1ad   :  { %2560 = vtanh.f32 %v187_v33 }
 0x1b5   :  { %v2559_v35 = vpop.eup %2558 }
 0x1b7   :  { %v2561_v36 = vpop.eup %2560 }
 0x1b8   :  { %v192_v37 = vpack.c.bf16 %v2561_v36, %v2559_v35 }
 0x1ba   :  { %2395 = vmatmul.mubr.msk.bf16.vlgmr.msra.gmra.mrb[4].mxu1 %vm229_vm5, %v192_v37 }
 0x1bb   :  { %329 = vmatpush1.bf16.msra.mxu1 %v2981_v21  ;;  %360 = vmatprep.mubr.bf16.mxu1 %v2814_v0 }
 0x1bc   :  { %330 = vmatprep.subr.bf16.mxu1 %v2987_v22 }
 0x1bf   :  { %331 = vmatpush1.bf16.msra.mxu1 %v2992_v23 }
 0x1c0   :  { %332 = vmatprep.subr.bf16.mxu1 %v2999_v24 }
 0x1c3   :  { %333 = vmatpush1.bf16.msra.mxu1 %v3004_v25 }
 0x1c4   :  { %334 = vmatprep.subr.bf16.mxu1 %v3011_v26 }
 0x1c7   :  { %335 = vmatpush1.bf16.msra.mxu1 %v3016_v27 }
 0x1c8   :  { %553 = vmatprep.subr.bf16.mxu1 %v2971_v19 }
 0x1ca   :  { %361 = vmatmul.mubr.bf16.vlgmr.msra.gmra.mrb[8].mxu1 %v2814_v0 }
 0x1cb   :  { %554 = vmatpush1.bf16.msra.mxu1 %v2981_v21  ;;  %585 = vmatprep.mubr.bf16.mxu1 %v2814_v0 }
 0x1cc   :  { %555 = vmatprep.subr.bf16.mxu1 %v2987_v22 }
 0x1cf   :  { %556 = vmatpush1.bf16.msra.mxu1 %v2992_v23 }
 0x1d0   :  { %557 = vmatprep.subr.bf16.mxu1 %v2999_v24 }
 0x1d3   :  { %558 = vmatpush1.bf16.msra.mxu1 %v3004_v25 }
 0x1d4   :  { %559 = vmatprep.subr.bf16.mxu1 %v3011_v26 }
 0x1d7   :  { %560 = vmatpush1.bf16.msra.mxu1 %v3016_v27 }
 0x1d8   :  { %786 = vmatprep.subr.bf16.mxu1 %v2971_v19 }
 0x28d   :  { %v267_v43 = vpop.f32.mrb[4].mxu1 }
 0x28e   :  { %v269_v45 = vpop.f32.mrb[5].mxu1  ;;  %v3056_v56 = vadd.f32 %v267_v43, %v202_v44 }
 0x28f   :  { %v3050_v46 = vadd.f32 %v269_v45, %v206_v42  ;;  %v271_v47 = vpop.f32.mrb[6].mxu1 }
 0x290   :  { %v3052_v48 = vadd.f32 %v271_v47, %v202_v44  ;;  %v273_v49 = vpop.f32.mrb[7].mxu1 }
 0x291   :  { %v3054_v52 = vadd.f32 %v273_v49, %v206_v42 }
 0x29d   :  { %v362_v50 = vpop.f32.mrb[8].mxu1 }
 0x29e   :  { %v364_v51 = vpop.f32.mrb[9].mxu1  ;;  %v369_v58 = vadd.f32 %v362_v50, %v3056_v56 }
 0x29f   :  { %v371_v53 = vrot.slane %v364_v51, 2  ;;  %v366_v54 = vpop.f32.mrb[10].mxu1 }
 0x2a0   :  { %v367_v55 = vpop.f32.mrb[11].mxu1 }
 0x2a1   :  { %v373_v57 = vadd.f32 %v371_v53, %v3054_v52 }
 0x2a3   :  { %2562 = vtanh.f32 %v373_v57 }
 0x2a4   :  { %2564 = vtanh.f32 %v369_v58 }
 0x2ad   :  { %v2563_v59 = vpop.eup %2562 }
 0x2ae   :  { %393 = vrot.lane.b32.xlu1 %v2563_v59, %s2817_s4  ;;  %v2565_v60 = vpop.eup %2564  ;;  %v378_v61 = vmul.f32 0.5, %v2563_v59 }
 0x2af   :  { %v376_v63 = vmul.f32 0.5, %v2565_v60 }
 0x2b0   :  { %v379_v62 = vadd.f32 0.5, %v378_v61 }
 0x2b1   :  { %v377_v4 = vadd.f32 0.5, %v376_v63 }
 0x2b2   :  { %382 = vrot.lane.b32.xlu1 %v2565_v60, %s2817_s4  ;;  %v391_v7 = vmul.f32 0.0, %v379_v62 }
 0x2b3   :  { %v380_v10 = vmul.f32 0.0, %v377_v4 }
 0x320   :  { %v394_v2 = vpop.permute.xlu1 %393 }
 0x321   :  { %v396_v3 = vmul.f32 %v394_v2, %v379_v62 }
 0x323   :  { %398 = vrot.lane.b32.xlu0 %v396_v3, %s2817_s4 }
 0x324   :  { %v383_v5 = vpop.permute.xlu1 %382 }
 0x325   :  { %v385_v6 = vmul.f32 %v383_v5, %v377_v4 }
 0x327   :  { %387 = vrot.lane.b32.xlu1 %v385_v6, %s2817_s4 }
 0x395   :  { %v399_v8 = vpop.permute.xlu0 %398 }
 0x396   :  { %v3064_v9 = vadd.f32 %v399_v8, %v391_v7 }
 0x398   :  { %2566 = vtanh.f32 %v3064_v9  ;;  %v505_v58 = vrot.slane %v3064_v9, 2 }
 0x399   :  { %v388_v11 = vpop.permute.xlu1 %387 }
 0x39a   :  { %v390_v12 = vadd.f32 %v388_v11, %v380_v10 }
 0x39c   :  { %2568 = vtanh.f32 %v390_v12  ;;  %v491_v57 = vrot.slane %v390_v12, 6 }
 0x3a2   :  { %v2567_v13 = vpop.eup %2566 }
 0x3a3   :  { %410 = vrot.lane.b32.xlu0 %v2567_v13, %s2817_s4 }
 0x3a6   :  { %v2569_v14 = vpop.eup %2568 }
 0x3a7   :  { %404 = vrot.lane.b32.xlu1 %v2569_v14, %s2817_s4 }
 0x415   :  { %v411_v15 = vpop.permute.xlu0 %410 }
 0x416   :  { %v3069_v16 = vmul.f32 %v411_v15, %v379_v62 }
 0x418   :  { %v419_v17 = vrot.slane %v3069_v16, 6 }
 0x419   :  { %v405_v18 = vpop.permute.xlu1 %404 }
 0x41a   :  { %v407_v20 = vmul.f32 %v405_v18, %v377_v4  ;;  %420 = vrot.lane.b32.xlu1 %v419_v17, %s2818_s16 }
 0x41c   :  { %415 = vrot.lane.b32.xlu0 %v407_v20, %s2819_s17 }
 0x48c   :  { %v421_v28 = vpop.permute.xlu1 %420 }
 0x48e   :  { %v416_v29 = vpop.permute.xlu0 %415 }
 0x48f   :  { %v423_v30 = vsel %vm229_vm5, %v416_v29, %v421_v28  ;;  %425 = vst.msk [vmem:[#allocation2] sm:$0x3] %vm424_vm6, %v416_v29 }
 0x490   :  { %v431_v31 = vpack.c.bf16 %v423_v30, %v423_v30 }
 0x492   :  { %2404 = vmatmul.mubr.msk.bf16.vlgmr.msra.gmra.mrb[0].mxu0 %vm324_vm7, %v431_v31 }
 0x493   :  { %672 = vmatpush1.bf16.msra.mxu0 %v2981_v21  ;;  %703 = vmatprep.mubr.bf16.mxu0 %v2814_v0 }
 0x494   :  { %673 = vmatprep.subr.bf16.mxu0 %v2987_v22 }
 0x497   :  { %674 = vmatpush1.bf16.msra.mxu0 %v2992_v23 }
 0x498   :  { %675 = vmatprep.subr.bf16.mxu0 %v2999_v24 }
 0x49b   :  { %676 = vmatpush1.bf16.msra.mxu0 %v3004_v25 }
 0x49c   :  { %677 = vmatprep.subr.bf16.mxu0 %v3011_v26 }
 0x49f   :  { %678 = vmatpush1.bf16.msra.mxu0 %v3016_v27 }
 0x4a0   :  { %897 = vmatprep.subr.bf16.mxu0 %v2971_v19 }
 0x565   :  { %v469_v32 = vpop.f32.mrb[0].mxu0 }
 0x566   :  { %v477_v33 = vrot.slane %v469_v32, 6  ;;  %v471_v34 = vpop.f32.mrb[1].mxu0 }
 0x567   :  { %v481_v35 = vrot.slane %v471_v34, 4  ;;  %v473_v36 = vpop.f32.mrb[2].mxu0 }
 0x568   :  { %v479_v37 = vadd.f32 %v477_v33, %v3056_v56  ;;  %v474_v40 = vpop.f32.mrb[3].mxu0 }
 0x569   :  { %v483_v42 = vadd.f32 %v481_v35, %v3054_v52 }
 0x56a   :  { %2570 = vtanh.f32 %v479_v37 }
 0x56b   :  { %2572 = vtanh.f32 %v483_v42 }
 0x574   :  { %v2571_v43 = vpop.eup %2570 }
 0x575   :  { %v2573_v44 = vpop.eup %2572  ;;  %495 = vrot.lane.b32.xlu1 %v2571_v43, %s2817_s4  ;;  %v486_v45 = vmul.f32 0.5, %v2571_v43 }
 0x576   :  { %509 = vrot.lane.b32.xlu0 %v2573_v44, %s2817_s4  ;;  %v488_v47 = vmul.f32 0.5, %v2573_v44 }
 0x577   :  { %v487_v49 = vadd.f32 0.5, %v486_v45 }
 0x578   :  { %v489_v51 = vadd.f32 0.5, %v488_v47 }
 0x579   :  { %v493_v59 = vmul.f32 %v491_v57, %v487_v49 }
 0x57a   :  { %v507_v61 = vmul.f32 %v505_v58, %v489_v51 }
 0x5e7   :  { %v496_v50 = vpop.permute.xlu1 %495 }
 0x5e8   :  { %v498_v53 = vmul.f32 %v496_v50, %v487_v49  ;;  %v510_v54 = vpop.permute.xlu0 %509 }
 0x5e9   :  { %v512_v55 = vmul.f32 %v510_v54, %v489_v51 }
 0x5ea   :  { %500 = vrot.lane.b32.xlu1 %v498_v53, %s2817_s4 }
 0x5eb   :  { %514 = vrot.lane.b32.xlu0 %v512_v55, %s2817_s4 }
 0x65c   :  { %v501_v60 = vpop.permute.xlu1 %500 }
 0x65d   :  { %v503_v62 = vadd.f32 %v501_v60, %v493_v59  ;;  %v515_v63 = vpop.permute.xlu0 %514 }
 0x65e   :  { %v517_v2 = vadd.f32 %v515_v63, %v507_v61 }
 0x65f   :  { %2574 = vtanh.f32 %v503_v62  ;;  %v609_v45 = vrot.slane %v503_v62, 6 }
 0x660   :  { %2576 = vtanh.f32 %v517_v2  ;;  %v623_v47 = vrot.slane %v517_v2, 2 }
 0x669   :  { %v2575_v3 = vpop.eup %2574 }
 0x66a   :  { %v2577_v4 = vpop.eup %2576  ;;  %520 = vrot.lane.b32.xlu1 %v2575_v3, %s2817_s4 }
 0x66b   :  { %526 = vrot.lane.b32.xlu0 %v2577_v4, %s2817_s4 }
 0x6dc   :  { %v521_v5 = vpop.permute.xlu1 %520 }
 0x6dd   :  { %v523_v6 = vmul.f32 %v521_v5, %v487_v49  ;;  %v527_v7 = vpop.permute.xlu0 %526 }
 0x6de   :  { %v3095_v8 = vmul.f32 %v527_v7, %v489_v51 }
 0x6df   :  { %531 = vrot.lane.b32.xlu0 %v523_v6, %s2819_s17 }
 0x6e0   :  { %v535_v9 = vrot.slane %v3095_v8, 2 }
 0x6e2   :  { %536 = vrot.lane.b32.xlu1 %v535_v9, %s2818_s16 }
 0x751   :  { %v532_v10 = vpop.permute.xlu0 %531 }
 0x752   :  { %541 = vst.msk [vmem:[#allocation2] sm:$0xc] %vm540_vm8, %v532_v10 }
 0x754   :  { %v537_v11 = vpop.permute.xlu1 %536 }
 0x755   :  { %v539_v12 = vsel %vm229_vm5, %v532_v10, %v537_v11 }
 0x756   :  { %v547_v13 = vpack.c.bf16 %v539_v12, %v539_v12 }
 0x758   :  { %v549_v14 = vrot.slane %v547_v13, 1 }
 0x75a   :  { %2405 = vmatmul.mubr.msk.bf16.vlgmr.msra.gmra.mrb[12].mxu1 %vm324_vm7, %v549_v14 }
 0x75b   :  { %787 = vmatpush1.bf16.msra.mxu1 %v2981_v21  ;;  %818 = vmatprep.mubr.bf16.mxu1 %v2814_v0 }
 0x75c   :  { %788 = vmatprep.subr.bf16.mxu1 %v2987_v22 }
 0x75f   :  { %789 = vmatpush1.bf16.msra.mxu1 %v2992_v23 }
 0x760   :  { %790 = vmatprep.subr.bf16.mxu1 %v2999_v24 }
 0x763   :  { %791 = vmatpush1.bf16.msra.mxu1 %v3004_v25 }
 0x764   :  { %792 = vmatprep.subr.bf16.mxu1 %v3011_v26 }
 0x767   :  { %793 = vmatpush1.bf16.msra.mxu1 %v3016_v27 }
 0x768   :  { %1013 = vmatprep.subr.bf16.mxu1 %v2971_v19 }
 0x82d   :  { %v587_v15 = vpop.f32.mrb[12].mxu1 }
 0x82e   :  { %v595_v17 = vrot.slane %v587_v15, 4  ;;  %v589_v18 = vpop.f32.mrb[13].mxu1 }
 0x82f   :  { %v599_v20 = vrot.slane %v589_v18, 6  ;;  %v591_v28 = vpop.f32.mrb[14].mxu1 }
 0x830   :  { %v597_v29 = vadd.f32 %v595_v17, %v3056_v56  ;;  %v592_v30 = vpop.f32.mrb[15].mxu1 }
 0x831   :  { %v601_v31 = vadd.f32 %v599_v20, %v3054_v52 }
 0x832   :  { %2578 = vtanh.f32 %v597_v29 }
 0x833   :  { %2580 = vtanh.f32 %v601_v31 }
 0x83c   :  { %v2579_v32 = vpop.eup %2578 }
 0x83d   :  { %v2581_v33 = vpop.eup %2580  ;;  %613 = vrot.lane.b32.xlu1 %v2579_v32, %s2817_s4  ;;  %v604_v34 = vmul.f32 0.5, %v2579_v32 }
 0x83e   :  { %627 = vrot.lane.b32.xlu0 %v2581_v33, %s2817_s4  ;;  %v606_v35 = vmul.f32 0.5, %v2581_v33 }
 0x83f   :  { %v605_v36 = vadd.f32 0.5, %v604_v34 }
 0x840   :  { %v607_v40 = vadd.f32 0.5, %v606_v35 }
 0x841   :  { %v611_v49 = vmul.f32 %v609_v45, %v605_v36 }
 0x842   :  { %v625_v51 = vmul.f32 %v623_v47, %v607_v40 }
 0x8af   :  { %v614_v37 = vpop.permute.xlu1 %613 }
 0x8b0   :  { %v616_v42 = vmul.f32 %v614_v37, %v605_v36  ;;  %v628_v43 = vpop.permute.xlu0 %627 }
 0x8b1   :  { %v630_v44 = vmul.f32 %v628_v43, %v607_v40 }
 0x8b2   :  { %618 = vrot.lane.b32.xlu1 %v616_v42, %s2817_s4 }
 0x8b3   :  { %632 = vrot.lane.b32.xlu0 %v630_v44, %s2817_s4 }
 0x924   :  { %v619_v50 = vpop.permute.xlu1 %618 }
 0x925   :  { %v621_v53 = vadd.f32 %v619_v50, %v611_v49  ;;  %v633_v54 = vpop.permute.xlu0 %632 }
 0x926   :  { %v635_v55 = vadd.f32 %v633_v54, %v625_v51 }
 0x927   :  { %2582 = vtanh.f32 %v621_v53  ;;  %v724_v32 = vrot.slane %v621_v53, 6 }
 0x928   :  { %2584 = vtanh.f32 %v635_v55 }
 0x931   :  { %v2583_v57 = vpop.eup %2582 }
 0x932   :  { %v2585_v58 = vpop.eup %2584  ;;  %638 = vrot.lane.b32.xlu1 %v2583_v57, %s2817_s4 }
 0x933   :  { %644 = vrot.lane.b32.xlu0 %v2585_v58, %s2817_s4 }
 0x9a4   :  { %v639_v59 = vpop.permute.xlu1 %638 }
 0x9a5   :  { %v641_v60 = vmul.f32 %v639_v59, %v605_v36  ;;  %v645_v61 = vpop.permute.xlu0 %644 }
 0x9a6   :  { %v3120_v63 = vmul.f32 %v645_v61, %v607_v40 }
 0x9a7   :  { %649 = vrot.lane.b32.xlu0 %v641_v60, %s2819_s17 }
 0x9a8   :  { %v653_v62 = vrot.slane %v3120_v63, 6 }
 0x9aa   :  { %654 = vrot.lane.b32.xlu1 %v653_v62, %s2818_s16 }
 0xa19   :  { %v650_v2 = vpop.permute.xlu0 %649 }
 0xa1a   :  { %659 = vst.msk [vmem:[#allocation2] sm:$0x30] %vm658_vm9, %v650_v2 }
 0xa1c   :  { %v655_v3 = vpop.permute.xlu1 %654 }
 0xa1d   :  { %v657_v4 = vsel %vm229_vm5, %v650_v2, %v655_v3 }
 0xa1e   :  { %v665_v5 = vpack.c.bf16 %v657_v4, %v657_v4 }
 0xa20   :  { %v667_v6 = vrot.slane %v665_v5, 2 }
 0xa22   :  { %2406 = vmatmul.mubr.msk.bf16.vlgmr.msra.gmra.mrb[4].mxu0 %vm324_vm7, %v667_v6 }
 0xa23   :  { %898 = vmatpush1.bf16.msra.mxu0 %v2981_v21  ;;  %929 = vmatprep.mubr.bf16.mxu0 %v2814_v0 }
 0xa24   :  { %899 = vmatprep.subr.bf16.mxu0 %v2987_v22 }
 0xa27   :  { %900 = vmatpush1.bf16.msra.mxu0 %v2992_v23 }
 0xa28   :  { %901 = vmatprep.subr.bf16.mxu0 %v2999_v24 }
 0xa2b   :  { %902 = vmatpush1.bf16.msra.mxu0 %v3004_v25 }
 0xa2c   :  { %903 = vmatprep.subr.bf16.mxu0 %v3011_v26 }
 0xa2f   :  { %904 = vmatpush1.bf16.msra.mxu0 %v3016_v27 }
 0xa30   :  { %1129 = vmatprep.subr.bf16.mxu0 %v2971_v19 }
 0xaf5   :  { %v705_v7 = vpop.f32.mrb[4].mxu0 }
 0xaf6   :  { %v713_v9 = vrot.slane %v705_v7, 2  ;;  %v707_v10 = vpop.f32.mrb[5].mxu0 }
 0xaf7   :  { %v716_v11 = vadd.f32 %v707_v10, %v3054_v52  ;;  %v709_v12 = vpop.f32.mrb[6].mxu0 }
 0xaf8   :  { %v715_v13 = vadd.f32 %v713_v9, %v3056_v56  ;;  %v710_v14 = vpop.f32.mrb[7].mxu0  ;;  %v738_v56 = vrot.slane %v635_v55, 2 }
 0xaf9   :  { %2586 = vtanh.f32 %v716_v11 }
 0xafa   :  { %2588 = vtanh.f32 %v715_v13 }
 0xb03   :  { %v2587_v15 = vpop.eup %2586 }
 0xb04   :  { %v2589_v17 = vpop.eup %2588  ;;  %742 = vrot.lane.b32.xlu0 %v2587_v15, %s2817_s4  ;;  %v721_v18 = vmul.f32 0.5, %v2587_v15 }
 0xb05   :  { %728 = vrot.lane.b32.xlu1 %v2589_v17, %s2817_s4  ;;  %v719_v20 = vmul.f32 0.5, %v2589_v17 }
 0xb06   :  { %v722_v19 = vadd.f32 0.5, %v721_v18 }
 0xb07   :  { %v720_v29 = vadd.f32 0.5, %v719_v20 }
 0xb08   :  { %v740_v33 = vmul.f32 %v738_v56, %v722_v19 }
 0xb09   :  { %v726_v35 = vmul.f32 %v724_v32, %v720_v29 }
 0xb76   :  { %v743_v28 = vpop.permute.xlu0 %742 }
 0xb77   :  { %v745_v30 = vmul.f32 %v743_v28, %v722_v19  ;;  %v729_v31 = vpop.permute.xlu1 %728 }
 0xb78   :  { %v731_v52 = vmul.f32 %v729_v31, %v720_v29 }
 0xb79   :  { %747 = vrot.lane.b32.xlu0 %v745_v30, %s2817_s4 }
 0xb7a   :  { %733 = vrot.lane.b32.xlu1 %v731_v52, %s2817_s4 }
 0xbeb   :  { %v748_v34 = vpop.permute.xlu0 %747 }
 0xbec   :  { %v750_v36 = vadd.f32 %v748_v34, %v740_v33  ;;  %v734_v37 = vpop.permute.xlu1 %733 }
 0xbed   :  { %v736_v40 = vadd.f32 %v734_v37, %v726_v35 }
 0xbee   :  { %2590 = vtanh.f32 %v750_v36  ;;  %v853_v18 = vrot.slane %v750_v36, 2 }
 0xbef   :  { %2592 = vtanh.f32 %v736_v40  ;;  %v839_v15 = vrot.slane %v736_v40, 6 }
 0xbf8   :  { %v2591_v42 = vpop.eup %2590 }
 0xbf9   :  { %v2593_v43 = vpop.eup %2592  ;;  %759 = vrot.lane.b32.xlu0 %v2591_v42, %s2817_s4 }
 0xbfa   :  { %753 = vrot.lane.b32.xlu1 %v2593_v43, %s2817_s4 }
 0xc6b   :  { %v760_v44 = vpop.permute.xlu0 %759 }
 0xc6c   :  { %v3145_v45 = vmul.f32 %v760_v44, %v722_v19  ;;  %v754_v47 = vpop.permute.xlu1 %753 }
 0xc6d   :  { %v756_v49 = vmul.f32 %v754_v47, %v720_v29 }
 0xc6e   :  { %v768_v50 = vrot.slane %v3145_v45, 2 }
 0xc6f   :  { %764 = vrot.lane.b32.xlu0 %v756_v49, %s2819_s17 }
 0xc70   :  { %769 = vrot.lane.b32.xlu1 %v768_v50, %s2818_s16 }
 0xce1   :  { %v765_v51 = vpop.permute.xlu0 %764 }
 0xce2   :  { %774 = vst.msk [vmem:[#allocation2] sm:$0xc0] %vm773_vm10, %v765_v51  ;;  %v770_v53 = vpop.permute.xlu1 %769 }
 0xce3   :  { %v772_v54 = vsel %vm229_vm5, %v765_v51, %v770_v53 }
 0xce4   :  { %v780_v55 = vpack.c.bf16 %v772_v54, %v772_v54 }
 0xce6   :  { %v782_v57 = vrot.slane %v780_v55, 3 }
 0xce8   :  { %2407 = vmatmul.mubr.msk.bf16.vlgmr.msra.gmra.mrb[16].mxu1 %vm324_vm7, %v782_v57 }
 0xce9   :  { %1014 = vmatpush1.bf16.msra.mxu1 %v2981_v21  ;;  %1045 = vmatprep.mubr.bf16.mxu1 %v2814_v0 }
 0xcea   :  { %1015 = vmatprep.subr.bf16.mxu1 %v2987_v22 }
 0xced   :  { %1016 = vmatpush1.bf16.msra.mxu1 %v2992_v23 }
 0xcee   :  { %1017 = vmatprep.subr.bf16.mxu1 %v2999_v24 }
 0xcf1   :  { %1018 = vmatpush1.bf16.msra.mxu1 %v3004_v25 }
 0xcf2   :  { %1019 = vmatprep.subr.bf16.mxu1 %v3011_v26 }
 0xcf5   :  { %1020 = vmatpush1.bf16.msra.mxu1 %v3016_v27 }
 0xdbb   :  { %v820_v58 = vpop.f32.mrb[16].mxu1 }
 0xdbc   :  { %v827_v59 = vadd.f32 %v820_v58, %v3052_v48  ;;  %v822_v60 = vpop.f32.mrb[17].mxu1 }
 0xdbd   :  { %v829_v61 = vrot.slane %v822_v60, 2  ;;  %v824_v62 = vpop.f32.mrb[18].mxu1 }
 0xdbe   :  { %2594 = vtanh.f32 %v827_v59  ;;  %v825_v2 = vpop.f32.mrb[19].mxu1 }
 0xdbf   :  { %v831_v3 = vadd.f32 %v829_v61, %v3050_v46 }
 0xdc1   :  { %2596 = vtanh.f32 %v831_v3 }
 0xdc8   :  { %v2595_v4 = vpop.eup %2594 }
 0xdc9   :  { %843 = vrot.lane.b32.xlu1 %v2595_v4, %s2817_s4  ;;  %v834_v6 = vmul.f32 0.5, %v2595_v4 }
 0xdcb   :  { %v2597_v5 = vpop.eup %2596  ;;  %v835_v9 = vadd.f32 0.5, %v834_v6 }
 0xdcc   :  { %857 = vrot.lane.b32.xlu0 %v2597_v5, %s2817_s4  ;;  %v836_v7 = vmul.f32 0.5, %v2597_v5 }
 0xdcd   :  { %v841_v17 = vmul.f32 %v839_v15, %v835_v9 }
 0xdce   :  { %v837_v12 = vadd.f32 0.5, %v836_v7 }
 0xdd0   :  { %v855_v28 = vmul.f32 %v853_v18, %v837_v12 }
 0xe3b   :  { %v844_v10 = vpop.permute.xlu1 %843 }
 0xe3c   :  { %v846_v11 = vmul.f32 %v844_v10, %v835_v9 }
 0xe3e   :  { %848 = vrot.lane.b32.xlu1 %v846_v11, %s2817_s4  ;;  %v858_v13 = vpop.permute.xlu0 %857 }
 0xe3f   :  { %v860_v14 = vmul.f32 %v858_v13, %v837_v12 }
 0xe41   :  { %862 = vrot.lane.b32.xlu0 %v860_v14, %s2817_s4 }
 0xeb0   :  { %v849_v20 = vpop.permute.xlu1 %848 }
 0xeb1   :  { %v851_v19 = vadd.f32 %v849_v20, %v841_v17 }
 0xeb3   :  { %2598 = vtanh.f32 %v851_v19  ;;  %v863_v29 = vpop.permute.xlu0 %862  ;;  %v953_v59 = vrot.slane %v851_v19, 6 }
 0xeb4   :  { %v865_v30 = vadd.f32 %v863_v29, %v855_v28 }
 0xeb6   :  { %2600 = vtanh.f32 %v865_v30  ;;  %v967_v60 = vrot.slane %v865_v30, 2 }
 0xebd   :  { %v2599_v31 = vpop.eup %2598 }
 0xebe   :  { %868 = vrot.lane.b32.xlu1 %v2599_v31, %s2817_s4 }
 0xec0   :  { %v2601_v52 = vpop.eup %2600 }
 0xec1   :  { %874 = vrot.lane.b32.xlu0 %v2601_v52, %s2817_s4 }
 0xf30   :  { %v869_v56 = vpop.permute.xlu1 %868 }
 0xf31   :  { %v871_v32 = vmul.f32 %v869_v56, %v835_v9 }
 0xf33   :  { %879 = vrot.lane.b32.xlu0 %v871_v32, %s2819_s17  ;;  %v875_v33 = vpop.permute.xlu0 %874 }
 0xf34   :  { %v3170_v34 = vmul.f32 %v875_v33, %v837_v12 }
 0xf36   :  { %v883_v35 = vrot.slane %v3170_v34, 6 }
 0xf38   :  { %884 = vrot.lane.b32.xlu1 %v883_v35, %s2818_s16 }
 0xfa5   :  { %v3174_v36 = vpop.permute.xlu0 %879 }
 0xfaa   :  { %v885_v37 = vpop.permute.xlu1 %884 }
 0xfab   :  { %v887_v40 = vsel %vm229_vm5, %v3174_v36, %v885_v37 }
 0xfac   :  { %v893_v42 = vpack.c.bf16 %v887_v40, %v887_v40 }
 0xfae   :  { %2408 = vmatmul.mubr.msk.bf16.vlgmr.msra.gmra.mrb[8].mxu0 %vm324_vm7, %v893_v42 }
 0xfaf   :  { %1130 = vmatpush1.bf16.msra.mxu0 %v2981_v21  ;;  %1161 = vmatprep.mubr.bf16.mxu0 %v2814_v0 }
 0xfb0   :  { %1131 = vmatprep.subr.bf16.mxu0 %v2987_v22 }
 0xfb3   :  { %1132 = vmatpush1.bf16.msra.mxu0 %v2992_v23 }
 0xfb4   :  { %1133 = vmatprep.subr.bf16.mxu0 %v2999_v24 }
 0xfb7   :  { %1134 = vmatpush1.bf16.msra.mxu0 %v3004_v25 }
 0xfb8   :  { %1135 = vmatprep.subr.bf16.mxu0 %v3011_v26 }
 0xfbb   :  { %1136 = vmatpush1.bf16.msra.mxu0 %v3016_v27 }
0x1081   :  { %v931_v43 = vpop.f32.mrb[8].mxu0 }
0x1082   :  { %v939_v44 = vrot.slane %v931_v43, 6  ;;  %v933_v47 = vpop.f32.mrb[9].mxu0 }
0x1083   :  { %v943_v49 = vrot.slane %v933_v47, 4  ;;  %v935_v50 = vpop.f32.mrb[10].mxu0 }
0x1084   :  { %v941_v21 = vadd.f32 %v939_v44, %v3052_v48  ;;  %v936_v51 = vpop.f32.mrb[11].mxu0 }
0x1085   :  { %v945_v22 = vadd.f32 %v943_v49, %v3050_v46 }
0x1086   :  { %2602 = vtanh.f32 %v941_v21 }
0x1087   :  { %2604 = vtanh.f32 %v945_v22 }
0x1090   :  { %v2603_v23 = vpop.eup %2602 }
0x1091   :  { %v2605_v24 = vpop.eup %2604  ;;  %957 = vrot.lane.b32.xlu1 %v2603_v23, %s2817_s4  ;;  %v948_v25 = vmul.f32 0.5, %v2603_v23 }
0x1092   :  { %971 = vrot.lane.b32.xlu0 %v2605_v24, %s2817_s4  ;;  %v950_v26 = vmul.f32 0.5, %v2605_v24 }
0x1093   :  { %v949_v27 = vadd.f32 0.5, %v948_v25 }
0x1094   :  { %v951_v54 = vadd.f32 0.5, %v950_v26 }
0x1095   :  { %v955_v61 = vmul.f32 %v953_v59, %v949_v27 }
0x1096   :  { %v969_v2 = vmul.f32 %v967_v60, %v951_v54 }
0x1103   :  { %v958_v53 = vpop.permute.xlu1 %957 }
0x1104   :  { %v960_v55 = vmul.f32 %v958_v53, %v949_v27  ;;  %v972_v57 = vpop.permute.xlu0 %971 }
0x1105   :  { %v974_v58 = vmul.f32 %v972_v57, %v951_v54 }
0x1106   :  { %962 = vrot.lane.b32.xlu1 %v960_v55, %s2817_s4 }
0x1107   :  { %976 = vrot.lane.b32.xlu0 %v974_v58, %s2817_s4 }
0x1178   :  { %v963_v62 = vpop.permute.xlu1 %962 }
0x1179   :  { %v965_v3 = vadd.f32 %v963_v62, %v955_v61  ;;  %v977_v4 = vpop.permute.xlu0 %976 }
0x117a   :  { %v979_v5 = vadd.f32 %v977_v4, %v969_v2 }
0x117b   :  { %2606 = vtanh.f32 %v965_v3  ;;  %v1069_v21 = vrot.slane %v965_v3, 6 }
0x117c   :  { %2608 = vtanh.f32 %v979_v5  ;;  %v1083_v51 = vrot.slane %v979_v5, 2 }
0x1185   :  { %v2607_v6 = vpop.eup %2606 }
0x1186   :  { %v2609_v7 = vpop.eup %2608  ;;  %982 = vrot.lane.b32.xlu1 %v2607_v6, %s2817_s4 }
0x1187   :  { %988 = vrot.lane.b32.xlu0 %v2609_v7, %s2817_s4 }
0x11f8   :  { %v983_v9 = vpop.permute.xlu1 %982 }
0x11f9   :  { %v985_v10 = vmul.f32 %v983_v9, %v949_v27  ;;  %v989_v11 = vpop.permute.xlu0 %988 }
0x11fa   :  { %v3195_v12 = vmul.f32 %v989_v11, %v951_v54 }
0x11fb   :  { %993 = vrot.lane.b32.xlu0 %v985_v10, %s2819_s17 }
0x11fc   :  { %v997_v13 = vrot.slane %v3195_v12, 2 }
0x11fe   :  { %998 = vrot.lane.b32.xlu1 %v997_v13, %s2818_s16 }
0x126d   :  { %v3200_v14 = vpop.permute.xlu0 %993 }
0x1270   :  { %v999_v15 = vpop.permute.xlu1 %998 }
0x1271   :  { %v1001_v17 = vsel %vm229_vm5, %v3200_v14, %v999_v15 }
0x1272   :  { %v1007_v18 = vpack.c.bf16 %v1001_v17, %v1001_v17 }
0x1274   :  { %v1009_v20 = vrot.slane %v1007_v18, 1 }
0x1276   :  { %2409 = vmatmul.mubr.msk.bf16.vlgmr.msra.gmra.mrb[20].mxu1 %vm324_vm7, %v1009_v20 }
0x1277   :  { %1329 = vmatprep.mubr.bf16.mxu1 %v2814_v0 }
0x1349   :  { %v1047_v19 = vpop.f32.mrb[20].mxu1 }
0x134a   :  { %v1055_v28 = vrot.slane %v1047_v19, 4  ;;  %v1049_v29 = vpop.f32.mrb[21].mxu1 }
0x134b   :  { %v1059_v30 = vrot.slane %v1049_v29, 6  ;;  %v1051_v31 = vpop.f32.mrb[22].mxu1 }
0x134c   :  { %v1057_v52 = vadd.f32 %v1055_v28, %v3052_v48  ;;  %v1052_v56 = vpop.f32.mrb[23].mxu1 }
0x134d   :  { %v1061_v32 = vadd.f32 %v1059_v30, %v3050_v46 }
0x134e   :  { %2610 = vtanh.f32 %v1057_v52 }
0x134f   :  { %2612 = vtanh.f32 %v1061_v32 }
0x1358   :  { %v2611_v33 = vpop.eup %2610 }
0x1359   :  { %v2613_v35 = vpop.eup %2612  ;;  %1073 = vrot.lane.b32.xlu1 %v2611_v33, %s2817_s4  ;;  %v1064_v37 = vmul.f32 0.5, %v2611_v33 }
0x135a   :  { %1087 = vrot.lane.b32.xlu0 %v2613_v35, %s2817_s4  ;;  %v1066_v40 = vmul.f32 0.5, %v2613_v35 }
0x135b   :  { %v1065_v42 = vadd.f32 0.5, %v1064_v37 }
0x135c   :  { %v1067_v44 = vadd.f32 0.5, %v1066_v40 }
0x135d   :  { %v1071_v22 = vmul.f32 %v1069_v21, %v1065_v42  ;;  %v3255_v21 = vld [vmem:[#allocation8 + $0x14] ss:$8 sps:$4 sm:$0xff]  }
0x135e   :  { %v1085_v24 = vmul.f32 %v1083_v51, %v1067_v44  ;;  %v2534_v51 = vld [vmem:[%s3561_s6 + $0x10] ss:$8 sps:$4 sm:$0xff]  }
0x13cb   :  { %v1074_v43 = vpop.permute.xlu1 %1073 }
0x13cc   :  { %v1076_v47 = vmul.f32 %v1074_v43, %v1065_v42  ;;  %v1088_v49 = vpop.permute.xlu0 %1087 }
0x13cd   :  { %v1090_v50 = vmul.f32 %v1088_v49, %v1067_v44  ;;  %v2530_v49 = vld [vmem:[%s3561_s6 + $0x4] ss:$8 sps:$4 sm:$0xff]  }
0x13ce   :  { %1078 = vrot.lane.b32.xlu1 %v1076_v47, %s2817_s4  ;;  %v2528_v47 = vld [vmem:[%s3561_s6] ss:$8 sps:$4 sm:$0xff]   ;;  %1297 = vmatprep.subr.bf16.mxu1 %v2530_v49 }
0x13cf   :  { %1092 = vrot.lane.b32.xlu0 %v1090_v50, %s2817_s4  ;;  %v3253_v50 = vld [vmem:[#allocation8] ss:$8 sps:$4 sm:$0xff]   ;;  %1298 = vmatpush1.bf16.msra.mxu1 %v2528_v47 }
0x1440   :  { %v1079_v23 = vpop.permute.xlu1 %1078 }
0x1441   :  { %v1081_v25 = vadd.f32 %v1079_v23, %v1071_v22  ;;  %v1093_v26 = vpop.permute.xlu0 %1092  ;;  %v3265_v22 = vld [vmem:[#allocation8 + $0x10] ss:$8 sps:$4 sm:$0xff]   ;;  %v3287_v23 = vld [vmem:[#allocation8 + $0x20] ss:$8 sps:$4 sm:$0xff]  }
0x1442   :  { %v1095_v27 = vadd.f32 %v1093_v26, %v1085_v24  ;;  %v3296_v24 = vld [vmem:[#allocation8 + $0x30] ss:$8 sps:$4 sm:$0xff]  }
0x1443   :  { %2614 = vtanh.f32 %v1081_v25  ;;  %v1182_v52 = vrot.slane %v1081_v25, 6  ;;  %v2546_v25 = vld [vmem:[%s3561_s6 + $0x30] ss:$8 sps:$4 sm:$0xff]  }
0x1444   :  { %2616 = vtanh.f32 %v1095_v27  ;;  %v1196_v31 = vrot.slane %v1095_v27, 2 }
0x144d   :  { %v2615_v53 = vpop.eup %2614 }
0x144e   :  { %v2617_v54 = vpop.eup %2616  ;;  %1098 = vrot.lane.b32.xlu1 %v2615_v53, %s2817_s4 }
0x144f   :  { %1104 = vrot.lane.b32.xlu0 %v2617_v54, %s2817_s4 }
0x14c0   :  { %v1099_v55 = vpop.permute.xlu1 %1098 }
0x14c1   :  { %v1101_v57 = vmul.f32 %v1099_v55, %v1065_v42  ;;  %v1105_v58 = vpop.permute.xlu0 %1104 }
0x14c2   :  { %v3214_v59 = vmul.f32 %v1105_v58, %v1067_v44  ;;  %v3243_v44 = vld [vmem:[#allocation8 + $0x4] ss:$8 sps:$4 sm:$0xff]  }
0x14c3   :  { %1109 = vrot.lane.b32.xlu0 %v1101_v57, %s2819_s17  ;;  %1388 = vmatprep.subr.bf16.mxu0 %v3243_v44 }
0x14c4   :  { %v1113_v60 = vrot.slane %v3214_v59, 6 }
0x14c6   :  { %1114 = vrot.lane.b32.xlu1 %v1113_v60, %s2818_s16 }
0x1535   :  { %v3219_v61 = vpop.permute.xlu0 %1109 }
0x1538   :  { %v1115_v62 = vpop.permute.xlu1 %1114 }
0x1539   :  { %v1117_v2 = vsel %vm229_vm5, %v3219_v61, %v1115_v62 }
0x153a   :  { %v1123_v3 = vpack.c.bf16 %v1117_v2, %v1117_v2 }
0x153c   :  { %v1125_v4 = vrot.slane %v1123_v3, 2 }
0x153e   :  { %2410 = vmatmul.mubr.msk.bf16.vlgmr.msra.gmra.mrb[12].mxu0 %vm324_vm7, %v1125_v4 }
0x153f   :  { %1420 = vmatprep.mubr.bf16.mxu0 %v2814_v0  ;;  %1389 = vmatpush1.bf16.msra.mxu0 %v3253_v50 }
0x1540   :  { %1390 = vmatprep.subr.bf16.mxu0 %v3255_v21 }
0x1543   :  { %1391 = vmatpush1.bf16.msra.mxu0 %v3265_v22 }
0x1611   :  { %v1163_v5 = vpop.f32.mrb[12].mxu0 }
0x1612   :  { %v1171_v6 = vrot.slane %v1163_v5, 2  ;;  %v1165_v7 = vpop.f32.mrb[13].mxu0 }
0x1613   :  { %v1174_v9 = vadd.f32 %v1165_v7, %v3050_v46  ;;  %v1167_v10 = vpop.f32.mrb[14].mxu0 }
0x1614   :  { %v1173_v11 = vadd.f32 %v1171_v6, %v3052_v48  ;;  %v1168_v13 = vpop.f32.mrb[15].mxu0  ;;  %v1242_v10 = vld [vmem:[%s3563_s8] sm:$0x3] }
0x1615   :  { %2618 = vtanh.f32 %v1174_v9  ;;  %v1251_v13 = vrot.slane %v1242_v10, %v205_v39 }
0x1616   :  { %2620 = vtanh.f32 %v1173_v11  ;;  %v1247_v11 = vrot.slane %v1242_v10, %v201_v41 }
0x161f   :  { %v2619_v15 = vpop.eup %2618 }
0x1620   :  { %v2621_v17 = vpop.eup %2620  ;;  %1200 = vrot.lane.b32.xlu1 %v2619_v15, %s2817_s4  ;;  %v1179_v18 = vmul.f32 0.5, %v2619_v15 }
0x1621   :  { %1186 = vrot.lane.b32.xlu0 %v2621_v17, %s2817_s4  ;;  %v1177_v20 = vmul.f32 0.5, %v2621_v17 }
0x1622   :  { %v3229_v19 = vadd.f32 0.5, %v1179_v18 }
0x1623   :  { %v3231_v29 = vadd.f32 0.5, %v1177_v20 }
0x1624   :  { %v1198_v56 = vmul.f32 %v1196_v31, %v3229_v19 }
0x1625   :  { %v1184_v33 = vmul.f32 %v1182_v52, %v3231_v29 }
0x1692   :  { %v1201_v28 = vpop.permute.xlu1 %1200 }
0x1693   :  { %v1203_v46 = vmul.f32 %v1201_v28, %v3229_v19  ;;  %v1187_v30 = vpop.permute.xlu0 %1186 }
0x1694   :  { %v1189_v48 = vmul.f32 %v1187_v30, %v3231_v29 }
0x1695   :  { %1205 = vrot.lane.b32.xlu1 %v1203_v46, %s2817_s4 }
0x1696   :  { %1191 = vrot.lane.b32.xlu0 %v1189_v48, %s2817_s4 }
0x1707   :  { %v1206_v32 = vpop.permute.xlu1 %1205 }
0x1708   :  { %v1208_v35 = vadd.f32 %v1206_v32, %v1198_v56  ;;  %v1192_v37 = vpop.permute.xlu0 %1191 }
0x1709   :  { %v1194_v40 = vadd.f32 %v1192_v37, %v1184_v33 }
0x170a   :  { %2622 = vtanh.f32 %v1208_v35 }
0x170b   :  { %2624 = vtanh.f32 %v1194_v40 }
0x1714   :  { %v2623_v42 = vpop.eup %2622 }
0x1715   :  { %v2625_v43 = vpop.eup %2624  ;;  %1217 = vrot.lane.b32.xlu1 %v2623_v42, %s2817_s4 }
0x1716   :  { %1211 = vrot.lane.b32.xlu0 %v2625_v43, %s2817_s4 }
0x1719   :  { %542 = vrot.lane.b32.xlu1 %v3095_v8, %s2818_s16  ;;  %v2536_v8 = vld [vmem:[%s3561_s6 + $0x14] ss:$8 sps:$4 sm:$0xff]  }
0x171a   :  { %426 = vrot.lane.b32.xlu0 %v3069_v16, %s2818_s16  ;;  %1299 = vmatprep.subr.bf16.mxu1 %v2536_v8  ;;  %v3279_v16 = vld [vmem:[#allocation8 + $0x24] ss:$8 sps:$4 sm:$0xff]  }
0x171b   :  { %1300 = vmatpush1.bf16.msra.mxu1 %v2534_v51  ;;  %1392 = vmatprep.subr.bf16.mxu0 %v3279_v16 }
0x171c   :  { %1393 = vmatpush1.bf16.msra.mxu0 %v3287_v23 }
0x171d   :  { %775 = vrot.lane.b32.xlu1 %v3145_v45, %s2818_s16  ;;  %v2540_v45 = vld [vmem:[%s3561_s6 + $0x20] ss:$8 sps:$4 sm:$0xff]  }
0x171e   :  { %660 = vrot.lane.b32.xlu0 %v3120_v63, %s2818_s16  ;;  %v2542_v63 = vld [vmem:[%s3561_s6 + $0x24] ss:$8 sps:$4 sm:$0xff]  }
0x171f   :  { %1301 = vmatprep.subr.bf16.mxu1 %v2542_v63 }
0x1720   :  { %1302 = vmatpush1.bf16.msra.mxu1 %v2540_v45 }
0x1721   :  { %1003 = vrot.lane.b32.xlu1 %v3195_v12, %s2818_s16  ;;  %v3290_v12 = vld [vmem:[#allocation8 + $0x34] ss:$8 sps:$4 sm:$0xff]  }
0x1722   :  { %889 = vrot.lane.b32.xlu0 %v3170_v34, %s2818_s16  ;;  %v2548_v34 = vld [vmem:[%s3561_s6 + $0x34] ss:$8 sps:$4 sm:$0xff]   ;;  %1394 = vmatprep.subr.bf16.mxu0 %v3290_v12 }
0x1723   :  { %1303 = vmatprep.subr.bf16.mxu1 %v2548_v34  ;;  %1395 = vmatpush1.bf16.msra.mxu0 %v3296_v24 }
0x1724   :  { %1304 = vmatpush1.bf16.msra.mxu1 %v2546_v25  ;;  %1599 = vmatprep.subr.bf16.mxu0 %v3243_v44 }
0x1725   :  { %1488 = vmatprep.subr.bf16.mxu1 %v3243_v44 }
0x1726   :  { %1119 = vrot.lane.b32.xlu0 %v3214_v59, %s2818_s16  ;;  %1421 = vmatmul.mubr.bf16.vlgmr.msra.gmra.mrb[16].mxu0 %v2814_v0 }
0x1727   :  { %1600 = vmatpush1.bf16.msra.mxu0 %v3253_v50  ;;  %1631 = vmatprep.mubr.bf16.mxu0 %v2814_v0 }
0x1728   :  { %1601 = vmatprep.subr.bf16.mxu0 %v3255_v21 }
0x172b   :  { %1602 = vmatpush1.bf16.msra.mxu0 %v3265_v22 }
0x172c   :  { %1603 = vmatprep.subr.bf16.mxu0 %v3279_v16 }
0x172f   :  { %1604 = vmatpush1.bf16.msra.mxu0 %v3287_v23 }
0x1730   :  { %1605 = vmatprep.subr.bf16.mxu0 %v3290_v12 }
0x1733   :  { %1606 = vmatpush1.bf16.msra.mxu0 %v3296_v24 }
0x1734   :  { %1818 = vmatprep.subr.bf16.mxu0 %v3243_v44 }
0x1787   :  { %v1218_v26 = vpop.permute.xlu1 %1217 }
0x1788   :  { %v1220_v27 = vmul.f32 %v1218_v26, %v3229_v19  ;;  %v1212_v53 = vpop.permute.xlu0 %1211 }
0x1789   :  { %v1214_v54 = vmul.f32 %v1212_v53, %v3231_v29 }
0x178a   :  { %1227 = vrot.lane.b32.xlu0 %v1220_v27, %s2818_s16 }
0x178b   :  { %1222 = vrot.lane.b32.xlu1 %v1214_v54, %s2819_s17  ;;  %v543_v55 = vpop.permute.xlu1 %542 }
0x178c   :  { %546 = vst.msk [vmem:[#allocation2 + $0x8] sm:$0x30] %vm545_vm11, %v543_v55  ;;  %v427_v57 = vpop.permute.xlu0 %426 }
0x178d   :  { %1118 = vst.msk [vmem:[#allocation2 + $0x8] sm:$0x30] %vm658_vm9, %v3219_v61 }
0x178e   :  { %430 = vst.msk [vmem:[#allocation2 + $0x8] sm:$0xc0] %vm429_vm12, %v427_v57 }
0x178f   :  { %v776_v58 = vpop.permute.xlu1 %775 }
0x1790   :  { %779 = vst.msk [vmem:[#allocation2 + $0x8] sm:$0x3] %vm778_vm13, %v776_v58  ;;  %v661_v59 = vpop.permute.xlu0 %660 }
0x1791   :  { %888 = vst.msk [vmem:[#allocation2 + $0x8] sm:$0x3] %vm424_vm6, %v3174_v36 }
0x1792   :  { %664 = vst.msk [vmem:[#allocation2 + $0x8] sm:$0xc] %vm663_vm14, %v661_v59 }
0x1793   :  { %1002 = vst.msk [vmem:[#allocation2 + $0x8] sm:$0xc] %vm540_vm8, %v3200_v14  ;;  %v1004_v60 = vpop.permute.xlu1 %1003 }
0x1794   :  { %1006 = vst.msk [vmem:[#allocation2] sm:$0x30] %vm545_vm11, %v1004_v60  ;;  %v890_v61 = vpop.permute.xlu0 %889 }
0x1795   :  { %892 = vst.msk [vmem:[#allocation2] sm:$0xc0] %vm429_vm12, %v890_v61 }
0x1798   :  { %v1120_v62 = vpop.permute.xlu0 %1119 }
0x1799   :  { %1122 = vst.msk [vmem:[#allocation2] sm:$0xc] %vm663_vm14, %v1120_v62 }
0x17f9   :  { %v1422_v5 = vpop.f32.mrb[16].mxu0 }
0x17fa   :  { %v1424_v6 = vpop.f32.mrb[17].mxu0 }
0x17fb   :  { %v1426_v7 = vpop.f32.mrb[18].mxu0  ;;  %v1431_v20 = vrot.slane %v1424_v6, 2 }
0x17fc   :  { %v1228_v36 = vpop.permute.xlu0 %1227  ;;  %v1427_v9 = vpop.f32.mrb[19].mxu0 }
0x17fd   :  { %1230 = vst.msk [vmem:[#allocation2] sm:$0x3] %vm778_vm13, %v1228_v36  ;;  %v1223_v2 = vpop.permute.xlu1 %1222 }
0x17fe   :  { %1225 = vst.msk [vmem:[#allocation2 + $0x8] sm:$0xc0] %vm773_vm10, %v1223_v2 }
0x1804   :  { %v1231_v14 = vld [vmem:[#allocation2] sm:$0xff] }
0x1805   :  { %v1232_v3 = vld [vmem:[#allocation2 + $0x8] sm:$0xff] }
0x1806   :  { %v1233_v4 = vpack.c.bf16 %v1232_v3, %v1231_v14 }
0x1808   :  { %2419 = vmatmul.mubr.msk.bf16.vlgmr.msra.gmra.mrb[24].mxu1 %vm324_vm7, %v1233_v4 }
0x1809   :  { %1489 = vmatpush1.bf16.msra.mxu1 %v3253_v50  ;;  %1520 = vmatprep.mubr.bf16.mxu1 %v2814_v0 }
0x180a   :  { %1490 = vmatprep.subr.bf16.mxu1 %v3255_v21 }
0x180d   :  { %1491 = vmatpush1.bf16.msra.mxu1 %v3265_v22 }
0x180e   :  { %1492 = vmatprep.subr.bf16.mxu1 %v3279_v16 }
0x1811   :  { %1493 = vmatpush1.bf16.msra.mxu1 %v3287_v23 }
0x1812   :  { %1494 = vmatprep.subr.bf16.mxu1 %v3290_v12 }
0x1815   :  { %1495 = vmatpush1.bf16.msra.mxu1 %v3296_v24 }
0x1816   :  { %1710 = vmatprep.subr.bf16.mxu1 %v3243_v44 }
0x18db   :  { %v1331_v15 = vpop.f32.mrb[24].mxu1 }
0x18dc   :  { %v3351_v17 = vadd.f32 %v1331_v15, %v1247_v11  ;;  %v1333_v18 = vpop.f32.mrb[25].mxu1 }
0x18dd   :  { %v3353_v19 = vadd.f32 %v1333_v18, %v1251_v13  ;;  %v1335_v28 = vpop.f32.mrb[26].mxu1 }
0x18de   :  { %v1429_v29 = vadd.f32 %v1422_v5, %v3351_v17  ;;  %v3356_v46 = vadd.f32 %v1335_v28, %v1247_v11  ;;  %v1337_v30 = vpop.f32.mrb[27].mxu1 }
0x18df   :  { %v3358_v48 = vadd.f32 %v1337_v30, %v1251_v13 }
0x18e0   :  { %2626 = vtanh.f32 %v1429_v29 }
0x18e1   :  { %v1433_v41 = vadd.f32 %v1431_v20, %v3358_v48 }
0x18e3   :  { %2628 = vtanh.f32 %v1433_v41 }
0x18ea   :  { %v2627_v38 = vpop.eup %2626 }
0x18eb   :  { %1442 = vrot.lane.b32.xlu0 %v2627_v38, %s2817_s4  ;;  %v1436_v31 = vmul.f32 0.5, %v2627_v38 }
0x18ed   :  { %v2629_v39 = vpop.eup %2628  ;;  %v1437_v56 = vadd.f32 0.5, %v1436_v31 }
0x18ee   :  { %1453 = vrot.lane.b32.xlu1 %v2629_v39, %s2817_s4  ;;  %v1438_v52 = vmul.f32 0.5, %v2629_v39 }
0x18ef   :  { %v1440_v42 = vmul.f32 0.0, %v1437_v56 }
0x18f0   :  { %v1439_v35 = vadd.f32 0.5, %v1438_v52 }
0x18f2   :  { %v1451_v49 = vmul.f32 0.0, %v1439_v35 }
0x195d   :  { %v1443_v32 = vpop.permute.xlu0 %1442 }
0x195e   :  { %v1445_v33 = vmul.f32 %v1443_v32, %v1437_v56 }
0x1960   :  { %1447 = vrot.lane.b32.xlu0 %v1445_v33, %s2817_s4  ;;  %v1454_v37 = vpop.permute.xlu1 %1453 }
0x1961   :  { %v1456_v40 = vmul.f32 %v1454_v37, %v1439_v35 }
0x1963   :  { %1458 = vrot.lane.b32.xlu1 %v1456_v40, %s2817_s4 }
0x19d2   :  { %v1448_v43 = vpop.permute.xlu0 %1447 }
0x19d3   :  { %v1450_v47 = vadd.f32 %v1448_v43, %v1440_v42 }
0x19d5   :  { %2630 = vtanh.f32 %v1450_v47  ;;  %v1459_v8 = vpop.permute.xlu1 %1458  ;;  %v1544_v20 = vrot.slane %v1450_v47, 6 }
0x19d6   :  { %v1461_v51 = vadd.f32 %v1459_v8, %v1451_v49 }
0x19d8   :  { %2632 = vtanh.f32 %v1461_v51  ;;  %v1558_v28 = vrot.slane %v1461_v51, 2 }
0x19df   :  { %v2631_v45 = vpop.eup %2630 }
0x19e0   :  { %1464 = vrot.lane.b32.xlu0 %v2631_v45, %s2817_s4 }
0x19e2   :  { %v2633_v63 = vpop.eup %2632 }
0x19e3   :  { %1470 = vrot.lane.b32.xlu1 %v2633_v63, %s2817_s4 }
0x1a52   :  { %v1465_v34 = vpop.permute.xlu0 %1464 }
0x1a53   :  { %v1467_v25 = vmul.f32 %v1465_v34, %v1437_v56 }
0x1a55   :  { %1475 = vrot.lane.b32.xlu1 %v1467_v25, %s2819_s17  ;;  %v1471_v26 = vpop.permute.xlu1 %1470 }
0x1a56   :  { %v3368_v27 = vmul.f32 %v1471_v26, %v1439_v35 }
0x1a58   :  { %v1479_v53 = vrot.slane %v3368_v27, 6  ;;  %v2556_v27 = vld [vmem:[%s3564_s9 + $0x30] sm:$0xff]  }
0x1a5a   :  { %1480 = vrot.lane.b32.xlu0 %v1479_v53, %s2818_s16 }
0x1ac7   :  { %v3374_v54 = vpop.permute.xlu1 %1475 }
0x1acc   :  { %v1481_v55 = vpop.permute.xlu0 %1480 }
0x1acd   :  { %v1483_v57 = vsel %vm229_vm5, %v3374_v54, %v1481_v55 }
0x1ace   :  { %v1484_v58 = vpack.c.bf16 %v1483_v57, %v1483_v57 }
0x1ad0   :  { %2428 = vmatmul.mubr.msk.bf16.vlgmr.msra.gmra.mrb[28].mxu1 %vm324_vm7, %v1484_v58 }
0x1ad1   :  { %1711 = vmatpush1.bf16.msra.mxu1 %v3253_v50  ;;  %1742 = vmatprep.mubr.bf16.mxu1 %v2814_v0 }
0x1ad2   :  { %1712 = vmatprep.subr.bf16.mxu1 %v3255_v21 }
0x1ad5   :  { %1713 = vmatpush1.bf16.msra.mxu1 %v3265_v22 }
0x1ad6   :  { %1714 = vmatprep.subr.bf16.mxu1 %v3279_v16 }
0x1ad9   :  { %1715 = vmatpush1.bf16.msra.mxu1 %v3287_v23 }
0x1ada   :  { %1716 = vmatprep.subr.bf16.mxu1 %v3290_v12 }
0x1add   :  { %1717 = vmatpush1.bf16.msra.mxu1 %v3296_v24 }
0x1ade   :  { %1924 = vmatprep.subr.bf16.mxu1 %v3243_v44 }
0x1ba3   :  { %v1522_v59 = vpop.f32.mrb[28].mxu1 }
0x1ba4   :  { %v1530_v60 = vrot.slane %v1522_v59, 6  ;;  %v1524_v61 = vpop.f32.mrb[29].mxu1 }
0x1ba5   :  { %v1534_v62 = vrot.slane %v1524_v61, 4  ;;  %v1526_v36 = vpop.f32.mrb[30].mxu1 }
0x1ba6   :  { %v1532_v2 = vadd.f32 %v1530_v60, %v3351_v17  ;;  %v1527_v14 = vpop.f32.mrb[31].mxu1 }
0x1ba7   :  { %v1536_v3 = vadd.f32 %v1534_v62, %v3358_v48 }
0x1ba8   :  { %2634 = vtanh.f32 %v1532_v2 }
0x1ba9   :  { %2636 = vtanh.f32 %v1536_v3 }
0x1bb2   :  { %v2635_v4 = vpop.eup %2634 }
0x1bb3   :  { %v2637_v5 = vpop.eup %2636  ;;  %1548 = vrot.lane.b32.xlu0 %v2635_v4, %s2817_s4  ;;  %v1539_v6 = vmul.f32 0.5, %v2635_v4 }
0x1bb4   :  { %1562 = vrot.lane.b32.xlu1 %v2637_v5, %s2817_s4  ;;  %v1541_v7 = vmul.f32 0.5, %v2637_v5 }
0x1bb5   :  { %v1540_v9 = vadd.f32 0.5, %v1539_v6 }
0x1bb6   :  { %v1542_v11 = vadd.f32 0.5, %v1541_v7 }
0x1bb7   :  { %v1546_v29 = vmul.f32 %v1544_v20, %v1540_v9 }
0x1bb8   :  { %v1560_v41 = vmul.f32 %v1558_v28, %v1542_v11 }
0x1c25   :  { %v1549_v10 = vpop.permute.xlu0 %1548 }
0x1c26   :  { %v1551_v13 = vmul.f32 %v1549_v10, %v1540_v9  ;;  %v1563_v15 = vpop.permute.xlu1 %1562 }
0x1c27   :  { %v1565_v18 = vmul.f32 %v1563_v15, %v1542_v11 }
0x1c28   :  { %1553 = vrot.lane.b32.xlu0 %v1551_v13, %s2817_s4 }
0x1c29   :  { %1567 = vrot.lane.b32.xlu1 %v1565_v18, %s2817_s4 }
0x1c9a   :  { %v1554_v30 = vpop.permute.xlu0 %1553 }
0x1c9b   :  { %v1556_v38 = vadd.f32 %v1554_v30, %v1546_v29  ;;  %v1568_v39 = vpop.permute.xlu1 %1567 }
0x1c9c   :  { %v1570_v31 = vadd.f32 %v1568_v39, %v1560_v41 }
0x1c9d   :  { %2638 = vtanh.f32 %v1556_v38  ;;  %v1655_v5 = vrot.slane %v1556_v38, 6 }
0x1c9e   :  { %2640 = vtanh.f32 %v1570_v31  ;;  %v1669_v6 = vrot.slane %v1570_v31, 2 }
0x1ca7   :  { %v2639_v52 = vpop.eup %2638 }
0x1ca8   :  { %v2641_v56 = vpop.eup %2640  ;;  %1573 = vrot.lane.b32.xlu0 %v2639_v52, %s2817_s4 }
0x1ca9   :  { %1579 = vrot.lane.b32.xlu1 %v2641_v56, %s2817_s4 }
0x1d1a   :  { %v1574_v32 = vpop.permute.xlu0 %1573 }
0x1d1b   :  { %v1576_v33 = vmul.f32 %v1574_v32, %v1540_v9  ;;  %v1580_v35 = vpop.permute.xlu1 %1579 }
0x1d1c   :  { %v1582_v37 = vmul.f32 %v1580_v35, %v1542_v11 }
0x1d1d   :  { %1584 = vrot.lane.b32.xlu1 %v1576_v33, %s2819_s17 }
0x1d1e   :  { %v1588_v40 = vrot.slane %v1582_v37, 2 }
0x1d20   :  { %1589 = vrot.lane.b32.xlu0 %v1588_v40, %s2818_s16 }
0x1d8f   :  { %v1585_v42 = vpop.permute.xlu1 %1584 }
0x1d92   :  { %v1590_v43 = vpop.permute.xlu0 %1589 }
0x1d93   :  { %v1592_v47 = vsel %vm229_vm5, %v1585_v42, %v1590_v43 }
0x1d94   :  { %v1593_v49 = vpack.c.bf16 %v1592_v47, %v1592_v47 }
0x1d96   :  { %v1595_v8 = vrot.slane %v1593_v49, 1 }
0x1d98   :  { %2429 = vmatmul.mubr.msk.bf16.vlgmr.msra.gmra.mrb[20].mxu0 %vm324_vm7, %v1595_v8 }
0x1d99   :  { %1819 = vmatpush1.bf16.msra.mxu0 %v3253_v50  ;;  %1850 = vmatprep.mubr.bf16.mxu0 %v2814_v0 }
0x1d9a   :  { %1820 = vmatprep.subr.bf16.mxu0 %v3255_v21 }
0x1d9d   :  { %1821 = vmatpush1.bf16.msra.mxu0 %v3265_v22 }
0x1d9e   :  { %1822 = vmatprep.subr.bf16.mxu0 %v3279_v16 }
0x1da1   :  { %1823 = vmatpush1.bf16.msra.mxu0 %v3287_v23 }
0x1da2   :  { %1824 = vmatprep.subr.bf16.mxu0 %v3290_v12 }
0x1da5   :  { %1825 = vmatpush1.bf16.msra.mxu0 %v3296_v24 }
0x1da6   :  { %2035 = vmatprep.subr.bf16.mxu0 %v3243_v44 }
0x1e6b   :  { %v1633_v51 = vpop.f32.mrb[20].mxu0 }
0x1e6c   :  { %v1641_v45 = vrot.slane %v1633_v51, 4  ;;  %v1635_v63 = vpop.f32.mrb[21].mxu0 }
0x1e6d   :  { %v1645_v34 = vrot.slane %v1635_v63, 6  ;;  %v1637_v25 = vpop.f32.mrb[22].mxu0 }
0x1e6e   :  { %v1643_v26 = vadd.f32 %v1641_v45, %v3351_v17  ;;  %v1638_v55 = vpop.f32.mrb[23].mxu0 }
0x1e6f   :  { %v1647_v57 = vadd.f32 %v1645_v34, %v3358_v48 }
0x1e70   :  { %2642 = vtanh.f32 %v1643_v26 }
0x1e71   :  { %2644 = vtanh.f32 %v1647_v57 }
0x1e7a   :  { %v2643_v58 = vpop.eup %2642 }
0x1e7b   :  { %v2645_v59 = vpop.eup %2644  ;;  %1659 = vrot.lane.b32.xlu0 %v2643_v58, %s2817_s4  ;;  %v1650_v60 = vmul.f32 0.5, %v2643_v58 }
0x1e7c   :  { %1673 = vrot.lane.b32.xlu1 %v2645_v59, %s2817_s4  ;;  %v1652_v61 = vmul.f32 0.5, %v2645_v59 }
0x1e7d   :  { %v1651_v62 = vadd.f32 0.5, %v1650_v60 }
0x1e7e   :  { %v1653_v2 = vadd.f32 0.5, %v1652_v61 }
0x1e7f   :  { %v1657_v7 = vmul.f32 %v1655_v5, %v1651_v62 }
0x1e80   :  { %v1671_v10 = vmul.f32 %v1669_v6, %v1653_v2 }
0x1eed   :  { %v1660_v36 = vpop.permute.xlu0 %1659 }
0x1eee   :  { %v1662_v14 = vmul.f32 %v1660_v36, %v1651_v62  ;;  %v1674_v3 = vpop.permute.xlu1 %1673 }
0x1eef   :  { %v1676_v4 = vmul.f32 %v1674_v3, %v1653_v2 }
0x1ef0   :  { %1664 = vrot.lane.b32.xlu0 %v1662_v14, %s2817_s4 }
0x1ef1   :  { %1678 = vrot.lane.b32.xlu1 %v1676_v4, %s2817_s4 }
0x1f62   :  { %v1665_v9 = vpop.permute.xlu0 %1664 }
0x1f63   :  { %v1667_v11 = vadd.f32 %v1665_v9, %v1657_v7  ;;  %v1679_v13 = vpop.permute.xlu1 %1678 }
0x1f64   :  { %v1681_v15 = vadd.f32 %v1679_v13, %v1671_v10 }
0x1f65   :  { %2646 = vtanh.f32 %v1667_v11  ;;  %v1763_v55 = vrot.slane %v1667_v11, 6 }
0x1f66   :  { %2648 = vtanh.f32 %v1681_v15 }
0x1f6f   :  { %v2647_v18 = vpop.eup %2646 }
0x1f70   :  { %v2649_v20 = vpop.eup %2648  ;;  %1684 = vrot.lane.b32.xlu0 %v2647_v18, %s2817_s4 }
0x1f71   :  { %1690 = vrot.lane.b32.xlu1 %v2649_v20, %s2817_s4 }
0x1fe2   :  { %v1685_v28 = vpop.permute.xlu0 %1684 }
0x1fe3   :  { %v1687_v29 = vmul.f32 %v1685_v28, %v1651_v62  ;;  %v1691_v30 = vpop.permute.xlu1 %1690 }
0x1fe4   :  { %v1693_v41 = vmul.f32 %v1691_v30, %v1653_v2 }
0x1fe5   :  { %1695 = vrot.lane.b32.xlu1 %v1687_v29, %s2819_s17 }
0x1fe6   :  { %v1699_v38 = vrot.slane %v1693_v41, 6 }
0x1fe8   :  { %1700 = vrot.lane.b32.xlu0 %v1699_v38, %s2818_s16 }
0x2057   :  { %v1696_v39 = vpop.permute.xlu1 %1695 }
0x205a   :  { %v1701_v31 = vpop.permute.xlu0 %1700 }
0x205b   :  { %v1703_v52 = vsel %vm229_vm5, %v1696_v39, %v1701_v31 }
0x205c   :  { %v1704_v56 = vpack.c.bf16 %v1703_v52, %v1703_v52 }
0x205e   :  { %v1706_v32 = vrot.slane %v1704_v56, 2 }
0x2060   :  { %2430 = vmatmul.mubr.msk.bf16.vlgmr.msra.gmra.mrb[32].mxu1 %vm324_vm7, %v1706_v32 }
0x2061   :  { %1925 = vmatpush1.bf16.msra.mxu1 %v3253_v50  ;;  %1956 = vmatprep.mubr.bf16.mxu1 %v2814_v0 }
0x2062   :  { %1926 = vmatprep.subr.bf16.mxu1 %v3255_v21 }
0x2065   :  { %1927 = vmatpush1.bf16.msra.mxu1 %v3265_v22 }
0x2066   :  { %1928 = vmatprep.subr.bf16.mxu1 %v3279_v16 }
0x2069   :  { %1929 = vmatpush1.bf16.msra.mxu1 %v3287_v23 }
0x206a   :  { %1930 = vmatprep.subr.bf16.mxu1 %v3290_v12 }
0x206d   :  { %1931 = vmatpush1.bf16.msra.mxu1 %v3296_v24 }
0x206e   :  { %2146 = vmatprep.subr.bf16.mxu1 %v3243_v44 }
0x2133   :  { %v1744_v33 = vpop.f32.mrb[32].mxu1 }
0x2134   :  { %v1752_v35 = vrot.slane %v1744_v33, 2  ;;  %v1746_v37 = vpop.f32.mrb[33].mxu1 }
0x2135   :  { %v1755_v40 = vadd.f32 %v1746_v37, %v3358_v48  ;;  %v1748_v42 = vpop.f32.mrb[34].mxu1 }
0x2136   :  { %v1754_v43 = vadd.f32 %v1752_v35, %v3351_v17  ;;  %v1749_v47 = vpop.f32.mrb[35].mxu1  ;;  %v1777_v17 = vrot.slane %v1681_v15, 2 }
0x2137   :  { %2650 = vtanh.f32 %v1755_v40 }
0x2138   :  { %2652 = vtanh.f32 %v1754_v43 }
0x2141   :  { %v2651_v49 = vpop.eup %2650 }
0x2142   :  { %v2653_v8 = vpop.eup %2652  ;;  %1781 = vrot.lane.b32.xlu1 %v2651_v49, %s2817_s4  ;;  %v1760_v51 = vmul.f32 0.5, %v2651_v49 }
0x2143   :  { %1767 = vrot.lane.b32.xlu0 %v2653_v8, %s2817_s4  ;;  %v1758_v45 = vmul.f32 0.5, %v2653_v8 }
0x2144   :  { %v1761_v44 = vadd.f32 0.5, %v1760_v51 }
0x2145   :  { %v1759_v34 = vadd.f32 0.5, %v1758_v45 }
0x2146   :  { %v1779_v57 = vmul.f32 %v1777_v17, %v1761_v44 }
0x2147   :  { %v1765_v59 = vmul.f32 %v1763_v55, %v1759_v34 }
0x21b4   :  { %v1782_v63 = vpop.permute.xlu1 %1781 }
0x21b5   :  { %v1784_v25 = vmul.f32 %v1782_v63, %v1761_v44  ;;  %v1768_v26 = vpop.permute.xlu0 %1767 }
0x21b6   :  { %v1770_v48 = vmul.f32 %v1768_v26, %v1759_v34 }
0x21b7   :  { %1786 = vrot.lane.b32.xlu1 %v1784_v25, %s2817_s4 }
0x21b8   :  { %1772 = vrot.lane.b32.xlu0 %v1770_v48, %s2817_s4 }
0x2229   :  { %v1787_v58 = vpop.permute.xlu1 %1786 }
0x222a   :  { %v1789_v60 = vadd.f32 %v1787_v58, %v1779_v57  ;;  %v1773_v61 = vpop.permute.xlu0 %1772 }
0x222b   :  { %v1775_v62 = vadd.f32 %v1773_v61, %v1765_v59 }
0x222c   :  { %2654 = vtanh.f32 %v1789_v60  ;;  %v1885_v47 = vrot.slane %v1789_v60, 2 }
0x222d   :  { %2656 = vtanh.f32 %v1775_v62  ;;  %v1871_v42 = vrot.slane %v1775_v62, 6 }
0x2236   :  { %v2655_v36 = vpop.eup %2654 }
0x2237   :  { %v2657_v2 = vpop.eup %2656  ;;  %1798 = vrot.lane.b32.xlu1 %v2655_v36, %s2817_s4 }
0x2238   :  { %1792 = vrot.lane.b32.xlu0 %v2657_v2, %s2817_s4 }
0x22a9   :  { %v1799_v14 = vpop.permute.xlu1 %1798 }
0x22aa   :  { %v1801_v3 = vmul.f32 %v1799_v14, %v1761_v44  ;;  %v1793_v4 = vpop.permute.xlu0 %1792 }
0x22ab   :  { %v1795_v5 = vmul.f32 %v1793_v4, %v1759_v34 }
0x22ac   :  { %v1807_v6 = vrot.slane %v1801_v3, 2 }
0x22ad   :  { %1803 = vrot.lane.b32.xlu1 %v1795_v5, %s2819_s17 }
0x22ae   :  { %1808 = vrot.lane.b32.xlu0 %v1807_v6, %s2818_s16 }
0x231f   :  { %v1804_v7 = vpop.permute.xlu1 %1803 }
0x2320   :  { %v1809_v9 = vpop.permute.xlu0 %1808 }
0x2321   :  { %v1811_v10 = vsel %vm229_vm5, %v1804_v7, %v1809_v9 }
0x2322   :  { %v1812_v11 = vpack.c.bf16 %v1811_v10, %v1811_v10 }
0x2324   :  { %v1814_v13 = vrot.slane %v1812_v11, 3 }
0x2326   :  { %2431 = vmatmul.mubr.msk.bf16.vlgmr.msra.gmra.mrb[24].mxu0 %vm324_vm7, %v1814_v13 }
0x2327   :  { %2036 = vmatpush1.bf16.msra.mxu0 %v3253_v50  ;;  %2067 = vmatprep.mubr.bf16.mxu0 %v2814_v0 }
0x2328   :  { %2037 = vmatprep.subr.bf16.mxu0 %v3255_v21 }
0x232b   :  { %2038 = vmatpush1.bf16.msra.mxu0 %v3265_v22 }
0x232c   :  { %2039 = vmatprep.subr.bf16.mxu0 %v3279_v16 }
0x232f   :  { %2040 = vmatpush1.bf16.msra.mxu0 %v3287_v23 }
0x2330   :  { %2041 = vmatprep.subr.bf16.mxu0 %v3290_v12 }
0x2333   :  { %2042 = vmatpush1.bf16.msra.mxu0 %v3296_v24 }
0x2334   :  { %2470 = vmatprep.subr.bf16.mxu0 %v2815_v1 }
0x23f9   :  { %v1852_v15 = vpop.f32.mrb[24].mxu0 }
0x23fa   :  { %v1859_v18 = vadd.f32 %v1852_v15, %v3356_v46  ;;  %v1854_v20 = vpop.f32.mrb[25].mxu0 }
0x23fb   :  { %v1861_v28 = vrot.slane %v1854_v20, 2  ;;  %v1856_v29 = vpop.f32.mrb[26].mxu0 }
0x23fc   :  { %2658 = vtanh.f32 %v1859_v18  ;;  %v1857_v30 = vpop.f32.mrb[27].mxu0 }
0x23fd   :  { %v1863_v41 = vadd.f32 %v1861_v28, %v3353_v19 }
0x23ff   :  { %2660 = vtanh.f32 %v1863_v41 }
0x2406   :  { %v2659_v38 = vpop.eup %2658 }
0x2407   :  { %1875 = vrot.lane.b32.xlu0 %v2659_v38, %s2817_s4  ;;  %v1866_v31 = vmul.f32 0.5, %v2659_v38 }
0x2409   :  { %v2661_v39 = vpop.eup %2660  ;;  %v1867_v56 = vadd.f32 0.5, %v1866_v31 }
0x240a   :  { %1889 = vrot.lane.b32.xlu1 %v2661_v39, %s2817_s4  ;;  %v1868_v52 = vmul.f32 0.5, %v2661_v39 }
0x240b   :  { %v1873_v43 = vmul.f32 %v1871_v42, %v1867_v56 }
0x240c   :  { %v1869_v35 = vadd.f32 0.5, %v1868_v52 }
0x240e   :  { %v1887_v51 = vmul.f32 %v1885_v47, %v1869_v35 }
0x2479   :  { %v1876_v32 = vpop.permute.xlu0 %1875 }
0x247a   :  { %v1878_v33 = vmul.f32 %v1876_v32, %v1867_v56 }
0x247c   :  { %1880 = vrot.lane.b32.xlu0 %v1878_v33, %s2817_s4  ;;  %v1890_v37 = vpop.permute.xlu1 %1889 }
0x247d   :  { %v1892_v40 = vmul.f32 %v1890_v37, %v1869_v35 }
0x247f   :  { %1894 = vrot.lane.b32.xlu1 %v1892_v40, %s2817_s4 }
0x24ee   :  { %v1881_v49 = vpop.permute.xlu0 %1880 }
0x24ef   :  { %v1883_v8 = vadd.f32 %v1881_v49, %v1873_v43 }
0x24f1   :  { %2662 = vtanh.f32 %v1883_v8  ;;  %v1895_v45 = vpop.permute.xlu1 %1894  ;;  %v1980_v9 = vrot.slane %v1883_v8, 6 }
0x24f2   :  { %v1897_v44 = vadd.f32 %v1895_v45, %v1887_v51 }
0x24f4   :  { %2664 = vtanh.f32 %v1897_v44  ;;  %v1994_v10 = vrot.slane %v1897_v44, 2 }
0x24fb   :  { %v2663_v63 = vpop.eup %2662 }
0x24fc   :  { %1900 = vrot.lane.b32.xlu0 %v2663_v63, %s2817_s4 }
0x24fe   :  { %v2665_v34 = vpop.eup %2664 }
0x24ff   :  { %1906 = vrot.lane.b32.xlu1 %v2665_v34, %s2817_s4 }
0x256e   :  { %v1901_v25 = vpop.permute.xlu0 %1900 }
0x256f   :  { %v1903_v26 = vmul.f32 %v1901_v25, %v1867_v56 }
0x2571   :  { %1911 = vrot.lane.b32.xlu1 %v1903_v26, %s2819_s17  ;;  %v1907_v48 = vpop.permute.xlu1 %1906 }
0x2572   :  { %v1909_v17 = vmul.f32 %v1907_v48, %v1869_v35 }
0x2574   :  { %v1915_v55 = vrot.slane %v1909_v17, 6 }
0x2576   :  { %1916 = vrot.lane.b32.xlu0 %v1915_v55, %s2818_s16 }
0x25e3   :  { %v1912_v57 = vpop.permute.xlu1 %1911 }
0x25e8   :  { %v1917_v58 = vpop.permute.xlu0 %1916 }
0x25e9   :  { %v1919_v59 = vsel %vm229_vm5, %v1912_v57, %v1917_v58 }
0x25ea   :  { %v1920_v60 = vpack.c.bf16 %v1919_v59, %v1919_v59 }
0x25ec   :  { %2432 = vmatmul.mubr.msk.bf16.vlgmr.msra.gmra.mrb[36].mxu1 %vm324_vm7, %v1920_v60 }
0x25ed   :  { %2147 = vmatpush1.bf16.msra.mxu1 %v3253_v50  ;;  %2178 = vmatprep.mubr.bf16.mxu1 %v2814_v0 }
0x25ee   :  { %2148 = vmatprep.subr.bf16.mxu1 %v3255_v21 }
0x25f1   :  { %2149 = vmatpush1.bf16.msra.mxu1 %v3265_v22 }
0x25f2   :  { %2150 = vmatprep.subr.bf16.mxu1 %v3279_v16 }
0x25f5   :  { %2151 = vmatpush1.bf16.msra.mxu1 %v3287_v23 }
0x25f6   :  { %2152 = vmatprep.subr.bf16.mxu1 %v3290_v12 }
0x25f9   :  { %2153 = vmatpush1.bf16.msra.mxu1 %v3296_v24 }
0x26bf   :  { %v1958_v61 = vpop.f32.mrb[36].mxu1 }
0x26c0   :  { %v1966_v62 = vrot.slane %v1958_v61, 6  ;;  %v1960_v36 = vpop.f32.mrb[37].mxu1 }
0x26c1   :  { %v1970_v2 = vrot.slane %v1960_v36, 4  ;;  %v1962_v14 = vpop.f32.mrb[38].mxu1 }
0x26c2   :  { %v1968_v50 = vadd.f32 %v1966_v62, %v3356_v46  ;;  %v1963_v0 = vpop.f32.mrb[39].mxu1 }
0x26c3   :  { %v1972_v21 = vadd.f32 %v1970_v2, %v3353_v19 }
0x26c4   :  { %2666 = vtanh.f32 %v1968_v50 }
0x26c5   :  { %2668 = vtanh.f32 %v1972_v21 }
0x26ce   :  { %v2667_v22 = vpop.eup %2666 }
0x26cf   :  { %v2669_v16 = vpop.eup %2668  ;;  %1984 = vrot.lane.b32.xlu0 %v2667_v22, %s2817_s4  ;;  %v1975_v23 = vmul.f32 0.5, %v2667_v22 }
0x26d0   :  { %1998 = vrot.lane.b32.xlu1 %v2669_v16, %s2817_s4  ;;  %v1977_v12 = vmul.f32 0.5, %v2669_v16 }
0x26d1   :  { %v1976_v24 = vadd.f32 0.5, %v1975_v23 }
0x26d2   :  { %v1978_v4 = vadd.f32 0.5, %v1977_v12 }
0x26d3   :  { %v1982_v11 = vmul.f32 %v1980_v9, %v1976_v24 }
0x26d4   :  { %v1996_v15 = vmul.f32 %v1994_v10, %v1978_v4 }
0x2741   :  { %v1985_v3 = vpop.permute.xlu0 %1984 }
0x2742   :  { %v1987_v5 = vmul.f32 %v1985_v3, %v1976_v24  ;;  %v1999_v6 = vpop.permute.xlu1 %1998 }
0x2743   :  { %v2001_v7 = vmul.f32 %v1999_v6, %v1978_v4 }
0x2744   :  { %1989 = vrot.lane.b32.xlu0 %v1987_v5, %s2817_s4 }
0x2745   :  { %2003 = vrot.lane.b32.xlu1 %v2001_v7, %s2817_s4 }
0x27b6   :  { %v1990_v13 = vpop.permute.xlu0 %1989 }
0x27b7   :  { %v1992_v18 = vadd.f32 %v1990_v13, %v1982_v11  ;;  %v2004_v20 = vpop.permute.xlu1 %2003 }
0x27b8   :  { %v2006_v28 = vadd.f32 %v2004_v20, %v1996_v15 }
0x27b9   :  { %2670 = vtanh.f32 %v1992_v18  ;;  %v2091_v59 = vrot.slane %v1992_v18, 6 }
0x27ba   :  { %2672 = vtanh.f32 %v2006_v28  ;;  %v2105_v60 = vrot.slane %v2006_v28, 2 }
0x27c3   :  { %v2671_v29 = vpop.eup %2670 }
0x27c4   :  { %v2673_v30 = vpop.eup %2672  ;;  %2009 = vrot.lane.b32.xlu0 %v2671_v29, %s2817_s4 }
0x27c5   :  { %2015 = vrot.lane.b32.xlu1 %v2673_v30, %s2817_s4 }
0x2836   :  { %v2010_v41 = vpop.permute.xlu0 %2009 }
0x2837   :  { %v2012_v38 = vmul.f32 %v2010_v41, %v1976_v24  ;;  %v2016_v39 = vpop.permute.xlu1 %2015 }
0x2838   :  { %v2018_v31 = vmul.f32 %v2016_v39, %v1978_v4 }
0x2839   :  { %2020 = vrot.lane.b32.xlu1 %v2012_v38, %s2819_s17 }
0x283a   :  { %v2024_v52 = vrot.slane %v2018_v31, 2 }
0x283c   :  { %2025 = vrot.lane.b32.xlu0 %v2024_v52, %s2818_s16 }
0x28ab   :  { %v2021_v56 = vpop.permute.xlu1 %2020 }
0x28ae   :  { %v2026_v32 = vpop.permute.xlu0 %2025 }
0x28af   :  { %v2028_v33 = vsel %vm229_vm5, %v2021_v56, %v2026_v32 }
0x28b0   :  { %v2029_v35 = vpack.c.bf16 %v2028_v33, %v2028_v33 }
0x28b2   :  { %v2031_v37 = vrot.slane %v2029_v35, 1 }
0x28b4   :  { %2433 = vmatmul.mubr.msk.bf16.vlgmr.msra.gmra.mrb[28].mxu0 %vm324_vm7, %v2031_v37 }
0x28b5   :  { %2486 = vmatprep.mubr.msk.bf16.mxu0 %vm2816_vm0, %v2815_v1  ;;  %vm2364_vm0 = vcmask 9216  }
0x2987   :  { %v2069_v40 = vpop.f32.mrb[28].mxu0 }
0x2988   :  { %v2077_v42 = vrot.slane %v2069_v40, 4  ;;  %v2071_v43 = vpop.f32.mrb[29].mxu0 }
0x2989   :  { %v2081_v47 = vrot.slane %v2071_v43, 6  ;;  %v2073_v49 = vpop.f32.mrb[30].mxu0 }
0x298a   :  { %v2079_v8 = vadd.f32 %v2077_v42, %v3356_v46  ;;  %v2074_v51 = vpop.f32.mrb[31].mxu0  ;;  %v2551_v49 = vld [vmem:[%s3564_s9 + $0x8] sm:$0xff]  }
0x298b   :  { %v2083_v45 = vadd.f32 %v2081_v47, %v3353_v19  ;;  %v2550_v47 = vld [vmem:[%s3564_s9] sm:$0xff]  }
0x298c   :  { %2674 = vtanh.f32 %v2079_v8  ;;  %2471 = vmatpush3.bf16.msra.mxu0 %v2550_v47  ;;  %v2552_v8 = vld [vmem:[%s3564_s9 + $0x10] sm:$0xff]  }
0x298d   :  { %2676 = vtanh.f32 %v2083_v45  ;;  %2472 = vmatprep.subr.bf16.mxu0 %v2815_v1 }
0x2990   :  { %2473 = vmatpush3.bf16.msra.mxu0 %v2551_v49 }
0x2991   :  { %2474 = vmatprep.subr.bf16.mxu0 %v2815_v1 }
0x2994   :  { %2475 = vmatpush3.bf16.msra.mxu0 %v2552_v8 }
0x2995   :  { %2476 = vmatprep.subr.bf16.mxu0 %v2815_v1 }
0x2996   :  { %v2675_v44 = vpop.eup %2674 }
0x2997   :  { %v2677_v63 = vpop.eup %2676  ;;  %2095 = vrot.lane.b32.xlu0 %v2675_v44, %s2817_s4  ;;  %v2086_v34 = vmul.f32 0.5, %v2675_v44  ;;  %v2553_v44 = vld [vmem:[%s3564_s9 + $0x18] sm:$0xff]  }
0x2998   :  { %2109 = vrot.lane.b32.xlu1 %v2677_v63, %s2817_s4  ;;  %v2088_v25 = vmul.f32 0.5, %v2677_v63  ;;  %2477 = vmatpush3.bf16.msra.mxu0 %v2553_v44  ;;  %v2554_v63 = vld [vmem:[%s3564_s9 + $0x20] sm:$0xff]  }
0x2999   :  { %v2087_v26 = vadd.f32 0.5, %v2086_v34  ;;  %2478 = vmatprep.subr.bf16.mxu0 %v2815_v1  ;;  %v2555_v34 = vld [vmem:[%s3564_s9 + $0x28] sm:$0xff]  }
0x299a   :  { %v2089_v17 = vadd.f32 0.5, %v2088_v25 }
0x299b   :  { %v2093_v61 = vmul.f32 %v2091_v59, %v2087_v26 }
0x299c   :  { %v2107_v36 = vmul.f32 %v2105_v60, %v2089_v17  ;;  %2479 = vmatpush3.bf16.msra.mxu0 %v2554_v63 }
0x299d   :  { %2480 = vmatprep.subr.bf16.mxu0 %v2815_v1 }
0x29a0   :  { %2481 = vmatpush3.bf16.msra.mxu0 %v2555_v34 }
0x29a1   :  { %2482 = vmatprep.subr.bf16.mxu0 %v2815_v1 }
0x29a4   :  { %2483 = vmatpush3.bf16.msra.mxu0 %v2556_v27 }
0x29a5   :  { %2484 = vmatprep.subr.bf16.mxu0 %v2815_v1 }
0x2a09   :  { %v2096_v48 = vpop.permute.xlu0 %2095 }
0x2a0a   :  { %v2098_v55 = vmul.f32 %v2096_v48, %v2087_v26  ;;  %v2110_v57 = vpop.permute.xlu1 %2109 }
0x2a0b   :  { %v2112_v58 = vmul.f32 %v2110_v57, %v2089_v17 }
0x2a0c   :  { %2100 = vrot.lane.b32.xlu0 %v2098_v55, %s2817_s4 }
0x2a0d   :  { %2114 = vrot.lane.b32.xlu1 %v2112_v58, %s2817_s4 }
0x2a7e   :  { %v2101_v62 = vpop.permute.xlu0 %2100 }
0x2a7f   :  { %v2103_v2 = vadd.f32 %v2101_v62, %v2093_v61  ;;  %v2115_v14 = vpop.permute.xlu1 %2114  ;;  %v2435_v62 = vld [vmem:[#allocation9] ss:$0 sm:$0xff] }
0x2a80   :  { %v2117_v50 = vadd.f32 %v2115_v14, %v2107_v36 }
0x2a81   :  { %2678 = vtanh.f32 %v2103_v2  ;;  %v2199_v32 = vrot.slane %v2103_v2, 6 }
0x2a82   :  { %2680 = vtanh.f32 %v2117_v50 }
0x2a8b   :  { %v2679_v0 = vpop.eup %2678 }
0x2a8c   :  { %v2681_v21 = vpop.eup %2680  ;;  %2120 = vrot.lane.b32.xlu0 %v2679_v0, %s2817_s4 }
0x2a8d   :  { %2126 = vrot.lane.b32.xlu1 %v2681_v21, %s2817_s4 }
0x2afe   :  { %v2121_v22 = vpop.permute.xlu0 %2120 }
0x2aff   :  { %v2123_v16 = vmul.f32 %v2121_v22, %v2087_v26  ;;  %v2127_v23 = vpop.permute.xlu1 %2126 }
0x2b00   :  { %v2129_v12 = vmul.f32 %v2127_v23, %v2089_v17 }
0x2b01   :  { %2131 = vrot.lane.b32.xlu1 %v2123_v16, %s2819_s17 }
0x2b02   :  { %v2135_v24 = vrot.slane %v2129_v12, 6 }
0x2b04   :  { %2136 = vrot.lane.b32.xlu0 %v2135_v24, %s2818_s16 }
0x2b73   :  { %v2132_v3 = vpop.permute.xlu1 %2131 }
0x2b76   :  { %v2137_v4 = vpop.permute.xlu0 %2136 }
0x2b77   :  { %v2139_v5 = vsel %vm229_vm5, %v2132_v3, %v2137_v4 }
0x2b78   :  { %v2140_v6 = vpack.c.bf16 %v2139_v5, %v2139_v5 }
0x2b7a   :  { %v2142_v7 = vrot.slane %v2140_v6, 2 }
0x2b7c   :  { %2434 = vmatmul.mubr.msk.bf16.vlgmr.msra.gmra.mrb[40].mxu1 %vm324_vm7, %v2142_v7 }
0x2c4f   :  { %v2180_v9 = vpop.f32.mrb[40].mxu1 }
0x2c50   :  { %v2188_v10 = vrot.slane %v2180_v9, 2  ;;  %v2182_v11 = vpop.f32.mrb[41].mxu1 }
0x2c51   :  { %v2191_v13 = vadd.f32 %v2182_v11, %v3353_v19  ;;  %v2184_v15 = vpop.f32.mrb[42].mxu1 }
0x2c52   :  { %v2190_v18 = vadd.f32 %v2188_v10, %v3356_v46  ;;  %v2185_v20 = vpop.f32.mrb[43].mxu1  ;;  %v2213_v46 = vrot.slane %v2117_v50, 2 }
0x2c53   :  { %2682 = vtanh.f32 %v2191_v13 }
0x2c54   :  { %2684 = vtanh.f32 %v2190_v18 }
0x2c5d   :  { %v2683_v28 = vpop.eup %2682 }
0x2c5e   :  { %v2685_v29 = vpop.eup %2684  ;;  %2217 = vrot.lane.b32.xlu1 %v2683_v28, %s2817_s4  ;;  %v2196_v30 = vmul.f32 0.5, %v2683_v28 }
0x2c5f   :  { %2203 = vrot.lane.b32.xlu0 %v2685_v29, %s2817_s4  ;;  %v2194_v41 = vmul.f32 0.5, %v2685_v29 }
0x2c60   :  { %v2197_v38 = vadd.f32 0.5, %v2196_v30 }
0x2c61   :  { %v2195_v31 = vadd.f32 0.5, %v2194_v41 }
0x2c62   :  { %v2215_v33 = vmul.f32 %v2213_v46, %v2197_v38 }
0x2c63   :  { %v2201_v37 = vmul.f32 %v2199_v32, %v2195_v31 }
0x2cd0   :  { %v2218_v39 = vpop.permute.xlu1 %2217 }
0x2cd1   :  { %v2220_v52 = vmul.f32 %v2218_v39, %v2197_v38  ;;  %v2204_v56 = vpop.permute.xlu0 %2203 }
0x2cd2   :  { %v2206_v19 = vmul.f32 %v2204_v56, %v2195_v31 }
0x2cd3   :  { %2222 = vrot.lane.b32.xlu1 %v2220_v52, %s2817_s4 }
0x2cd4   :  { %2208 = vrot.lane.b32.xlu0 %v2206_v19, %s2817_s4 }
0x2d45   :  { %v2223_v35 = vpop.permute.xlu1 %2222 }
0x2d46   :  { %v2225_v40 = vadd.f32 %v2223_v35, %v2215_v33  ;;  %v2209_v42 = vpop.permute.xlu0 %2208 }
0x2d47   :  { %v2211_v43 = vadd.f32 %v2209_v42, %v2201_v37 }
0x2d48   :  { %2686 = vtanh.f32 %v2225_v40 }
0x2d49   :  { %2688 = vtanh.f32 %v2211_v43 }
0x2d52   :  { %v2687_v51 = vpop.eup %2686 }
0x2d53   :  { %v2689_v45 = vpop.eup %2688  ;;  %2234 = vrot.lane.b32.xlu1 %v2687_v51, %s2817_s4 }
0x2d54   :  { %2228 = vrot.lane.b32.xlu0 %v2689_v45, %s2817_s4 }
0x2d58   :  { %2245 = vrot.lane.b32.xlu0 %v1479_v53, %s2817_s4  ;;  %v2557_v53 = vld [vmem:[%s3564_s9 + $0x38] sm:$0xff]   ;;  %s2820_s9 = smov [#allocation11]  }
0x2d59   :  { %2485 = vmatpush3.bf16.msra.mxu0 %v2557_v53  ;;  %s2372_s18 = sshll.u32 %s2820_s9, 4  ;;  %s2373_s18 = int_to_ptr.vmem [resolvable:$true] %s2372_s18 }
0x2d5a   :  { %p2783_p5 = scmp.lt.s32.totalorder %s2373_s18, %s2373_s18 }
0x2dc5   :  { %v2235_v25 = vpop.permute.xlu1 %2234 }
0x2dc6   :  { %v2237_v26 = vmul.f32 %v2235_v25, %v2197_v38  ;;  %v2229_v48 = vpop.permute.xlu0 %2228 }
0x2dc7   :  { %v2231_v17 = vmul.f32 %v2229_v48, %v2195_v31 }
0x2dc8   :  { %2239 = vrot.lane.b32.xlu1 %v2237_v26, %s2818_s16  ;;  %s2778_s16 = scalar_lea.vmem %s2373_s18, 32 }
0x2dc9   :  { %v2243_v55 = vrot.slane %v2231_v17, 6  ;;  %p2779_p4 = scmp.ne.s32.totalorder %s2373_s18, %s2778_s16  ;;  %p2784_p6 = scmp.lt.s32.totalorder %s2778_s16, %s2778_s16 }
0x2dca   :  { %v2246_v59 = vpop.permute.xlu0 %2245 }
0x2dcb   :  { %p2785_p7 = por %p2784_p6, %p2783_p5 }
0x2dcd   :  { %p2786_p8 = pnand %p2785_p7, %p2779_p4 }
0x2e3a   :  { %v2240_v57 = vpop.permute.xlu1 %2239 }
0x2e3b   :  { %v2248_v58 = vsel %vm229_vm5, %v3374_v54, %v2240_v57 }
0x2e3c   :  { %v2249_v1 = vsel %vm324_vm7, %v2248_v58, %v2243_v55 }
0x2e3d   :  { %v2251_v60 = vsel %vm2250_vm15, %v2249_v1, %v2246_v59 }
0x2e3e   :  { %v2252_v61 = vpack.c.bf16 %v2251_v60, %v2251_v60 }
0x2e40   :  { %2487 = vmatmul.mubr.bf16.vlgmr.msra.gmra.mrb[32].mxu0 %v2252_v61 }
0x2f13   :  { %v2358_v36 = vpop.f32.mrb[32].mxu0 }
0x2f14   :  { %v2359_v2 = vadd.f32 %v2435_v62, %v2358_v36  ;;  %v2488_v14 = vpop.f32.mrb[33].mxu0 }
0x2f15   :  { %v2361_v50 = vpop.f32.mrb[34].mxu0 }
0x2f16   :  { %v2489_v0 = vpop.f32.mrb[35].mxu0  ;;  %2365 = vst.msk [vmem:[#allocation11] sm:$0x3] %vm2364_vm0, %v2359_v2 }
0x2f17   :  { %2789 = shalt.err (!%p2786_p8)
}
0x2f18   :  { %s2790_s26 = scalar_lea.hbm %s3566_s11, 32 }
0x2f19   :  { %p2791_p9 = scmp.ne.s32.totalorder %s3566_s11, %s2790_s26  ;;  %p2794_p10 = scmp.lt.u32.totalorder %s2790_s26, %s3566_s11 }
0x2f1b   :  { %p2796_p11 = pnand %p2794_p10, %p2791_p9 }
0x2f1d   :  { %2799 = shalt.err (!%p2796_p11)
}
0x2f1e   :  { %2375 = dma.vmem_to_hbm [thread:$0]  %s2373_s18, 32, %s3566_s11, [#allocation5]  }
0x2f1f   :  { %2806 = dma.done.wait [#allocation5], 32  }
0x2f20   :  { %2807 = vsyncadd [#allocation5], 4294967264 }
0x2f21   :  { %2379 = vsyncpa [#allocation4], 1 }
0x2f22   :  { %2380 = vsyncpa [#allocation7], 1 }
0x2f23   :  { %2381 = vsyncpa [#allocation10], 1 }
0x2f24   :  { %2382 = vsyncpa [#allocation5], 1 }

</bundles_post_ra>
